<compile_context>
chip_gen: v7x
topology: tpu7x:2x2x1
jax: 0.10.0
libtpu: 0.0.40
codegen_flags: <defaults>
</compile_context>

<pallas_src>
import functools

import jax
import jax.numpy as jnp
from jax.experimental import pallas as pl
from jax.experimental.pallas import tpu as pltpu


# ----------------------------- Pallas kernel -------------------------------

def _bilstm_fused_kernel(T, B, H, C,
                         x_ref,
                         wih1_ref, whhf1_ref, whhb1_ref, b1_ref,
                         wih2_ref, whhf2_ref, whhb2_ref, b2_ref,
                         fcw_ref, fcb_ref,
                         out_ref, out1_scr):
    """Fused 2-layer bidirectional LSTM + linear head.

    x_ref     : (T*B, Din)  time-major, flattened over (T, B)
    wih*_ref  : (Din, 8H)   [W_ih_fwd^T | W_ih_bwd^T]       (Din = 2H for layer 2)
    whhf*_ref : (H, 4H)     W_hh_fwd^T
    whhb*_ref : (H, 4H)     W_hh_bwd^T
    b*_ref    : (1, 8H)     [b_ih_f + b_hh_f | b_ih_b + b_hh_b]
    fcw_ref   : (2H, C), fcb_ref : (1, C)
    out_ref   : (B, C)
    out1_scr  : (T*B, 2H)   VMEM scratch holding layer-1 bidirectional output
    """
    f32 = jnp.float32
    G = 4 * H

    def cell(gates, c):
        # PyTorch gate order: i, f, g, o
        i = jax.nn.sigmoid(gates[:, 0 * H:1 * H])
        f = jax.nn.sigmoid(gates[:, 1 * H:2 * H])
        g = jnp.tanh(gates[:, 2 * H:3 * H])
        o = jax.nn.sigmoid(gates[:, 3 * H:4 * H])
        c_new = f * c + i * g
        h_new = o * jnp.tanh(c_new)
        return h_new, c_new

    zeros = jnp.zeros((B, H), f32)

    # ------------------------------ layer 1 --------------------------------
    # Hoisted input projection: ONE matmul for all time steps and BOTH
    # directions; bias broadcast happens once, outside the recurrence.
    gates1 = (jnp.dot(x_ref[...], wih1_ref[...], preferred_element_type=f32)
              + b1_ref[...])                                        # (T*B, 8H)

    h_f, c_f, h_b, c_b = zeros, zeros, zeros, zeros
    for s in range(T):                    # static unroll: T is small & static
        rf = s * B                        # forward consumes time s
        rb = (T - 1 - s) * B              # backward consumes time T-1-s
        rec_f = jnp.dot(h_f, whhf1_ref[...], preferred_element_type=f32)
        rec_b = jnp.dot(h_b, whhb1_ref[...], preferred_element_type=f32)
        h_f, c_f = cell(gates1[rf:rf + B, 0:G] + rec_f, c_f)
        h_b, c_b = cell(gates1[rb:rb + B, G:2 * G] + rec_b, c_b)
        out1_scr[rf:rf + B, 0:H] = h_f        # fwd output at position s
        out1_scr[rb:rb + B, H:2 * H] = h_b    # bwd output at position T-1-s

    # ------------------------------ layer 2 --------------------------------
    gates2 = (jnp.dot(out1_scr[...], wih2_ref[...], preferred_element_type=f32)
              + b2_ref[...])                                        # (T*B, 8H)

    h_f, c_f, h_b, c_b = zeros, zeros, zeros, zeros
    h_b_last = zeros
    for s in range(T):
        rf = s * B
        rb = (T - 1 - s) * B
        rec_f = jnp.dot(h_f, whhf2_ref[...], preferred_element_type=f32)
        rec_b = jnp.dot(h_b, whhb2_ref[...], preferred_element_type=f32)
        h_f, c_f = cell(gates2[rf:rf + B, 0:G] + rec_f, c_f)
        h_b, c_b = cell(gates2[rb:rb + B, G:2 * G] + rec_b, c_b)
        if s == 0:
            # backward hidden at output position T-1 == its first step (PyTorch)
            h_b_last = h_b

    # --------------------------- fused FC head -----------------------------
    # out = h_f @ fcw[:H] + h_b_last @ fcw[H:] + fcb   (no concat needed)
    out_ref[...] = (jnp.dot(h_f, fcw_ref[0:H, :], preferred_element_type=f32)
                    + jnp.dot(h_b_last, fcw_ref[H:2 * H, :],
                              preferred_element_type=f32)
                    + fcb_ref[...]).astype(out_ref.dtype)


# ----------------------------- JAX wrappers --------------------------------

def _pack_layer(params_fwd, params_bwd, H):
    """Pack one bidirectional layer's PyTorch-shaped weights for the kernel."""
    w_ih_f, w_hh_f, b_ih_f, b_hh_f = params_fwd
    w_ih_b, w_hh_b, b_ih_b, b_hh_b = params_bwd
    wih = jnp.concatenate([w_ih_f.T, w_ih_b.T], axis=1)             # (Din, 8H)
    whh_f = w_hh_f.T                                                # (H, 4H)
    whh_b = w_hh_b.T                                                # (H, 4H)
    b = jnp.concatenate([b_ih_f + b_hh_f, b_ih_b + b_hh_b]).reshape(1, 8 * H)
    return wih, whh_f, whh_b, b


def bi_lstm_forward(x, params):
    """Equivalent of Bi_LSTM.forward.  x: (B, T, input_size) -> (B, num_classes)."""
    assert len(params["lstm"]) == 2, "fused kernel implements num_layers == 2"
    B, T, Din = x.shape
    H = params["lstm"][0]["fwd"][1].shape[1]
    C = params["fc_w"].shape[0]

    x_flat = jnp.transpose(x, (1, 0, 2)).reshape(T * B, Din)   # time-major, flat

    wih1, whhf1, whhb1, b1 = _pack_layer(params["lstm"][0]["fwd"],
                                         params["lstm"][0]["bwd"], H)
    wih2, whhf2, whhb2, b2 = _pack_layer(params["lstm"][1]["fwd"],
                                         params["lstm"][1]["bwd"], H)
    fcw = jnp.transpose(params["fc_w"])                        # (2H, C)
    fcb = params["fc_b"].reshape(1, C)

    kernel = functools.partial(_bilstm_fused_kernel, T, B, H, C)
    return pl.pallas_call(
        kernel,
        out_shape=jax.ShapeDtypeStruct((B, C), jnp.float32),
        in_specs=[pl.BlockSpec(memory_space=pltpu.MemorySpace.VMEM)] * 11,
        out_specs=pl.BlockSpec(memory_space=pltpu.MemorySpace.VMEM),
        scratch_shapes=[pltpu.VMEM((T * B, 2 * H), jnp.float32)],
    )(x_flat, wih1, whhf1, whhb1, b1, wih2, whhf2, whhb2, b2, fcw, fcb)


# ------------------------- pure-JAX reference ------------------------------

def _lstm_dir_ref(x_tbd, w_ih, w_hh, b_ih, b_hh):
    T, B, _ = x_tbd.shape
    H = w_hh.shape[1]

    def step(carry, x_t):
        h, c = carry
        gates = x_t @ w_ih.T + h @ w_hh.T + b_ih + b_hh
        i = jax.nn.sigmoid(gates[:, 0 * H:1 * H])
        f = jax.nn.sigmoid(gates[:, 1 * H:2 * H])
        g = jnp.tanh(gates[:, 2 * H:3 * H])
        o = jax.nn.sigmoid(gates[:, 3 * H:4 * H])
        c = f * c + i * g
        h = o * jnp.tanh(c)
        return (h, c), h

    h0 = jnp.zeros((B, H), jnp.float32)
    c0 = jnp.zeros((B, H), jnp.float32)
    _, out = jax.lax.scan(step, (h0, c0), x_tbd)
    return out


def bi_lstm_reference(x, params):
    h = jnp.transpose(x, (1, 0, 2))
    for layer in params["lstm"]:
        out_f = _lstm_dir_ref(h, *layer["fwd"])
        out_b = _lstm_dir_ref(h[::-1], *layer["bwd"])[::-1]
        h = jnp.concatenate([out_f, out_b], axis=-1)
    last = h[-1]
    return last @ params["fc_w"].T + params["fc_b"]


# ----------------------------- parameter init ------------------------------

def init_params(key, input_size, hidden, num_layers, num_classes):
    params = {"lstm": []}
    in_sz = input_size
    k = key
    bound = 1.0 / (hidden ** 0.5)
    for _ in range(num_layers):
        layer = {}
        for d in ("fwd", "bwd"):
            k, k1, k2, k3, k4 = jax.random.split(k, 5)
            layer[d] = (
                jax.random.uniform(k1, (4 * hidden, in_sz), jnp.float32, -bound, bound),
                jax.random.uniform(k2, (4 * hidden, hidden), jnp.float32, -bound, bound),
                jax.random.uniform(k3, (4 * hidden,), jnp.float32, -bound, bound),
                jax.random.uniform(k4, (4 * hidden,), jnp.float32, -bound, bound),
            )
        params["lstm"].append(layer)
        in_sz = 2 * hidden
    k, k1, k2 = jax.random.split(k, 3)
    fb = 1.0 / ((2 * hidden) ** 0.5)
    params["fc_w"] = jax.random.uniform(k1, (num_classes, 2 * hidden), jnp.float32, -fb, fb)
    params["fc_b"] = jax.random.uniform(k2, (num_classes,), jnp.float32, -fb, fb)
    return params


# --------------------------------- main -------------------------------------

if __name__ == "__main__":
    # small, module-consistent shapes (hidden=32 -> 4H=128, 8H=256 lanes)
    input_size = 28
    hidden_size = 32
    num_layers = 2
    num_classes = 10
    batch, seq = 2, 8

    key = jax.random.PRNGKey(0)
    k_x, k_p = jax.random.split(key)
    x = jax.random.normal(k_x, (batch, seq, input_size), dtype=jnp.float32)
    params = init_params(k_p, input_size, hidden_size, num_layers, num_classes)

    out = jax.jit(bi_lstm_forward)(x, params)
    out = jax.block_until_ready(out)
    assert out.shape == (batch, num_classes)

    ref = bi_lstm_reference(x, params)
    err = float(jnp.max(jnp.abs(out - ref)))
    assert err < 1e-2, f"kernel/reference mismatch: {err}"

    print("KERNEL_OK")
</pallas_src>

<mosaic_0001>
module attributes {stable_mosaic.version = 11 : i64} {
  func.func @_bilstm_fused_kernel(%arg0: memref<16x28xf32, #tpu.memory_space<vmem>>, %arg1: memref<28x256xf32, #tpu.memory_space<vmem>>, %arg2: memref<32x128xf32, #tpu.memory_space<vmem>>, %arg3: memref<32x128xf32, #tpu.memory_space<vmem>>, %arg4: memref<1x256xf32, #tpu.memory_space<vmem>>, %arg5: memref<64x256xf32, #tpu.memory_space<vmem>>, %arg6: memref<32x128xf32, #tpu.memory_space<vmem>>, %arg7: memref<32x128xf32, #tpu.memory_space<vmem>>, %arg8: memref<1x256xf32, #tpu.memory_space<vmem>>, %arg9: memref<64x10xf32, #tpu.memory_space<vmem>>, %arg10: memref<1x10xf32, #tpu.memory_space<vmem>>, %arg11: memref<2x10xf32, #tpu.memory_space<vmem>>, %arg12: memref<16x64xf32, #tpu.memory_space<vmem>>) attributes {dimension_semantics = [], scalar_prefetch = 0 : i64, scratch_operands = 1 : i64, tpu.core_type = #tpu.core_type<tc>} {
    %cst = arith.constant 0.000000e+00 : f32
    %0 = vector.broadcast %cst : f32 to vector<2x32xf32>
    %c0 = arith.constant 0 : index
    %c0_0 = arith.constant 0 : index
    %1 = vector.load %arg0[%c0, %c0_0] : memref<16x28xf32, #tpu.memory_space<vmem>>, vector<16x28xf32>
    %c0_1 = arith.constant 0 : index
    %c0_2 = arith.constant 0 : index
    %2 = vector.load %arg1[%c0_1, %c0_2] : memref<28x256xf32, #tpu.memory_space<vmem>>, vector<28x256xf32>
    %cst_3 = arith.constant dense<0.000000e+00> : vector<16x256xf32>
    %3 = tpu.matmul %1, %2, %cst_3 {dimension_numbers = #tpu.dot_dimension_numbers<[1], [0], [0], [1], [0, 0, 1, 1], [], []>} : vector<16x28xf32>, vector<28x256xf32>, vector<16x256xf32> -> vector<16x256xf32>
    %c0_4 = arith.constant 0 : index
    %c0_5 = arith.constant 0 : index
    %4 = vector.load %arg4[%c0_4, %c0_5] : memref<1x256xf32, #tpu.memory_space<vmem>>, vector<1x256xf32>
    %5 = vector.broadcast %4 : vector<1x256xf32> to vector<16x256xf32>
    %6 = arith.addf %3, %5 : vector<16x256xf32>
    %c0_6 = arith.constant 0 : index
    %c0_7 = arith.constant 0 : index
    %7 = vector.load %arg2[%c0_6, %c0_7] : memref<32x128xf32, #tpu.memory_space<vmem>>, vector<32x128xf32>
    %cst_8 = arith.constant dense<0.000000e+00> : vector<2x128xf32>
    %8 = tpu.matmul %0, %7, %cst_8 {dimension_numbers = #tpu.dot_dimension_numbers<[1], [0], [0], [1], [0, 0, 1, 1], [], []>} : vector<2x32xf32>, vector<32x128xf32>, vector<2x128xf32> -> vector<2x128xf32>
    %c0_9 = arith.constant 0 : index
    %c0_10 = arith.constant 0 : index
    %9 = vector.load %arg3[%c0_9, %c0_10] : memref<32x128xf32, #tpu.memory_space<vmem>>, vector<32x128xf32>
    %cst_11 = arith.constant dense<0.000000e+00> : vector<2x128xf32>
    %10 = tpu.matmul %0, %9, %cst_11 {dimension_numbers = #tpu.dot_dimension_numbers<[1], [0], [0], [1], [0, 0, 1, 1], [], []>} : vector<2x32xf32>, vector<32x128xf32>, vector<2x128xf32> -> vector<2x128xf32>
    %11 = vector.extract_strided_slice %6 {offsets = [0, 0], sizes = [2, 128], strides = [1, 1]} : vector<16x256xf32> to vector<2x128xf32>
    %12 = arith.addf %11, %8 : vector<2x128xf32>
    %13 = vector.extract_strided_slice %12 {offsets = [0, 0], sizes = [2, 32], strides = [1, 1]} : vector<2x128xf32> to vector<2x32xf32>
    %14 = arith.negf %13 : vector<2x32xf32>
    %15 = math.exp %14 : vector<2x32xf32>
    %cst_12 = arith.constant 1.000000e+00 : f32
    %16 = vector.broadcast %cst_12 : f32 to vector<2x32xf32>
    %17 = arith.addf %16, %15 : vector<2x32xf32>
    %18 = arith.divf %16, %17 : vector<2x32xf32>
    %19 = vector.extract_strided_slice %12 {offsets = [0, 32], sizes = [2, 32], strides = [1, 1]} : vector<2x128xf32> to vector<2x32xf32>
    %20 = arith.negf %19 : vector<2x32xf32>
    %21 = math.exp %20 : vector<2x32xf32>
    %cst_13 = arith.constant 1.000000e+00 : f32
    %22 = vector.broadcast %cst_13 : f32 to vector<2x32xf32>
    %23 = arith.addf %22, %21 : vector<2x32xf32>
    %24 = arith.divf %22, %23 : vector<2x32xf32>
    %25 = vector.extract_strided_slice %12 {offsets = [0, 64], sizes = [2, 32], strides = [1, 1]} : vector<2x128xf32> to vector<2x32xf32>
    %26 = math.tanh %25 : vector<2x32xf32>
    %27 = vector.extract_strided_slice %12 {offsets = [0, 96], sizes = [2, 32], strides = [1, 1]} : vector<2x128xf32> to vector<2x32xf32>
    %28 = arith.negf %27 : vector<2x32xf32>
    %29 = math.exp %28 : vector<2x32xf32>
    %cst_14 = arith.constant 1.000000e+00 : f32
    %30 = vector.broadcast %cst_14 : f32 to vector<2x32xf32>
    %31 = arith.addf %30, %29 : vector<2x32xf32>
    %32 = arith.divf %30, %31 : vector<2x32xf32>
    %33 = arith.mulf %24, %0 : vector<2x32xf32>
    %34 = arith.mulf %18, %26 : vector<2x32xf32>
    %35 = arith.addf %33, %34 : vector<2x32xf32>
    %36 = math.tanh %35 : vector<2x32xf32>
    %37 = arith.mulf %32, %36 : vector<2x32xf32>
    %38 = vector.extract_strided_slice %6 {offsets = [14, 128], sizes = [2, 128], strides = [1, 1]} : vector<16x256xf32> to vector<2x128xf32>
    %39 = arith.addf %38, %10 : vector<2x128xf32>
    %40 = vector.extract_strided_slice %39 {offsets = [0, 0], sizes = [2, 32], strides = [1, 1]} : vector<2x128xf32> to vector<2x32xf32>
    %41 = arith.negf %40 : vector<2x32xf32>
    %42 = math.exp %41 : vector<2x32xf32>
    %cst_15 = arith.constant 1.000000e+00 : f32
    %43 = vector.broadcast %cst_15 : f32 to vector<2x32xf32>
    %44 = arith.addf %43, %42 : vector<2x32xf32>
    %45 = arith.divf %43, %44 : vector<2x32xf32>
    %46 = vector.extract_strided_slice %39 {offsets = [0, 32], sizes = [2, 32], strides = [1, 1]} : vector<2x128xf32> to vector<2x32xf32>
    %47 = arith.negf %46 : vector<2x32xf32>
    %48 = math.exp %47 : vector<2x32xf32>
    %cst_16 = arith.constant 1.000000e+00 : f32
    %49 = vector.broadcast %cst_16 : f32 to vector<2x32xf32>
    %50 = arith.addf %49, %48 : vector<2x32xf32>
    %51 = arith.divf %49, %50 : vector<2x32xf32>
    %52 = vector.extract_strided_slice %39 {offsets = [0, 64], sizes = [2, 32], strides = [1, 1]} : vector<2x128xf32> to vector<2x32xf32>
    %53 = math.tanh %52 : vector<2x32xf32>
    %54 = vector.extract_strided_slice %39 {offsets = [0, 96], sizes = [2, 32], strides = [1, 1]} : vector<2x128xf32> to vector<2x32xf32>
    %55 = arith.negf %54 : vector<2x32xf32>
    %56 = math.exp %55 : vector<2x32xf32>
    %cst_17 = arith.constant 1.000000e+00 : f32
    %57 = vector.broadcast %cst_17 : f32 to vector<2x32xf32>
    %58 = arith.addf %57, %56 : vector<2x32xf32>
    %59 = arith.divf %57, %58 : vector<2x32xf32>
    %60 = arith.mulf %51, %0 : vector<2x32xf32>
    %61 = arith.mulf %45, %53 : vector<2x32xf32>
    %62 = arith.addf %60, %61 : vector<2x32xf32>
    %63 = math.tanh %62 : vector<2x32xf32>
    %64 = arith.mulf %59, %63 : vector<2x32xf32>
    %c0_18 = arith.constant 0 : index
    %c0_19 = arith.constant 0 : index
    %65 = vector.load %arg12[%c0_18, %c0_19] : memref<16x64xf32, #tpu.memory_space<vmem>>, vector<2x32xf32>
    tpu.vector_store %arg12[%c0_18, %c0_19], %37 {strides = array<i32>} : memref<16x64xf32, #tpu.memory_space<vmem>>, vector<2x32xf32>,
    %c14 = arith.constant 14 : index
    %c32 = arith.constant 32 : index
    %66 = vector.load %arg12[%c14, %c32] : memref<16x64xf32, #tpu.memory_space<vmem>>, vector<2x32xf32>
    tpu.vector_store %arg12[%c14, %c32], %64 {strides = array<i32>} : memref<16x64xf32, #tpu.memory_space<vmem>>, vector<2x32xf32>,
    %c0_20 = arith.constant 0 : index
    %c0_21 = arith.constant 0 : index
    %67 = vector.load %arg2[%c0_20, %c0_21] : memref<32x128xf32, #tpu.memory_space<vmem>>, vector<32x128xf32>
    %cst_22 = arith.constant dense<0.000000e+00> : vector<2x128xf32>
    %68 = tpu.matmul %37, %67, %cst_22 {dimension_numbers = #tpu.dot_dimension_numbers<[1], [0], [0], [1], [0, 0, 1, 1], [], []>} : vector<2x32xf32>, vector<32x128xf32>, vector<2x128xf32> -> vector<2x128xf32>
    %c0_23 = arith.constant 0 : index
    %c0_24 = arith.constant 0 : index
    %69 = vector.load %arg3[%c0_23, %c0_24] : memref<32x128xf32, #tpu.memory_space<vmem>>, vector<32x128xf32>
    %cst_25 = arith.constant dense<0.000000e+00> : vector<2x128xf32>
    %70 = tpu.matmul %64, %69, %cst_25 {dimension_numbers = #tpu.dot_dimension_numbers<[1], [0], [0], [1], [0, 0, 1, 1], [], []>} : vector<2x32xf32>, vector<32x128xf32>, vector<2x128xf32> -> vector<2x128xf32>
    %71 = vector.extract_strided_slice %6 {offsets = [2, 0], sizes = [2, 128], strides = [1, 1]} : vector<16x256xf32> to vector<2x128xf32>
    %72 = arith.addf %71, %68 : vector<2x128xf32>
    %73 = vector.extract_strided_slice %72 {offsets = [0, 0], sizes = [2, 32], strides = [1, 1]} : vector<2x128xf32> to vector<2x32xf32>
    %74 = arith.negf %73 : vector<2x32xf32>
    %75 = math.exp %74 : vector<2x32xf32>
    %cst_26 = arith.constant 1.000000e+00 : f32
    %76 = vector.broadcast %cst_26 : f32 to vector<2x32xf32>
    %77 = arith.addf %76, %75 : vector<2x32xf32>
    %78 = arith.divf %76, %77 : vector<2x32xf32>
    %79 = vector.extract_strided_slice %72 {offsets = [0, 32], sizes = [2, 32], strides = [1, 1]} : vector<2x128xf32> to vector<2x32xf32>
    %80 = arith.negf %79 : vector<2x32xf32>
    %81 = math.exp %80 : vector<2x32xf32>
    %cst_27 = arith.constant 1.000000e+00 : f32
    %82 = vector.broadcast %cst_27 : f32 to vector<2x32xf32>
    %83 = arith.addf %82, %81 : vector<2x32xf32>
    %84 = arith.divf %82, %83 : vector<2x32xf32>
    %85 = vector.extract_strided_slice %72 {offsets = [0, 64], sizes = [2, 32], strides = [1, 1]} : vector<2x128xf32> to vector<2x32xf32>
    %86 = math.tanh %85 : vector<2x32xf32>
    %87 = vector.extract_strided_slice %72 {offsets = [0, 96], sizes = [2, 32], strides = [1, 1]} : vector<2x128xf32> to vector<2x32xf32>
    %88 = arith.negf %87 : vector<2x32xf32>
    %89 = math.exp %88 : vector<2x32xf32>
    %cst_28 = arith.constant 1.000000e+00 : f32
    %90 = vector.broadcast %cst_28 : f32 to vector<2x32xf32>
    %91 = arith.addf %90, %89 : vector<2x32xf32>
    %92 = arith.divf %90, %91 : vector<2x32xf32>
    %93 = arith.mulf %84, %35 : vector<2x32xf32>
    %94 = arith.mulf %78, %86 : vector<2x32xf32>
    %95 = arith.addf %93, %94 : vector<2x32xf32>
    %96 = math.tanh %95 : vector<2x32xf32>
    %97 = arith.mulf %92, %96 : vector<2x32xf32>
    %98 = vector.extract_strided_slice %6 {offsets = [12, 128], sizes = [2, 128], strides = [1, 1]} : vector<16x256xf32> to vector<2x128xf32>
    %99 = arith.addf %98, %70 : vector<2x128xf32>
    %100 = vector.extract_strided_slice %99 {offsets = [0, 0], sizes = [2, 32], strides = [1, 1]} : vector<2x128xf32> to vector<2x32xf32>
    %101 = arith.negf %100 : vector<2x32xf32>
    %102 = math.exp %101 : vector<2x32xf32>
    %cst_29 = arith.constant 1.000000e+00 : f32
    %103 = vector.broadcast %cst_29 : f32 to vector<2x32xf32>
    %104 = arith.addf %103, %102 : vector<2x32xf32>
    %105 = arith.divf %103, %104 : vector<2x32xf32>
    %106 = vector.extract_strided_slice %99 {offsets = [0, 32], sizes = [2, 32], strides = [1, 1]} : vector<2x128xf32> to vector<2x32xf32>
    %107 = arith.negf %106 : vector<2x32xf32>
    %108 = math.exp %107 : vector<2x32xf32>
    %cst_30 = arith.constant 1.000000e+00 : f32
    %109 = vector.broadcast %cst_30 : f32 to vector<2x32xf32>
    %110 = arith.addf %109, %108 : vector<2x32xf32>
    %111 = arith.divf %109, %110 : vector<2x32xf32>
    %112 = vector.extract_strided_slice %99 {offsets = [0, 64], sizes = [2, 32], strides = [1, 1]} : vector<2x128xf32> to vector<2x32xf32>
    %113 = math.tanh %112 : vector<2x32xf32>
    %114 = vector.extract_strided_slice %99 {offsets = [0, 96], sizes = [2, 32], strides = [1, 1]} : vector<2x128xf32> to vector<2x32xf32>
    %115 = arith.negf %114 : vector<2x32xf32>
    %116 = math.exp %115 : vector<2x32xf32>
    %cst_31 = arith.constant 1.000000e+00 : f32
    %117 = vector.broadcast %cst_31 : f32 to vector<2x32xf32>
    %118 = arith.addf %117, %116 : vector<2x32xf32>
    %119 = arith.divf %117, %118 : vector<2x32xf32>
    %120 = arith.mulf %111, %62 : vector<2x32xf32>
    %121 = arith.mulf %105, %113 : vector<2x32xf32>
    %122 = arith.addf %120, %121 : vector<2x32xf32>
    %123 = math.tanh %122 : vector<2x32xf32>
    %124 = arith.mulf %119, %123 : vector<2x32xf32>
    %c2 = arith.constant 2 : index
    %c0_32 = arith.constant 0 : index
    %125 = vector.load %arg12[%c2, %c0_32] : memref<16x64xf32, #tpu.memory_space<vmem>>, vector<2x32xf32>
    tpu.vector_store %arg12[%c2, %c0_32], %97 {strides = array<i32>} : memref<16x64xf32, #tpu.memory_space<vmem>>, vector<2x32xf32>,
    %c12 = arith.constant 12 : index
    %c32_33 = arith.constant 32 : index
    %126 = vector.load %arg12[%c12, %c32_33] : memref<16x64xf32, #tpu.memory_space<vmem>>, vector<2x32xf32>
    tpu.vector_store %arg12[%c12, %c32_33], %124 {strides = array<i32>} : memref<16x64xf32, #tpu.memory_space<vmem>>, vector<2x32xf32>,
    %c0_34 = arith.constant 0 : index
    %c0_35 = arith.constant 0 : index
    %127 = vector.load %arg2[%c0_34, %c0_35] : memref<32x128xf32, #tpu.memory_space<vmem>>, vector<32x128xf32>
    %cst_36 = arith.constant dense<0.000000e+00> : vector<2x128xf32>
    %128 = tpu.matmul %97, %127, %cst_36 {dimension_numbers = #tpu.dot_dimension_numbers<[1], [0], [0], [1], [0, 0, 1, 1], [], []>} : vector<2x32xf32>, vector<32x128xf32>, vector<2x128xf32> -> vector<2x128xf32>
    %c0_37 = arith.constant 0 : index
    %c0_38 = arith.constant 0 : index
    %129 = vector.load %arg3[%c0_37, %c0_38] : memref<32x128xf32, #tpu.memory_space<vmem>>, vector<32x128xf32>
    %cst_39 = arith.constant dense<0.000000e+00> : vector<2x128xf32>
    %130 = tpu.matmul %124, %129, %cst_39 {dimension_numbers = #tpu.dot_dimension_numbers<[1], [0], [0], [1], [0, 0, 1, 1], [], []>} : vector<2x32xf32>, vector<32x128xf32>, vector<2x128xf32> -> vector<2x128xf32>
    %131 = vector.extract_strided_slice %6 {offsets = [4, 0], sizes = [2, 128], strides = [1, 1]} : vector<16x256xf32> to vector<2x128xf32>
    %132 = arith.addf %131, %128 : vector<2x128xf32>
    %133 = vector.extract_strided_slice %132 {offsets = [0, 0], sizes = [2, 32], strides = [1, 1]} : vector<2x128xf32> to vector<2x32xf32>
    %134 = arith.negf %133 : vector<2x32xf32>
    %135 = math.exp %134 : vector<2x32xf32>
    %cst_40 = arith.constant 1.000000e+00 : f32
    %136 = vector.broadcast %cst_40 : f32 to vector<2x32xf32>
    %137 = arith.addf %136, %135 : vector<2x32xf32>
    %138 = arith.divf %136, %137 : vector<2x32xf32>
    %139 = vector.extract_strided_slice %132 {offsets = [0, 32], sizes = [2, 32], strides = [1, 1]} : vector<2x128xf32> to vector<2x32xf32>
    %140 = arith.negf %139 : vector<2x32xf32>
    %141 = math.exp %140 : vector<2x32xf32>
    %cst_41 = arith.constant 1.000000e+00 : f32
    %142 = vector.broadcast %cst_41 : f32 to vector<2x32xf32>
    %143 = arith.addf %142, %141 : vector<2x32xf32>
    %144 = arith.divf %142, %143 : vector<2x32xf32>
    %145 = vector.extract_strided_slice %132 {offsets = [0, 64], sizes = [2, 32], strides = [1, 1]} : vector<2x128xf32> to vector<2x32xf32>
    %146 = math.tanh %145 : vector<2x32xf32>
    %147 = vector.extract_strided_slice %132 {offsets = [0, 96], sizes = [2, 32], strides = [1, 1]} : vector<2x128xf32> to vector<2x32xf32>
    %148 = arith.negf %147 : vector<2x32xf32>
    %149 = math.exp %148 : vector<2x32xf32>
    %cst_42 = arith.constant 1.000000e+00 : f32
    %150 = vector.broadcast %cst_42 : f32 to vector<2x32xf32>
    %151 = arith.addf %150, %149 : vector<2x32xf32>
    %152 = arith.divf %150, %151 : vector<2x32xf32>
    %153 = arith.mulf %144, %95 : vector<2x32xf32>
    %154 = arith.mulf %138, %146 : vector<2x32xf32>
    %155 = arith.addf %153, %154 : vector<2x32xf32>
    %156 = math.tanh %155 : vector<2x32xf32>
    %157 = arith.mulf %152, %156 : vector<2x32xf32>
    %158 = vector.extract_strided_slice %6 {offsets = [10, 128], sizes = [2, 128], strides = [1, 1]} : vector<16x256xf32> to vector<2x128xf32>
    %159 = arith.addf %158, %130 : vector<2x128xf32>
    %160 = vector.extract_strided_slice %159 {offsets = [0, 0], sizes = [2, 32], strides = [1, 1]} : vector<2x128xf32> to vector<2x32xf32>
    %161 = arith.negf %160 : vector<2x32xf32>
    %162 = math.exp %161 : vector<2x32xf32>
    %cst_43 = arith.constant 1.000000e+00 : f32
    %163 = vector.broadcast %cst_43 : f32 to vector<2x32xf32>
    %164 = arith.addf %163, %162 : vector<2x32xf32>
    %165 = arith.divf %163, %164 : vector<2x32xf32>
    %166 = vector.extract_strided_slice %159 {offsets = [0, 32], sizes = [2, 32], strides = [1, 1]} : vector<2x128xf32> to vector<2x32xf32>
    %167 = arith.negf %166 : vector<2x32xf32>
    %168 = math.exp %167 : vector<2x32xf32>
    %cst_44 = arith.constant 1.000000e+00 : f32
    %169 = vector.broadcast %cst_44 : f32 to vector<2x32xf32>
    %170 = arith.addf %169, %168 : vector<2x32xf32>
    %171 = arith.divf %169, %170 : vector<2x32xf32>
    %172 = vector.extract_strided_slice %159 {offsets = [0, 64], sizes = [2, 32], strides = [1, 1]} : vector<2x128xf32> to vector<2x32xf32>
    %173 = math.tanh %172 : vector<2x32xf32>
    %174 = vector.extract_strided_slice %159 {offsets = [0, 96], sizes = [2, 32], strides = [1, 1]} : vector<2x128xf32> to vector<2x32xf32>
    %175 = arith.negf %174 : vector<2x32xf32>
    %176 = math.exp %175 : vector<2x32xf32>
    %cst_45 = arith.constant 1.000000e+00 : f32
    %177 = vector.broadcast %cst_45 : f32 to vector<2x32xf32>
    %178 = arith.addf %177, %176 : vector<2x32xf32>
    %179 = arith.divf %177, %178 : vector<2x32xf32>
    %180 = arith.mulf %171, %122 : vector<2x32xf32>
    %181 = arith.mulf %165, %173 : vector<2x32xf32>
    %182 = arith.addf %180, %181 : vector<2x32xf32>
    %183 = math.tanh %182 : vector<2x32xf32>
    %184 = arith.mulf %179, %183 : vector<2x32xf32>
    %c4 = arith.constant 4 : index
    %c0_46 = arith.constant 0 : index
    %185 = vector.load %arg12[%c4, %c0_46] : memref<16x64xf32, #tpu.memory_space<vmem>>, vector<2x32xf32>
    tpu.vector_store %arg12[%c4, %c0_46], %157 {strides = array<i32>} : memref<16x64xf32, #tpu.memory_space<vmem>>, vector<2x32xf32>,
    %c10 = arith.constant 10 : index
    %c32_47 = arith.constant 32 : index
    %186 = vector.load %arg12[%c10, %c32_47] : memref<16x64xf32, #tpu.memory_space<vmem>>, vector<2x32xf32>
    tpu.vector_store %arg12[%c10, %c32_47], %184 {strides = array<i32>} : memref<16x64xf32, #tpu.memory_space<vmem>>, vector<2x32xf32>,
    %c0_48 = arith.constant 0 : index
    %c0_49 = arith.constant 0 : index
    %187 = vector.load %arg2[%c0_48, %c0_49] : memref<32x128xf32, #tpu.memory_space<vmem>>, vector<32x128xf32>
    %cst_50 = arith.constant dense<0.000000e+00> : vector<2x128xf32>
    %188 = tpu.matmul %157, %187, %cst_50 {dimension_numbers = #tpu.dot_dimension_numbers<[1], [0], [0], [1], [0, 0, 1, 1], [], []>} : vector<2x32xf32>, vector<32x128xf32>, vector<2x128xf32> -> vector<2x128xf32>
    %c0_51 = arith.constant 0 : index
    %c0_52 = arith.constant 0 : index
    %189 = vector.load %arg3[%c0_51, %c0_52] : memref<32x128xf32, #tpu.memory_space<vmem>>, vector<32x128xf32>
    %cst_53 = arith.constant dense<0.000000e+00> : vector<2x128xf32>
    %190 = tpu.matmul %184, %189, %cst_53 {dimension_numbers = #tpu.dot_dimension_numbers<[1], [0], [0], [1], [0, 0, 1, 1], [], []>} : vector<2x32xf32>, vector<32x128xf32>, vector<2x128xf32> -> vector<2x128xf32>
    %191 = vector.extract_strided_slice %6 {offsets = [6, 0], sizes = [2, 128], strides = [1, 1]} : vector<16x256xf32> to vector<2x128xf32>
    %192 = arith.addf %191, %188 : vector<2x128xf32>
    %193 = vector.extract_strided_slice %192 {offsets = [0, 0], sizes = [2, 32], strides = [1, 1]} : vector<2x128xf32> to vector<2x32xf32>
    %194 = arith.negf %193 : vector<2x32xf32>
    %195 = math.exp %194 : vector<2x32xf32>
    %cst_54 = arith.constant 1.000000e+00 : f32
    %196 = vector.broadcast %cst_54 : f32 to vector<2x32xf32>
    %197 = arith.addf %196, %195 : vector<2x32xf32>
    %198 = arith.divf %196, %197 : vector<2x32xf32>
    %199 = vector.extract_strided_slice %192 {offsets = [0, 32], sizes = [2, 32], strides = [1, 1]} : vector<2x128xf32> to vector<2x32xf32>
    %200 = arith.negf %199 : vector<2x32xf32>
    %201 = math.exp %200 : vector<2x32xf32>
    %cst_55 = arith.constant 1.000000e+00 : f32
    %202 = vector.broadcast %cst_55 : f32 to vector<2x32xf32>
    %203 = arith.addf %202, %201 : vector<2x32xf32>
    %204 = arith.divf %202, %203 : vector<2x32xf32>
    %205 = vector.extract_strided_slice %192 {offsets = [0, 64], sizes = [2, 32], strides = [1, 1]} : vector<2x128xf32> to vector<2x32xf32>
    %206 = math.tanh %205 : vector<2x32xf32>
    %207 = vector.extract_strided_slice %192 {offsets = [0, 96], sizes = [2, 32], strides = [1, 1]} : vector<2x128xf32> to vector<2x32xf32>
    %208 = arith.negf %207 : vector<2x32xf32>
    %209 = math.exp %208 : vector<2x32xf32>
    %cst_56 = arith.constant 1.000000e+00 : f32
    %210 = vector.broadcast %cst_56 : f32 to vector<2x32xf32>
    %211 = arith.addf %210, %209 : vector<2x32xf32>
    %212 = arith.divf %210, %211 : vector<2x32xf32>
    %213 = arith.mulf %204, %155 : vector<2x32xf32>
    %214 = arith.mulf %198, %206 : vector<2x32xf32>
    %215 = arith.addf %213, %214 : vector<2x32xf32>
    %216 = math.tanh %215 : vector<2x32xf32>
    %217 = arith.mulf %212, %216 : vector<2x32xf32>
    %218 = vector.extract_strided_slice %6 {offsets = [8, 128], sizes = [2, 128], strides = [1, 1]} : vector<16x256xf32> to vector<2x128xf32>
    %219 = arith.addf %218, %190 : vector<2x128xf32>
    %220 = vector.extract_strided_slice %219 {offsets = [0, 0], sizes = [2, 32], strides = [1, 1]} : vector<2x128xf32> to vector<2x32xf32>
    %221 = arith.negf %220 : vector<2x32xf32>
    %222 = math.exp %221 : vector<2x32xf32>
    %cst_57 = arith.constant 1.000000e+00 : f32
    %223 = vector.broadcast %cst_57 : f32 to vector<2x32xf32>
    %224 = arith.addf %223, %222 : vector<2x32xf32>
    %225 = arith.divf %223, %224 : vector<2x32xf32>
    %226 = vector.extract_strided_slice %219 {offsets = [0, 32], sizes = [2, 32], strides = [1, 1]} : vector<2x128xf32> to vector<2x32xf32>
    %227 = arith.negf %226 : vector<2x32xf32>
    %228 = math.exp %227 : vector<2x32xf32>
    %cst_58 = arith.constant 1.000000e+00 : f32
    %229 = vector.broadcast %cst_58 : f32 to vector<2x32xf32>
    %230 = arith.addf %229, %228 : vector<2x32xf32>
    %231 = arith.divf %229, %230 : vector<2x32xf32>
    %232 = vector.extract_strided_slice %219 {offsets = [0, 64], sizes = [2, 32], strides = [1, 1]} : vector<2x128xf32> to vector<2x32xf32>
    %233 = math.tanh %232 : vector<2x32xf32>
    %234 = vector.extract_strided_slice %219 {offsets = [0, 96], sizes = [2, 32], strides = [1, 1]} : vector<2x128xf32> to vector<2x32xf32>
    %235 = arith.negf %234 : vector<2x32xf32>
    %236 = math.exp %235 : vector<2x32xf32>
    %cst_59 = arith.constant 1.000000e+00 : f32
    %237 = vector.broadcast %cst_59 : f32 to vector<2x32xf32>
    %238 = arith.addf %237, %236 : vector<2x32xf32>
    %239 = arith.divf %237, %238 : vector<2x32xf32>
    %240 = arith.mulf %231, %182 : vector<2x32xf32>
    %241 = arith.mulf %225, %233 : vector<2x32xf32>
    %242 = arith.addf %240, %241 : vector<2x32xf32>
    %243 = math.tanh %242 : vector<2x32xf32>
    %244 = arith.mulf %239, %243 : vector<2x32xf32>
    %c6 = arith.constant 6 : index
    %c0_60 = arith.constant 0 : index
    %245 = vector.load %arg12[%c6, %c0_60] : memref<16x64xf32, #tpu.memory_space<vmem>>, vector<2x32xf32>
    tpu.vector_store %arg12[%c6, %c0_60], %217 {strides = array<i32>} : memref<16x64xf32, #tpu.memory_space<vmem>>, vector<2x32xf32>,
    %c8 = arith.constant 8 : index
    %c32_61 = arith.constant 32 : index
    %246 = vector.load %arg12[%c8, %c32_61] : memref<16x64xf32, #tpu.memory_space<vmem>>, vector<2x32xf32>
    tpu.vector_store %arg12[%c8, %c32_61], %244 {strides = array<i32>} : memref<16x64xf32, #tpu.memory_space<vmem>>, vector<2x32xf32>,
    %c0_62 = arith.constant 0 : index
    %c0_63 = arith.constant 0 : index
    %247 = vector.load %arg2[%c0_62, %c0_63] : memref<32x128xf32, #tpu.memory_space<vmem>>, vector<32x128xf32>
    %cst_64 = arith.constant dense<0.000000e+00> : vector<2x128xf32>
    %248 = tpu.matmul %217, %247, %cst_64 {dimension_numbers = #tpu.dot_dimension_numbers<[1], [0], [0], [1], [0, 0, 1, 1], [], []>} : vector<2x32xf32>, vector<32x128xf32>, vector<2x128xf32> -> vector<2x128xf32>
    %c0_65 = arith.constant 0 : index
    %c0_66 = arith.constant 0 : index
    %249 = vector.load %arg3[%c0_65, %c0_66] : memref<32x128xf32, #tpu.memory_space<vmem>>, vector<32x128xf32>
    %cst_67 = arith.constant dense<0.000000e+00> : vector<2x128xf32>
    %250 = tpu.matmul %244, %249, %cst_67 {dimension_numbers = #tpu.dot_dimension_numbers<[1], [0], [0], [1], [0, 0, 1, 1], [], []>} : vector<2x32xf32>, vector<32x128xf32>, vector<2x128xf32> -> vector<2x128xf32>
    %251 = vector.extract_strided_slice %6 {offsets = [8, 0], sizes = [2, 128], strides = [1, 1]} : vector<16x256xf32> to vector<2x128xf32>
    %252 = arith.addf %251, %248 : vector<2x128xf32>
    %253 = vector.extract_strided_slice %252 {offsets = [0, 0], sizes = [2, 32], strides = [1, 1]} : vector<2x128xf32> to vector<2x32xf32>
    %254 = arith.negf %253 : vector<2x32xf32>
    %255 = math.exp %254 : vector<2x32xf32>
    %cst_68 = arith.constant 1.000000e+00 : f32
    %256 = vector.broadcast %cst_68 : f32 to vector<2x32xf32>
    %257 = arith.addf %256, %255 : vector<2x32xf32>
    %258 = arith.divf %256, %257 : vector<2x32xf32>
    %259 = vector.extract_strided_slice %252 {offsets = [0, 32], sizes = [2, 32], strides = [1, 1]} : vector<2x128xf32> to vector<2x32xf32>
    %260 = arith.negf %259 : vector<2x32xf32>
    %261 = math.exp %260 : vector<2x32xf32>
    %cst_69 = arith.constant 1.000000e+00 : f32
    %262 = vector.broadcast %cst_69 : f32 to vector<2x32xf32>
    %263 = arith.addf %262, %261 : vector<2x32xf32>
    %264 = arith.divf %262, %263 : vector<2x32xf32>
    %265 = vector.extract_strided_slice %252 {offsets = [0, 64], sizes = [2, 32], strides = [1, 1]} : vector<2x128xf32> to vector<2x32xf32>
    %266 = math.tanh %265 : vector<2x32xf32>
    %267 = vector.extract_strided_slice %252 {offsets = [0, 96], sizes = [2, 32], strides = [1, 1]} : vector<2x128xf32> to vector<2x32xf32>
    %268 = arith.negf %267 : vector<2x32xf32>
    %269 = math.exp %268 : vector<2x32xf32>
    %cst_70 = arith.constant 1.000000e+00 : f32
    %270 = vector.broadcast %cst_70 : f32 to vector<2x32xf32>
    %271 = arith.addf %270, %269 : vector<2x32xf32>
    %272 = arith.divf %270, %271 : vector<2x32xf32>
    %273 = arith.mulf %264, %215 : vector<2x32xf32>
    %274 = arith.mulf %258, %266 : vector<2x32xf32>
    %275 = arith.addf %273, %274 : vector<2x32xf32>
    %276 = math.tanh %275 : vector<2x32xf32>
    %277 = arith.mulf %272, %276 : vector<2x32xf32>
    %278 = vector.extract_strided_slice %6 {offsets = [6, 128], sizes = [2, 128], strides = [1, 1]} : vector<16x256xf32> to vector<2x128xf32>
    %279 = arith.addf %278, %250 : vector<2x128xf32>
    %280 = vector.extract_strided_slice %279 {offsets = [0, 0], sizes = [2, 32], strides = [1, 1]} : vector<2x128xf32> to vector<2x32xf32>
    %281 = arith.negf %280 : vector<2x32xf32>
    %282 = math.exp %281 : vector<2x32xf32>
    %cst_71 = arith.constant 1.000000e+00 : f32
    %283 = vector.broadcast %cst_71 : f32 to vector<2x32xf32>
    %284 = arith.addf %283, %282 : vector<2x32xf32>
    %285 = arith.divf %283, %284 : vector<2x32xf32>
    %286 = vector.extract_strided_slice %279 {offsets = [0, 32], sizes = [2, 32], strides = [1, 1]} : vector<2x128xf32> to vector<2x32xf32>
    %287 = arith.negf %286 : vector<2x32xf32>
    %288 = math.exp %287 : vector<2x32xf32>
    %cst_72 = arith.constant 1.000000e+00 : f32
    %289 = vector.broadcast %cst_72 : f32 to vector<2x32xf32>
    %290 = arith.addf %289, %288 : vector<2x32xf32>
    %291 = arith.divf %289, %290 : vector<2x32xf32>
    %292 = vector.extract_strided_slice %279 {offsets = [0, 64], sizes = [2, 32], strides = [1, 1]} : vector<2x128xf32> to vector<2x32xf32>
    %293 = math.tanh %292 : vector<2x32xf32>
    %294 = vector.extract_strided_slice %279 {offsets = [0, 96], sizes = [2, 32], strides = [1, 1]} : vector<2x128xf32> to vector<2x32xf32>
    %295 = arith.negf %294 : vector<2x32xf32>
    %296 = math.exp %295 : vector<2x32xf32>
    %cst_73 = arith.constant 1.000000e+00 : f32
    %297 = vector.broadcast %cst_73 : f32 to vector<2x32xf32>
    %298 = arith.addf %297, %296 : vector<2x32xf32>
    %299 = arith.divf %297, %298 : vector<2x32xf32>
    %300 = arith.mulf %291, %242 : vector<2x32xf32>
    %301 = arith.mulf %285, %293 : vector<2x32xf32>
    %302 = arith.addf %300, %301 : vector<2x32xf32>
    %303 = math.tanh %302 : vector<2x32xf32>
    %304 = arith.mulf %299, %303 : vector<2x32xf32>
    %c8_74 = arith.constant 8 : index
    %c0_75 = arith.constant 0 : index
    %305 = vector.load %arg12[%c8_74, %c0_75] : memref<16x64xf32, #tpu.memory_space<vmem>>, vector<2x32xf32>
    tpu.vector_store %arg12[%c8_74, %c0_75], %277 {strides = array<i32>} : memref<16x64xf32, #tpu.memory_space<vmem>>, vector<2x32xf32>,
    %c6_76 = arith.constant 6 : index
    %c32_77 = arith.constant 32 : index
    %306 = vector.load %arg12[%c6_76, %c32_77] : memref<16x64xf32, #tpu.memory_space<vmem>>, vector<2x32xf32>
    tpu.vector_store %arg12[%c6_76, %c32_77], %304 {strides = array<i32>} : memref<16x64xf32, #tpu.memory_space<vmem>>, vector<2x32xf32>,
    %c0_78 = arith.constant 0 : index
    %c0_79 = arith.constant 0 : index
    %307 = vector.load %arg2[%c0_78, %c0_79] : memref<32x128xf32, #tpu.memory_space<vmem>>, vector<32x128xf32>
    %cst_80 = arith.constant dense<0.000000e+00> : vector<2x128xf32>
    %308 = tpu.matmul %277, %307, %cst_80 {dimension_numbers = #tpu.dot_dimension_numbers<[1], [0], [0], [1], [0, 0, 1, 1], [], []>} : vector<2x32xf32>, vector<32x128xf32>, vector<2x128xf32> -> vector<2x128xf32>
    %c0_81 = arith.constant 0 : index
    %c0_82 = arith.constant 0 : index
    %309 = vector.load %arg3[%c0_81, %c0_82] : memref<32x128xf32, #tpu.memory_space<vmem>>, vector<32x128xf32>
    %cst_83 = arith.constant dense<0.000000e+00> : vector<2x128xf32>
    %310 = tpu.matmul %304, %309, %cst_83 {dimension_numbers = #tpu.dot_dimension_numbers<[1], [0], [0], [1], [0, 0, 1, 1], [], []>} : vector<2x32xf32>, vector<32x128xf32>, vector<2x128xf32> -> vector<2x128xf32>
    %311 = vector.extract_strided_slice %6 {offsets = [10, 0], sizes = [2, 128], strides = [1, 1]} : vector<16x256xf32> to vector<2x128xf32>
    %312 = arith.addf %311, %308 : vector<2x128xf32>
    %313 = vector.extract_strided_slice %312 {offsets = [0, 0], sizes = [2, 32], strides = [1, 1]} : vector<2x128xf32> to vector<2x32xf32>
    %314 = arith.negf %313 : vector<2x32xf32>
    %315 = math.exp %314 : vector<2x32xf32>
    %cst_84 = arith.constant 1.000000e+00 : f32
    %316 = vector.broadcast %cst_84 : f32 to vector<2x32xf32>
    %317 = arith.addf %316, %315 : vector<2x32xf32>
    %318 = arith.divf %316, %317 : vector<2x32xf32>
    %319 = vector.extract_strided_slice %312 {offsets = [0, 32], sizes = [2, 32], strides = [1, 1]} : vector<2x128xf32> to vector<2x32xf32>
    %320 = arith.negf %319 : vector<2x32xf32>
    %321 = math.exp %320 : vector<2x32xf32>
    %cst_85 = arith.constant 1.000000e+00 : f32
    %322 = vector.broadcast %cst_85 : f32 to vector<2x32xf32>
    %323 = arith.addf %322, %321 : vector<2x32xf32>
    %324 = arith.divf %322, %323 : vector<2x32xf32>
    %325 = vector.extract_strided_slice %312 {offsets = [0, 64], sizes = [2, 32], strides = [1, 1]} : vector<2x128xf32> to vector<2x32xf32>
    %326 = math.tanh %325 : vector<2x32xf32>
    %327 = vector.extract_strided_slice %312 {offsets = [0, 96], sizes = [2, 32], strides = [1, 1]} : vector<2x128xf32> to vector<2x32xf32>
    %328 = arith.negf %327 : vector<2x32xf32>
    %329 = math.exp %328 : vector<2x32xf32>
    %cst_86 = arith.constant 1.000000e+00 : f32
    %330 = vector.broadcast %cst_86 : f32 to vector<2x32xf32>
    %331 = arith.addf %330, %329 : vector<2x32xf32>
    %332 = arith.divf %330, %331 : vector<2x32xf32>
    %333 = arith.mulf %324, %275 : vector<2x32xf32>
    %334 = arith.mulf %318, %326 : vector<2x32xf32>
    %335 = arith.addf %333, %334 : vector<2x32xf32>
    %336 = math.tanh %335 : vector<2x32xf32>
    %337 = arith.mulf %332, %336 : vector<2x32xf32>
    %338 = vector.extract_strided_slice %6 {offsets = [4, 128], sizes = [2, 128], strides = [1, 1]} : vector<16x256xf32> to vector<2x128xf32>
    %339 = arith.addf %338, %310 : vector<2x128xf32>
    %340 = vector.extract_strided_slice %339 {offsets = [0, 0], sizes = [2, 32], strides = [1, 1]} : vector<2x128xf32> to vector<2x32xf32>
    %341 = arith.negf %340 : vector<2x32xf32>
    %342 = math.exp %341 : vector<2x32xf32>
    %cst_87 = arith.constant 1.000000e+00 : f32
    %343 = vector.broadcast %cst_87 : f32 to vector<2x32xf32>
    %344 = arith.addf %343, %342 : vector<2x32xf32>
    %345 = arith.divf %343, %344 : vector<2x32xf32>
    %346 = vector.extract_strided_slice %339 {offsets = [0, 32], sizes = [2, 32], strides = [1, 1]} : vector<2x128xf32> to vector<2x32xf32>
    %347 = arith.negf %346 : vector<2x32xf32>
    %348 = math.exp %347 : vector<2x32xf32>
    %cst_88 = arith.constant 1.000000e+00 : f32
    %349 = vector.broadcast %cst_88 : f32 to vector<2x32xf32>
    %350 = arith.addf %349, %348 : vector<2x32xf32>
    %351 = arith.divf %349, %350 : vector<2x32xf32>
    %352 = vector.extract_strided_slice %339 {offsets = [0, 64], sizes = [2, 32], strides = [1, 1]} : vector<2x128xf32> to vector<2x32xf32>
    %353 = math.tanh %352 : vector<2x32xf32>
    %354 = vector.extract_strided_slice %339 {offsets = [0, 96], sizes = [2, 32], strides = [1, 1]} : vector<2x128xf32> to vector<2x32xf32>
    %355 = arith.negf %354 : vector<2x32xf32>
    %356 = math.exp %355 : vector<2x32xf32>
    %cst_89 = arith.constant 1.000000e+00 : f32
    %357 = vector.broadcast %cst_89 : f32 to vector<2x32xf32>
    %358 = arith.addf %357, %356 : vector<2x32xf32>
    %359 = arith.divf %357, %358 : vector<2x32xf32>
    %360 = arith.mulf %351, %302 : vector<2x32xf32>
    %361 = arith.mulf %345, %353 : vector<2x32xf32>
    %362 = arith.addf %360, %361 : vector<2x32xf32>
    %363 = math.tanh %362 : vector<2x32xf32>
    %364 = arith.mulf %359, %363 : vector<2x32xf32>
    %c10_90 = arith.constant 10 : index
    %c0_91 = arith.constant 0 : index
    %365 = vector.load %arg12[%c10_90, %c0_91] : memref<16x64xf32, #tpu.memory_space<vmem>>, vector<2x32xf32>
    tpu.vector_store %arg12[%c10_90, %c0_91], %337 {strides = array<i32>} : memref<16x64xf32, #tpu.memory_space<vmem>>, vector<2x32xf32>,
    %c4_92 = arith.constant 4 : index
    %c32_93 = arith.constant 32 : index
    %366 = vector.load %arg12[%c4_92, %c32_93] : memref<16x64xf32, #tpu.memory_space<vmem>>, vector<2x32xf32>
    tpu.vector_store %arg12[%c4_92, %c32_93], %364 {strides = array<i32>} : memref<16x64xf32, #tpu.memory_space<vmem>>, vector<2x32xf32>,
    %c0_94 = arith.constant 0 : index
    %c0_95 = arith.constant 0 : index
    %367 = vector.load %arg2[%c0_94, %c0_95] : memref<32x128xf32, #tpu.memory_space<vmem>>, vector<32x128xf32>
    %cst_96 = arith.constant dense<0.000000e+00> : vector<2x128xf32>
    %368 = tpu.matmul %337, %367, %cst_96 {dimension_numbers = #tpu.dot_dimension_numbers<[1], [0], [0], [1], [0, 0, 1, 1], [], []>} : vector<2x32xf32>, vector<32x128xf32>, vector<2x128xf32> -> vector<2x128xf32>
    %c0_97 = arith.constant 0 : index
    %c0_98 = arith.constant 0 : index
    %369 = vector.load %arg3[%c0_97, %c0_98] : memref<32x128xf32, #tpu.memory_space<vmem>>, vector<32x128xf32>
    %cst_99 = arith.constant dense<0.000000e+00> : vector<2x128xf32>
    %370 = tpu.matmul %364, %369, %cst_99 {dimension_numbers = #tpu.dot_dimension_numbers<[1], [0], [0], [1], [0, 0, 1, 1], [], []>} : vector<2x32xf32>, vector<32x128xf32>, vector<2x128xf32> -> vector<2x128xf32>
    %371 = vector.extract_strided_slice %6 {offsets = [12, 0], sizes = [2, 128], strides = [1, 1]} : vector<16x256xf32> to vector<2x128xf32>
    %372 = arith.addf %371, %368 : vector<2x128xf32>
    %373 = vector.extract_strided_slice %372 {offsets = [0, 0], sizes = [2, 32], strides = [1, 1]} : vector<2x128xf32> to vector<2x32xf32>
    %374 = arith.negf %373 : vector<2x32xf32>
    %375 = math.exp %374 : vector<2x32xf32>
    %cst_100 = arith.constant 1.000000e+00 : f32
    %376 = vector.broadcast %cst_100 : f32 to vector<2x32xf32>
    %377 = arith.addf %376, %375 : vector<2x32xf32>
    %378 = arith.divf %376, %377 : vector<2x32xf32>
    %379 = vector.extract_strided_slice %372 {offsets = [0, 32], sizes = [2, 32], strides = [1, 1]} : vector<2x128xf32> to vector<2x32xf32>
    %380 = arith.negf %379 : vector<2x32xf32>
    %381 = math.exp %380 : vector<2x32xf32>
    %cst_101 = arith.constant 1.000000e+00 : f32
    %382 = vector.broadcast %cst_101 : f32 to vector<2x32xf32>
    %383 = arith.addf %382, %381 : vector<2x32xf32>
    %384 = arith.divf %382, %383 : vector<2x32xf32>
    %385 = vector.extract_strided_slice %372 {offsets = [0, 64], sizes = [2, 32], strides = [1, 1]} : vector<2x128xf32> to vector<2x32xf32>
    %386 = math.tanh %385 : vector<2x32xf32>
    %387 = vector.extract_strided_slice %372 {offsets = [0, 96], sizes = [2, 32], strides = [1, 1]} : vector<2x128xf32> to vector<2x32xf32>
    %388 = arith.negf %387 : vector<2x32xf32>
    %389 = math.exp %388 : vector<2x32xf32>
    %cst_102 = arith.constant 1.000000e+00 : f32
    %390 = vector.broadcast %cst_102 : f32 to vector<2x32xf32>
    %391 = arith.addf %390, %389 : vector<2x32xf32>
    %392 = arith.divf %390, %391 : vector<2x32xf32>
    %393 = arith.mulf %384, %335 : vector<2x32xf32>
    %394 = arith.mulf %378, %386 : vector<2x32xf32>
    %395 = arith.addf %393, %394 : vector<2x32xf32>
    %396 = math.tanh %395 : vector<2x32xf32>
    %397 = arith.mulf %392, %396 : vector<2x32xf32>
    %398 = vector.extract_strided_slice %6 {offsets = [2, 128], sizes = [2, 128], strides = [1, 1]} : vector<16x256xf32> to vector<2x128xf32>
    %399 = arith.addf %398, %370 : vector<2x128xf32>
    %400 = vector.extract_strided_slice %399 {offsets = [0, 0], sizes = [2, 32], strides = [1, 1]} : vector<2x128xf32> to vector<2x32xf32>
    %401 = arith.negf %400 : vector<2x32xf32>
    %402 = math.exp %401 : vector<2x32xf32>
    %cst_103 = arith.constant 1.000000e+00 : f32
    %403 = vector.broadcast %cst_103 : f32 to vector<2x32xf32>
    %404 = arith.addf %403, %402 : vector<2x32xf32>
    %405 = arith.divf %403, %404 : vector<2x32xf32>
    %406 = vector.extract_strided_slice %399 {offsets = [0, 32], sizes = [2, 32], strides = [1, 1]} : vector<2x128xf32> to vector<2x32xf32>
    %407 = arith.negf %406 : vector<2x32xf32>
    %408 = math.exp %407 : vector<2x32xf32>
    %cst_104 = arith.constant 1.000000e+00 : f32
    %409 = vector.broadcast %cst_104 : f32 to vector<2x32xf32>
    %410 = arith.addf %409, %408 : vector<2x32xf32>
    %411 = arith.divf %409, %410 : vector<2x32xf32>
    %412 = vector.extract_strided_slice %399 {offsets = [0, 64], sizes = [2, 32], strides = [1, 1]} : vector<2x128xf32> to vector<2x32xf32>
    %413 = math.tanh %412 : vector<2x32xf32>
    %414 = vector.extract_strided_slice %399 {offsets = [0, 96], sizes = [2, 32], strides = [1, 1]} : vector<2x128xf32> to vector<2x32xf32>
    %415 = arith.negf %414 : vector<2x32xf32>
    %416 = math.exp %415 : vector<2x32xf32>
    %cst_105 = arith.constant 1.000000e+00 : f32
    %417 = vector.broadcast %cst_105 : f32 to vector<2x32xf32>
    %418 = arith.addf %417, %416 : vector<2x32xf32>
    %419 = arith.divf %417, %418 : vector<2x32xf32>
    %420 = arith.mulf %411, %362 : vector<2x32xf32>
    %421 = arith.mulf %405, %413 : vector<2x32xf32>
    %422 = arith.addf %420, %421 : vector<2x32xf32>
    %423 = math.tanh %422 : vector<2x32xf32>
    %424 = arith.mulf %419, %423 : vector<2x32xf32>
    %c12_106 = arith.constant 12 : index
    %c0_107 = arith.constant 0 : index
    %425 = vector.load %arg12[%c12_106, %c0_107] : memref<16x64xf32, #tpu.memory_space<vmem>>, vector<2x32xf32>
    tpu.vector_store %arg12[%c12_106, %c0_107], %397 {strides = array<i32>} : memref<16x64xf32, #tpu.memory_space<vmem>>, vector<2x32xf32>,
    %c2_108 = arith.constant 2 : index
    %c32_109 = arith.constant 32 : index
    %426 = vector.load %arg12[%c2_108, %c32_109] : memref<16x64xf32, #tpu.memory_space<vmem>>, vector<2x32xf32>
    tpu.vector_store %arg12[%c2_108, %c32_109], %424 {strides = array<i32>} : memref<16x64xf32, #tpu.memory_space<vmem>>, vector<2x32xf32>,
    %c0_110 = arith.constant 0 : index
    %c0_111 = arith.constant 0 : index
    %427 = vector.load %arg2[%c0_110, %c0_111] : memref<32x128xf32, #tpu.memory_space<vmem>>, vector<32x128xf32>
    %cst_112 = arith.constant dense<0.000000e+00> : vector<2x128xf32>
    %428 = tpu.matmul %397, %427, %cst_112 {dimension_numbers = #tpu.dot_dimension_numbers<[1], [0], [0], [1], [0, 0, 1, 1], [], []>} : vector<2x32xf32>, vector<32x128xf32>, vector<2x128xf32> -> vector<2x128xf32>
    %c0_113 = arith.constant 0 : index
    %c0_114 = arith.constant 0 : index
    %429 = vector.load %arg3[%c0_113, %c0_114] : memref<32x128xf32, #tpu.memory_space<vmem>>, vector<32x128xf32>
    %cst_115 = arith.constant dense<0.000000e+00> : vector<2x128xf32>
    %430 = tpu.matmul %424, %429, %cst_115 {dimension_numbers = #tpu.dot_dimension_numbers<[1], [0], [0], [1], [0, 0, 1, 1], [], []>} : vector<2x32xf32>, vector<32x128xf32>, vector<2x128xf32> -> vector<2x128xf32>
    %431 = vector.extract_strided_slice %6 {offsets = [14, 0], sizes = [2, 128], strides = [1, 1]} : vector<16x256xf32> to vector<2x128xf32>
    %432 = arith.addf %431, %428 : vector<2x128xf32>
    %433 = vector.extract_strided_slice %432 {offsets = [0, 0], sizes = [2, 32], strides = [1, 1]} : vector<2x128xf32> to vector<2x32xf32>
    %434 = arith.negf %433 : vector<2x32xf32>
    %435 = math.exp %434 : vector<2x32xf32>
    %cst_116 = arith.constant 1.000000e+00 : f32
    %436 = vector.broadcast %cst_116 : f32 to vector<2x32xf32>
    %437 = arith.addf %436, %435 : vector<2x32xf32>
    %438 = arith.divf %436, %437 : vector<2x32xf32>
    %439 = vector.extract_strided_slice %432 {offsets = [0, 32], sizes = [2, 32], strides = [1, 1]} : vector<2x128xf32> to vector<2x32xf32>
    %440 = arith.negf %439 : vector<2x32xf32>
    %441 = math.exp %440 : vector<2x32xf32>
    %cst_117 = arith.constant 1.000000e+00 : f32
    %442 = vector.broadcast %cst_117 : f32 to vector<2x32xf32>
    %443 = arith.addf %442, %441 : vector<2x32xf32>
    %444 = arith.divf %442, %443 : vector<2x32xf32>
    %445 = vector.extract_strided_slice %432 {offsets = [0, 64], sizes = [2, 32], strides = [1, 1]} : vector<2x128xf32> to vector<2x32xf32>
    %446 = math.tanh %445 : vector<2x32xf32>
    %447 = vector.extract_strided_slice %432 {offsets = [0, 96], sizes = [2, 32], strides = [1, 1]} : vector<2x128xf32> to vector<2x32xf32>
    %448 = arith.negf %447 : vector<2x32xf32>
    %449 = math.exp %448 : vector<2x32xf32>
    %cst_118 = arith.constant 1.000000e+00 : f32
    %450 = vector.broadcast %cst_118 : f32 to vector<2x32xf32>
    %451 = arith.addf %450, %449 : vector<2x32xf32>
    %452 = arith.divf %450, %451 : vector<2x32xf32>
    %453 = arith.mulf %444, %395 : vector<2x32xf32>
    %454 = arith.mulf %438, %446 : vector<2x32xf32>
    %455 = arith.addf %453, %454 : vector<2x32xf32>
    %456 = math.tanh %455 : vector<2x32xf32>
    %457 = arith.mulf %452, %456 : vector<2x32xf32>
    %458 = vector.extract_strided_slice %6 {offsets = [0, 128], sizes = [2, 128], strides = [1, 1]} : vector<16x256xf32> to vector<2x128xf32>
    %459 = arith.addf %458, %430 : vector<2x128xf32>
    %460 = vector.extract_strided_slice %459 {offsets = [0, 0], sizes = [2, 32], strides = [1, 1]} : vector<2x128xf32> to vector<2x32xf32>
    %461 = arith.negf %460 : vector<2x32xf32>
    %462 = math.exp %461 : vector<2x32xf32>
    %cst_119 = arith.constant 1.000000e+00 : f32
    %463 = vector.broadcast %cst_119 : f32 to vector<2x32xf32>
    %464 = arith.addf %463, %462 : vector<2x32xf32>
    %465 = arith.divf %463, %464 : vector<2x32xf32>
    %466 = vector.extract_strided_slice %459 {offsets = [0, 32], sizes = [2, 32], strides = [1, 1]} : vector<2x128xf32> to vector<2x32xf32>
    %467 = arith.negf %466 : vector<2x32xf32>
    %468 = math.exp %467 : vector<2x32xf32>
    %cst_120 = arith.constant 1.000000e+00 : f32
    %469 = vector.broadcast %cst_120 : f32 to vector<2x32xf32>
    %470 = arith.addf %469, %468 : vector<2x32xf32>
    %471 = arith.divf %469, %470 : vector<2x32xf32>
    %472 = vector.extract_strided_slice %459 {offsets = [0, 64], sizes = [2, 32], strides = [1, 1]} : vector<2x128xf32> to vector<2x32xf32>
    %473 = math.tanh %472 : vector<2x32xf32>
    %474 = vector.extract_strided_slice %459 {offsets = [0, 96], sizes = [2, 32], strides = [1, 1]} : vector<2x128xf32> to vector<2x32xf32>
    %475 = arith.negf %474 : vector<2x32xf32>
    %476 = math.exp %475 : vector<2x32xf32>
    %cst_121 = arith.constant 1.000000e+00 : f32
    %477 = vector.broadcast %cst_121 : f32 to vector<2x32xf32>
    %478 = arith.addf %477, %476 : vector<2x32xf32>
    %479 = arith.divf %477, %478 : vector<2x32xf32>
    %480 = arith.mulf %471, %422 : vector<2x32xf32>
    %481 = arith.mulf %465, %473 : vector<2x32xf32>
    %482 = arith.addf %480, %481 : vector<2x32xf32>
    %483 = math.tanh %482 : vector<2x32xf32>
    %484 = arith.mulf %479, %483 : vector<2x32xf32>
    %c14_122 = arith.constant 14 : index
    %c0_123 = arith.constant 0 : index
    %485 = vector.load %arg12[%c14_122, %c0_123] : memref<16x64xf32, #tpu.memory_space<vmem>>, vector<2x32xf32>
    tpu.vector_store %arg12[%c14_122, %c0_123], %457 {strides = array<i32>} : memref<16x64xf32, #tpu.memory_space<vmem>>, vector<2x32xf32>,
    %c0_124 = arith.constant 0 : index
    %c32_125 = arith.constant 32 : index
    %486 = vector.load %arg12[%c0_124, %c32_125] : memref<16x64xf32, #tpu.memory_space<vmem>>, vector<2x32xf32>
    tpu.vector_store %arg12[%c0_124, %c32_125], %484 {strides = array<i32>} : memref<16x64xf32, #tpu.memory_space<vmem>>, vector<2x32xf32>,
    %c0_126 = arith.constant 0 : index
    %c0_127 = arith.constant 0 : index
    %487 = vector.load %arg12[%c0_126, %c0_127] : memref<16x64xf32, #tpu.memory_space<vmem>>, vector<16x64xf32>
    %c0_128 = arith.constant 0 : index
    %c0_129 = arith.constant 0 : index
    %488 = vector.load %arg5[%c0_128, %c0_129] : memref<64x256xf32, #tpu.memory_space<vmem>>, vector<64x256xf32>
    %cst_130 = arith.constant dense<0.000000e+00> : vector<16x256xf32>
    %489 = tpu.matmul %487, %488, %cst_130 {dimension_numbers = #tpu.dot_dimension_numbers<[1], [0], [0], [1], [0, 0, 1, 1], [], []>} : vector<16x64xf32>, vector<64x256xf32>, vector<16x256xf32> -> vector<16x256xf32>
    %c0_131 = arith.constant 0 : index
    %c0_132 = arith.constant 0 : index
    %490 = vector.load %arg8[%c0_131, %c0_132] : memref<1x256xf32, #tpu.memory_space<vmem>>, vector<1x256xf32>
    %491 = vector.broadcast %490 : vector<1x256xf32> to vector<16x256xf32>
    %492 = arith.addf %489, %491 : vector<16x256xf32>
    %c0_133 = arith.constant 0 : index
    %c0_134 = arith.constant 0 : index
    %493 = vector.load %arg6[%c0_133, %c0_134] : memref<32x128xf32, #tpu.memory_space<vmem>>, vector<32x128xf32>
    %cst_135 = arith.constant dense<0.000000e+00> : vector<2x128xf32>
    %494 = tpu.matmul %0, %493, %cst_135 {dimension_numbers = #tpu.dot_dimension_numbers<[1], [0], [0], [1], [0, 0, 1, 1], [], []>} : vector<2x32xf32>, vector<32x128xf32>, vector<2x128xf32> -> vector<2x128xf32>
    %c0_136 = arith.constant 0 : index
    %c0_137 = arith.constant 0 : index
    %495 = vector.load %arg7[%c0_136, %c0_137] : memref<32x128xf32, #tpu.memory_space<vmem>>, vector<32x128xf32>
    %cst_138 = arith.constant dense<0.000000e+00> : vector<2x128xf32>
    %496 = tpu.matmul %0, %495, %cst_138 {dimension_numbers = #tpu.dot_dimension_numbers<[1], [0], [0], [1], [0, 0, 1, 1], [], []>} : vector<2x32xf32>, vector<32x128xf32>, vector<2x128xf32> -> vector<2x128xf32>
    %497 = vector.extract_strided_slice %492 {offsets = [0, 0], sizes = [2, 128], strides = [1, 1]} : vector<16x256xf32> to vector<2x128xf32>
    %498 = arith.addf %497, %494 : vector<2x128xf32>
    %499 = vector.extract_strided_slice %498 {offsets = [0, 0], sizes = [2, 32], strides = [1, 1]} : vector<2x128xf32> to vector<2x32xf32>
    %500 = arith.negf %499 : vector<2x32xf32>
    %501 = math.exp %500 : vector<2x32xf32>
    %cst_139 = arith.constant 1.000000e+00 : f32
    %502 = vector.broadcast %cst_139 : f32 to vector<2x32xf32>
    %503 = arith.addf %502, %501 : vector<2x32xf32>
    %504 = arith.divf %502, %503 : vector<2x32xf32>
    %505 = vector.extract_strided_slice %498 {offsets = [0, 32], sizes = [2, 32], strides = [1, 1]} : vector<2x128xf32> to vector<2x32xf32>
    %506 = arith.negf %505 : vector<2x32xf32>
    %507 = math.exp %506 : vector<2x32xf32>
    %cst_140 = arith.constant 1.000000e+00 : f32
    %508 = vector.broadcast %cst_140 : f32 to vector<2x32xf32>
    %509 = arith.addf %508, %507 : vector<2x32xf32>
    %510 = arith.divf %508, %509 : vector<2x32xf32>
    %511 = vector.extract_strided_slice %498 {offsets = [0, 64], sizes = [2, 32], strides = [1, 1]} : vector<2x128xf32> to vector<2x32xf32>
    %512 = math.tanh %511 : vector<2x32xf32>
    %513 = vector.extract_strided_slice %498 {offsets = [0, 96], sizes = [2, 32], strides = [1, 1]} : vector<2x128xf32> to vector<2x32xf32>
    %514 = arith.negf %513 : vector<2x32xf32>
    %515 = math.exp %514 : vector<2x32xf32>
    %cst_141 = arith.constant 1.000000e+00 : f32
    %516 = vector.broadcast %cst_141 : f32 to vector<2x32xf32>
    %517 = arith.addf %516, %515 : vector<2x32xf32>
    %518 = arith.divf %516, %517 : vector<2x32xf32>
    %519 = arith.mulf %510, %0 : vector<2x32xf32>
    %520 = arith.mulf %504, %512 : vector<2x32xf32>
    %521 = arith.addf %519, %520 : vector<2x32xf32>
    %522 = math.tanh %521 : vector<2x32xf32>
    %523 = arith.mulf %518, %522 : vector<2x32xf32>
    %524 = vector.extract_strided_slice %492 {offsets = [14, 128], sizes = [2, 128], strides = [1, 1]} : vector<16x256xf32> to vector<2x128xf32>
    %525 = arith.addf %524, %496 : vector<2x128xf32>
    %526 = vector.extract_strided_slice %525 {offsets = [0, 0], sizes = [2, 32], strides = [1, 1]} : vector<2x128xf32> to vector<2x32xf32>
    %527 = arith.negf %526 : vector<2x32xf32>
    %528 = math.exp %527 : vector<2x32xf32>
    %cst_142 = arith.constant 1.000000e+00 : f32
    %529 = vector.broadcast %cst_142 : f32 to vector<2x32xf32>
    %530 = arith.addf %529, %528 : vector<2x32xf32>
    %531 = arith.divf %529, %530 : vector<2x32xf32>
    %532 = vector.extract_strided_slice %525 {offsets = [0, 32], sizes = [2, 32], strides = [1, 1]} : vector<2x128xf32> to vector<2x32xf32>
    %533 = arith.negf %532 : vector<2x32xf32>
    %534 = math.exp %533 : vector<2x32xf32>
    %cst_143 = arith.constant 1.000000e+00 : f32
    %535 = vector.broadcast %cst_143 : f32 to vector<2x32xf32>
    %536 = arith.addf %535, %534 : vector<2x32xf32>
    %537 = arith.divf %535, %536 : vector<2x32xf32>
    %538 = vector.extract_strided_slice %525 {offsets = [0, 64], sizes = [2, 32], strides = [1, 1]} : vector<2x128xf32> to vector<2x32xf32>
    %539 = math.tanh %538 : vector<2x32xf32>
    %540 = vector.extract_strided_slice %525 {offsets = [0, 96], sizes = [2, 32], strides = [1, 1]} : vector<2x128xf32> to vector<2x32xf32>
    %541 = arith.negf %540 : vector<2x32xf32>
    %542 = math.exp %541 : vector<2x32xf32>
    %cst_144 = arith.constant 1.000000e+00 : f32
    %543 = vector.broadcast %cst_144 : f32 to vector<2x32xf32>
    %544 = arith.addf %543, %542 : vector<2x32xf32>
    %545 = arith.divf %543, %544 : vector<2x32xf32>
    %546 = arith.mulf %537, %0 : vector<2x32xf32>
    %547 = arith.mulf %531, %539 : vector<2x32xf32>
    %548 = arith.addf %546, %547 : vector<2x32xf32>
    %549 = math.tanh %548 : vector<2x32xf32>
    %550 = arith.mulf %545, %549 : vector<2x32xf32>
    %c0_145 = arith.constant 0 : index
    %c0_146 = arith.constant 0 : index
    %551 = vector.load %arg6[%c0_145, %c0_146] : memref<32x128xf32, #tpu.memory_space<vmem>>, vector<32x128xf32>
    %cst_147 = arith.constant dense<0.000000e+00> : vector<2x128xf32>
    %552 = tpu.matmul %523, %551, %cst_147 {dimension_numbers = #tpu.dot_dimension_numbers<[1], [0], [0], [1], [0, 0, 1, 1], [], []>} : vector<2x32xf32>, vector<32x128xf32>, vector<2x128xf32> -> vector<2x128xf32>
    %553 = vector.extract_strided_slice %492 {offsets = [2, 0], sizes = [2, 128], strides = [1, 1]} : vector<16x256xf32> to vector<2x128xf32>
    %554 = arith.addf %553, %552 : vector<2x128xf32>
    %555 = vector.extract_strided_slice %554 {offsets = [0, 0], sizes = [2, 32], strides = [1, 1]} : vector<2x128xf32> to vector<2x32xf32>
    %556 = arith.negf %555 : vector<2x32xf32>
    %557 = math.exp %556 : vector<2x32xf32>
    %cst_148 = arith.constant 1.000000e+00 : f32
    %558 = vector.broadcast %cst_148 : f32 to vector<2x32xf32>
    %559 = arith.addf %558, %557 : vector<2x32xf32>
    %560 = arith.divf %558, %559 : vector<2x32xf32>
    %561 = vector.extract_strided_slice %554 {offsets = [0, 32], sizes = [2, 32], strides = [1, 1]} : vector<2x128xf32> to vector<2x32xf32>
    %562 = arith.negf %561 : vector<2x32xf32>
    %563 = math.exp %562 : vector<2x32xf32>
    %cst_149 = arith.constant 1.000000e+00 : f32
    %564 = vector.broadcast %cst_149 : f32 to vector<2x32xf32>
    %565 = arith.addf %564, %563 : vector<2x32xf32>
    %566 = arith.divf %564, %565 : vector<2x32xf32>
    %567 = vector.extract_strided_slice %554 {offsets = [0, 64], sizes = [2, 32], strides = [1, 1]} : vector<2x128xf32> to vector<2x32xf32>
    %568 = math.tanh %567 : vector<2x32xf32>
    %569 = vector.extract_strided_slice %554 {offsets = [0, 96], sizes = [2, 32], strides = [1, 1]} : vector<2x128xf32> to vector<2x32xf32>
    %570 = arith.negf %569 : vector<2x32xf32>
    %571 = math.exp %570 : vector<2x32xf32>
    %cst_150 = arith.constant 1.000000e+00 : f32
    %572 = vector.broadcast %cst_150 : f32 to vector<2x32xf32>
    %573 = arith.addf %572, %571 : vector<2x32xf32>
    %574 = arith.divf %572, %573 : vector<2x32xf32>
    %575 = arith.mulf %566, %521 : vector<2x32xf32>
    %576 = arith.mulf %560, %568 : vector<2x32xf32>
    %577 = arith.addf %575, %576 : vector<2x32xf32>
    %578 = math.tanh %577 : vector<2x32xf32>
    %579 = arith.mulf %574, %578 : vector<2x32xf32>
    %c0_151 = arith.constant 0 : index
    %c0_152 = arith.constant 0 : index
    %580 = vector.load %arg6[%c0_151, %c0_152] : memref<32x128xf32, #tpu.memory_space<vmem>>, vector<32x128xf32>
    %cst_153 = arith.constant dense<0.000000e+00> : vector<2x128xf32>
    %581 = tpu.matmul %579, %580, %cst_153 {dimension_numbers = #tpu.dot_dimension_numbers<[1], [0], [0], [1], [0, 0, 1, 1], [], []>} : vector<2x32xf32>, vector<32x128xf32>, vector<2x128xf32> -> vector<2x128xf32>
    %582 = vector.extract_strided_slice %492 {offsets = [4, 0], sizes = [2, 128], strides = [1, 1]} : vector<16x256xf32> to vector<2x128xf32>
    %583 = arith.addf %582, %581 : vector<2x128xf32>
    %584 = vector.extract_strided_slice %583 {offsets = [0, 0], sizes = [2, 32], strides = [1, 1]} : vector<2x128xf32> to vector<2x32xf32>
    %585 = arith.negf %584 : vector<2x32xf32>
    %586 = math.exp %585 : vector<2x32xf32>
    %cst_154 = arith.constant 1.000000e+00 : f32
    %587 = vector.broadcast %cst_154 : f32 to vector<2x32xf32>
    %588 = arith.addf %587, %586 : vector<2x32xf32>
    %589 = arith.divf %587, %588 : vector<2x32xf32>
    %590 = vector.extract_strided_slice %583 {offsets = [0, 32], sizes = [2, 32], strides = [1, 1]} : vector<2x128xf32> to vector<2x32xf32>
    %591 = arith.negf %590 : vector<2x32xf32>
    %592 = math.exp %591 : vector<2x32xf32>
    %cst_155 = arith.constant 1.000000e+00 : f32
    %593 = vector.broadcast %cst_155 : f32 to vector<2x32xf32>
    %594 = arith.addf %593, %592 : vector<2x32xf32>
    %595 = arith.divf %593, %594 : vector<2x32xf32>
    %596 = vector.extract_strided_slice %583 {offsets = [0, 64], sizes = [2, 32], strides = [1, 1]} : vector<2x128xf32> to vector<2x32xf32>
    %597 = math.tanh %596 : vector<2x32xf32>
    %598 = vector.extract_strided_slice %583 {offsets = [0, 96], sizes = [2, 32], strides = [1, 1]} : vector<2x128xf32> to vector<2x32xf32>
    %599 = arith.negf %598 : vector<2x32xf32>
    %600 = math.exp %599 : vector<2x32xf32>
    %cst_156 = arith.constant 1.000000e+00 : f32
    %601 = vector.broadcast %cst_156 : f32 to vector<2x32xf32>
    %602 = arith.addf %601, %600 : vector<2x32xf32>
    %603 = arith.divf %601, %602 : vector<2x32xf32>
    %604 = arith.mulf %595, %577 : vector<2x32xf32>
    %605 = arith.mulf %589, %597 : vector<2x32xf32>
    %606 = arith.addf %604, %605 : vector<2x32xf32>
    %607 = math.tanh %606 : vector<2x32xf32>
    %608 = arith.mulf %603, %607 : vector<2x32xf32>
    %c0_157 = arith.constant 0 : index
    %c0_158 = arith.constant 0 : index
    %609 = vector.load %arg6[%c0_157, %c0_158] : memref<32x128xf32, #tpu.memory_space<vmem>>, vector<32x128xf32>
    %cst_159 = arith.constant dense<0.000000e+00> : vector<2x128xf32>
    %610 = tpu.matmul %608, %609, %cst_159 {dimension_numbers = #tpu.dot_dimension_numbers<[1], [0], [0], [1], [0, 0, 1, 1], [], []>} : vector<2x32xf32>, vector<32x128xf32>, vector<2x128xf32> -> vector<2x128xf32>
    %611 = vector.extract_strided_slice %492 {offsets = [6, 0], sizes = [2, 128], strides = [1, 1]} : vector<16x256xf32> to vector<2x128xf32>
    %612 = arith.addf %611, %610 : vector<2x128xf32>
    %613 = vector.extract_strided_slice %612 {offsets = [0, 0], sizes = [2, 32], strides = [1, 1]} : vector<2x128xf32> to vector<2x32xf32>
    %614 = arith.negf %613 : vector<2x32xf32>
    %615 = math.exp %614 : vector<2x32xf32>
    %cst_160 = arith.constant 1.000000e+00 : f32
    %616 = vector.broadcast %cst_160 : f32 to vector<2x32xf32>
    %617 = arith.addf %616, %615 : vector<2x32xf32>
    %618 = arith.divf %616, %617 : vector<2x32xf32>
    %619 = vector.extract_strided_slice %612 {offsets = [0, 32], sizes = [2, 32], strides = [1, 1]} : vector<2x128xf32> to vector<2x32xf32>
    %620 = arith.negf %619 : vector<2x32xf32>
    %621 = math.exp %620 : vector<2x32xf32>
    %cst_161 = arith.constant 1.000000e+00 : f32
    %622 = vector.broadcast %cst_161 : f32 to vector<2x32xf32>
    %623 = arith.addf %622, %621 : vector<2x32xf32>
    %624 = arith.divf %622, %623 : vector<2x32xf32>
    %625 = vector.extract_strided_slice %612 {offsets = [0, 64], sizes = [2, 32], strides = [1, 1]} : vector<2x128xf32> to vector<2x32xf32>
    %626 = math.tanh %625 : vector<2x32xf32>
    %627 = vector.extract_strided_slice %612 {offsets = [0, 96], sizes = [2, 32], strides = [1, 1]} : vector<2x128xf32> to vector<2x32xf32>
    %628 = arith.negf %627 : vector<2x32xf32>
    %629 = math.exp %628 : vector<2x32xf32>
    %cst_162 = arith.constant 1.000000e+00 : f32
    %630 = vector.broadcast %cst_162 : f32 to vector<2x32xf32>
    %631 = arith.addf %630, %629 : vector<2x32xf32>
    %632 = arith.divf %630, %631 : vector<2x32xf32>
    %633 = arith.mulf %624, %606 : vector<2x32xf32>
    %634 = arith.mulf %618, %626 : vector<2x32xf32>
    %635 = arith.addf %633, %634 : vector<2x32xf32>
    %636 = math.tanh %635 : vector<2x32xf32>
    %637 = arith.mulf %632, %636 : vector<2x32xf32>
    %c0_163 = arith.constant 0 : index
    %c0_164 = arith.constant 0 : index
    %638 = vector.load %arg6[%c0_163, %c0_164] : memref<32x128xf32, #tpu.memory_space<vmem>>, vector<32x128xf32>
    %cst_165 = arith.constant dense<0.000000e+00> : vector<2x128xf32>
    %639 = tpu.matmul %637, %638, %cst_165 {dimension_numbers = #tpu.dot_dimension_numbers<[1], [0], [0], [1], [0, 0, 1, 1], [], []>} : vector<2x32xf32>, vector<32x128xf32>, vector<2x128xf32> -> vector<2x128xf32>
    %640 = vector.extract_strided_slice %492 {offsets = [8, 0], sizes = [2, 128], strides = [1, 1]} : vector<16x256xf32> to vector<2x128xf32>
    %641 = arith.addf %640, %639 : vector<2x128xf32>
    %642 = vector.extract_strided_slice %641 {offsets = [0, 0], sizes = [2, 32], strides = [1, 1]} : vector<2x128xf32> to vector<2x32xf32>
    %643 = arith.negf %642 : vector<2x32xf32>
    %644 = math.exp %643 : vector<2x32xf32>
    %cst_166 = arith.constant 1.000000e+00 : f32
    %645 = vector.broadcast %cst_166 : f32 to vector<2x32xf32>
    %646 = arith.addf %645, %644 : vector<2x32xf32>
    %647 = arith.divf %645, %646 : vector<2x32xf32>
    %648 = vector.extract_strided_slice %641 {offsets = [0, 32], sizes = [2, 32], strides = [1, 1]} : vector<2x128xf32> to vector<2x32xf32>
    %649 = arith.negf %648 : vector<2x32xf32>
    %650 = math.exp %649 : vector<2x32xf32>
    %cst_167 = arith.constant 1.000000e+00 : f32
    %651 = vector.broadcast %cst_167 : f32 to vector<2x32xf32>
    %652 = arith.addf %651, %650 : vector<2x32xf32>
    %653 = arith.divf %651, %652 : vector<2x32xf32>
    %654 = vector.extract_strided_slice %641 {offsets = [0, 64], sizes = [2, 32], strides = [1, 1]} : vector<2x128xf32> to vector<2x32xf32>
    %655 = math.tanh %654 : vector<2x32xf32>
    %656 = vector.extract_strided_slice %641 {offsets = [0, 96], sizes = [2, 32], strides = [1, 1]} : vector<2x128xf32> to vector<2x32xf32>
    %657 = arith.negf %656 : vector<2x32xf32>
    %658 = math.exp %657 : vector<2x32xf32>
    %cst_168 = arith.constant 1.000000e+00 : f32
    %659 = vector.broadcast %cst_168 : f32 to vector<2x32xf32>
    %660 = arith.addf %659, %658 : vector<2x32xf32>
    %661 = arith.divf %659, %660 : vector<2x32xf32>
    %662 = arith.mulf %653, %635 : vector<2x32xf32>
    %663 = arith.mulf %647, %655 : vector<2x32xf32>
    %664 = arith.addf %662, %663 : vector<2x32xf32>
    %665 = math.tanh %664 : vector<2x32xf32>
    %666 = arith.mulf %661, %665 : vector<2x32xf32>
    %c0_169 = arith.constant 0 : index
    %c0_170 = arith.constant 0 : index
    %667 = vector.load %arg6[%c0_169, %c0_170] : memref<32x128xf32, #tpu.memory_space<vmem>>, vector<32x128xf32>
    %cst_171 = arith.constant dense<0.000000e+00> : vector<2x128xf32>
    %668 = tpu.matmul %666, %667, %cst_171 {dimension_numbers = #tpu.dot_dimension_numbers<[1], [0], [0], [1], [0, 0, 1, 1], [], []>} : vector<2x32xf32>, vector<32x128xf32>, vector<2x128xf32> -> vector<2x128xf32>
    %669 = vector.extract_strided_slice %492 {offsets = [10, 0], sizes = [2, 128], strides = [1, 1]} : vector<16x256xf32> to vector<2x128xf32>
    %670 = arith.addf %669, %668 : vector<2x128xf32>
    %671 = vector.extract_strided_slice %670 {offsets = [0, 0], sizes = [2, 32], strides = [1, 1]} : vector<2x128xf32> to vector<2x32xf32>
    %672 = arith.negf %671 : vector<2x32xf32>
    %673 = math.exp %672 : vector<2x32xf32>
    %cst_172 = arith.constant 1.000000e+00 : f32
    %674 = vector.broadcast %cst_172 : f32 to vector<2x32xf32>
    %675 = arith.addf %674, %673 : vector<2x32xf32>
    %676 = arith.divf %674, %675 : vector<2x32xf32>
    %677 = vector.extract_strided_slice %670 {offsets = [0, 32], sizes = [2, 32], strides = [1, 1]} : vector<2x128xf32> to vector<2x32xf32>
    %678 = arith.negf %677 : vector<2x32xf32>
    %679 = math.exp %678 : vector<2x32xf32>
    %cst_173 = arith.constant 1.000000e+00 : f32
    %680 = vector.broadcast %cst_173 : f32 to vector<2x32xf32>
    %681 = arith.addf %680, %679 : vector<2x32xf32>
    %682 = arith.divf %680, %681 : vector<2x32xf32>
    %683 = vector.extract_strided_slice %670 {offsets = [0, 64], sizes = [2, 32], strides = [1, 1]} : vector<2x128xf32> to vector<2x32xf32>
    %684 = math.tanh %683 : vector<2x32xf32>
    %685 = vector.extract_strided_slice %670 {offsets = [0, 96], sizes = [2, 32], strides = [1, 1]} : vector<2x128xf32> to vector<2x32xf32>
    %686 = arith.negf %685 : vector<2x32xf32>
    %687 = math.exp %686 : vector<2x32xf32>
    %cst_174 = arith.constant 1.000000e+00 : f32
    %688 = vector.broadcast %cst_174 : f32 to vector<2x32xf32>
    %689 = arith.addf %688, %687 : vector<2x32xf32>
    %690 = arith.divf %688, %689 : vector<2x32xf32>
    %691 = arith.mulf %682, %664 : vector<2x32xf32>
    %692 = arith.mulf %676, %684 : vector<2x32xf32>
    %693 = arith.addf %691, %692 : vector<2x32xf32>
    %694 = math.tanh %693 : vector<2x32xf32>
    %695 = arith.mulf %690, %694 : vector<2x32xf32>
    %c0_175 = arith.constant 0 : index
    %c0_176 = arith.constant 0 : index
    %696 = vector.load %arg6[%c0_175, %c0_176] : memref<32x128xf32, #tpu.memory_space<vmem>>, vector<32x128xf32>
    %cst_177 = arith.constant dense<0.000000e+00> : vector<2x128xf32>
    %697 = tpu.matmul %695, %696, %cst_177 {dimension_numbers = #tpu.dot_dimension_numbers<[1], [0], [0], [1], [0, 0, 1, 1], [], []>} : vector<2x32xf32>, vector<32x128xf32>, vector<2x128xf32> -> vector<2x128xf32>
    %698 = vector.extract_strided_slice %492 {offsets = [12, 0], sizes = [2, 128], strides = [1, 1]} : vector<16x256xf32> to vector<2x128xf32>
    %699 = arith.addf %698, %697 : vector<2x128xf32>
    %700 = vector.extract_strided_slice %699 {offsets = [0, 0], sizes = [2, 32], strides = [1, 1]} : vector<2x128xf32> to vector<2x32xf32>
    %701 = arith.negf %700 : vector<2x32xf32>
    %702 = math.exp %701 : vector<2x32xf32>
    %cst_178 = arith.constant 1.000000e+00 : f32
    %703 = vector.broadcast %cst_178 : f32 to vector<2x32xf32>
    %704 = arith.addf %703, %702 : vector<2x32xf32>
    %705 = arith.divf %703, %704 : vector<2x32xf32>
    %706 = vector.extract_strided_slice %699 {offsets = [0, 32], sizes = [2, 32], strides = [1, 1]} : vector<2x128xf32> to vector<2x32xf32>
    %707 = arith.negf %706 : vector<2x32xf32>
    %708 = math.exp %707 : vector<2x32xf32>
    %cst_179 = arith.constant 1.000000e+00 : f32
    %709 = vector.broadcast %cst_179 : f32 to vector<2x32xf32>
    %710 = arith.addf %709, %708 : vector<2x32xf32>
    %711 = arith.divf %709, %710 : vector<2x32xf32>
    %712 = vector.extract_strided_slice %699 {offsets = [0, 64], sizes = [2, 32], strides = [1, 1]} : vector<2x128xf32> to vector<2x32xf32>
    %713 = math.tanh %712 : vector<2x32xf32>
    %714 = vector.extract_strided_slice %699 {offsets = [0, 96], sizes = [2, 32], strides = [1, 1]} : vector<2x128xf32> to vector<2x32xf32>
    %715 = arith.negf %714 : vector<2x32xf32>
    %716 = math.exp %715 : vector<2x32xf32>
    %cst_180 = arith.constant 1.000000e+00 : f32
    %717 = vector.broadcast %cst_180 : f32 to vector<2x32xf32>
    %718 = arith.addf %717, %716 : vector<2x32xf32>
    %719 = arith.divf %717, %718 : vector<2x32xf32>
    %720 = arith.mulf %711, %693 : vector<2x32xf32>
    %721 = arith.mulf %705, %713 : vector<2x32xf32>
    %722 = arith.addf %720, %721 : vector<2x32xf32>
    %723 = math.tanh %722 : vector<2x32xf32>
    %724 = arith.mulf %719, %723 : vector<2x32xf32>
    %c0_181 = arith.constant 0 : index
    %c0_182 = arith.constant 0 : index
    %725 = vector.load %arg6[%c0_181, %c0_182] : memref<32x128xf32, #tpu.memory_space<vmem>>, vector<32x128xf32>
    %cst_183 = arith.constant dense<0.000000e+00> : vector<2x128xf32>
    %726 = tpu.matmul %724, %725, %cst_183 {dimension_numbers = #tpu.dot_dimension_numbers<[1], [0], [0], [1], [0, 0, 1, 1], [], []>} : vector<2x32xf32>, vector<32x128xf32>, vector<2x128xf32> -> vector<2x128xf32>
    %727 = vector.extract_strided_slice %492 {offsets = [14, 0], sizes = [2, 128], strides = [1, 1]} : vector<16x256xf32> to vector<2x128xf32>
    %728 = arith.addf %727, %726 : vector<2x128xf32>
    %729 = vector.extract_strided_slice %728 {offsets = [0, 0], sizes = [2, 32], strides = [1, 1]} : vector<2x128xf32> to vector<2x32xf32>
    %730 = arith.negf %729 : vector<2x32xf32>
    %731 = math.exp %730 : vector<2x32xf32>
    %cst_184 = arith.constant 1.000000e+00 : f32
    %732 = vector.broadcast %cst_184 : f32 to vector<2x32xf32>
    %733 = arith.addf %732, %731 : vector<2x32xf32>
    %734 = arith.divf %732, %733 : vector<2x32xf32>
    %735 = vector.extract_strided_slice %728 {offsets = [0, 32], sizes = [2, 32], strides = [1, 1]} : vector<2x128xf32> to vector<2x32xf32>
    %736 = arith.negf %735 : vector<2x32xf32>
    %737 = math.exp %736 : vector<2x32xf32>
    %cst_185 = arith.constant 1.000000e+00 : f32
    %738 = vector.broadcast %cst_185 : f32 to vector<2x32xf32>
    %739 = arith.addf %738, %737 : vector<2x32xf32>
    %740 = arith.divf %738, %739 : vector<2x32xf32>
    %741 = vector.extract_strided_slice %728 {offsets = [0, 64], sizes = [2, 32], strides = [1, 1]} : vector<2x128xf32> to vector<2x32xf32>
    %742 = math.tanh %741 : vector<2x32xf32>
    %743 = vector.extract_strided_slice %728 {offsets = [0, 96], sizes = [2, 32], strides = [1, 1]} : vector<2x128xf32> to vector<2x32xf32>
    %744 = arith.negf %743 : vector<2x32xf32>
    %745 = math.exp %744 : vector<2x32xf32>
    %cst_186 = arith.constant 1.000000e+00 : f32
    %746 = vector.broadcast %cst_186 : f32 to vector<2x32xf32>
    %747 = arith.addf %746, %745 : vector<2x32xf32>
    %748 = arith.divf %746, %747 : vector<2x32xf32>
    %749 = arith.mulf %740, %722 : vector<2x32xf32>
    %750 = arith.mulf %734, %742 : vector<2x32xf32>
    %751 = arith.addf %749, %750 : vector<2x32xf32>
    %752 = math.tanh %751 : vector<2x32xf32>
    %753 = arith.mulf %748, %752 : vector<2x32xf32>
    %c0_187 = arith.constant 0 : index
    %c0_188 = arith.constant 0 : index
    %754 = vector.load %arg9[%c0_187, %c0_188] : memref<64x10xf32, #tpu.memory_space<vmem>>, vector<32x10xf32>
    %cst_189 = arith.constant dense<0.000000e+00> : vector<2x10xf32>
    %755 = tpu.matmul %753, %754, %cst_189 {dimension_numbers = #tpu.dot_dimension_numbers<[1], [0], [0], [1], [0, 0, 1, 1], [], []>} : vector<2x32xf32>, vector<32x10xf32>, vector<2x10xf32> -> vector<2x10xf32>
    %c32_190 = arith.constant 32 : index
    %c0_191 = arith.constant 0 : index
    %756 = vector.load %arg9[%c32_190, %c0_191] : memref<64x10xf32, #tpu.memory_space<vmem>>, vector<32x10xf32>
    %cst_192 = arith.constant dense<0.000000e+00> : vector<2x10xf32>
    %757 = tpu.matmul %550, %756, %cst_192 {dimension_numbers = #tpu.dot_dimension_numbers<[1], [0], [0], [1], [0, 0, 1, 1], [], []>} : vector<2x32xf32>, vector<32x10xf32>, vector<2x10xf32> -> vector<2x10xf32>
    %758 = arith.addf %755, %757 : vector<2x10xf32>
    %c0_193 = arith.constant 0 : index
    %c0_194 = arith.constant 0 : index
    %759 = vector.load %arg10[%c0_193, %c0_194] : memref<1x10xf32, #tpu.memory_space<vmem>>, vector<1x10xf32>
    %760 = vector.broadcast %759 : vector<1x10xf32> to vector<2x10xf32>
    %761 = arith.addf %758, %760 : vector<2x10xf32>
    %c0_195 = arith.constant 0 : index
    %c0_196 = arith.constant 0 : index
    %762 = vector.load %arg11[%c0_195, %c0_196] : memref<2x10xf32, #tpu.memory_space<vmem>>, vector<2x10xf32>
    tpu.vector_store %arg11[%c0_195, %c0_196], %761 {strides = array<i32>} : memref<2x10xf32, #tpu.memory_space<vmem>>, vector<2x10xf32>,
    return
  }
}

</mosaic_0001>

<bundles_post_ra>
// kernel: bi_lstm_forward.1
= control target key start
LH: loop header
LB: loop body
LE: loop exit
PB: predicated region body
PF: predicated region fallthrough
CT: control target
= control target key end

     0   :  { %vm68_vm0 = vcmask 1043456   ;;  %v4117_v5 = vmov 0.0|0.0   ;;  %vm4118_vm1 = vmmov 1   ;;  %v4119_v13 = vmov 0.0   ;;  %s4891_s0 = inlined_call_operand.vmem [shape: f32[16,28], index: 0, kind: input, shape index: {}]   ;;  %s4892_s1 = inlined_call_operand.vmem [shape: f32[28,256], index: 1, kind: input, shape index: {}]   ;;  %s4893_s2 = inlined_call_operand.vmem [shape: f32[32,128], index: 2, kind: input, shape index: {}]   ;;  %s4894_s3 = inlined_call_operand.vmem [shape: f32[32,128], index: 3, kind: input, shape index: {}]   ;;  %s4895_s4 = inlined_call_operand.vmem [shape: f32[1,256], index: 4, kind: input, shape index: {}]   ;;  %s4896_s5 = inlined_call_operand.vmem [shape: f32[64,256], index: 5, kind: input, shape index: {}]   ;;  %s4897_s6 = inlined_call_operand.vmem [shape: f32[32,128], index: 6, kind: input, shape index: {}]   ;;  %s4898_s7 = inlined_call_operand.vmem [shape: f32[32,128], index: 7, kind: input, shape index: {}]   ;;  %s4899_s8 = inlined_call_operand.vmem [shape: f32[1,256], index: 8, kind: input, shape index: {}]   ;;  %s4900_s9 = inlined_call_operand.vmem [shape: f32[64,10], index: 9, kind: input, shape index: {}]   ;;  %s4901_s10 = inlined_call_operand.vmem [shape: f32[1,10], index: 10, kind: input, shape index: {}]   ;;  %s4902_s11 = inlined_call_operand.hbm [shape: f32[2,10], index: 11, kind: output, shape index: {}]  }
   0x1   :  { %v42_v0 = vld [vmem:[%s4892_s1 + $0x8] sm:$0xff]  ;;  %v44_v1 = vld [vmem:[%s4892_s1 + $0x18] sm:$0xff]  ;;  %v41_v2 = vld [vmem:[%s4892_s1] sm:$0xff]  ;;  %3708 = vmatprep.subr.bf16.mxu1 %v4117_v5  ;;  %139 = vmatprep.mubr.f32.mxu0 %v4119_v13  ;;  %vm4120_vm3 = vmmov 0  }
   0x2   :  { %v3698_v3 = vpack.c.bf16 %v44_v1, %v42_v0  ;;  %v43_v4 = vld [vmem:[%s4892_s1 + $0x10] sm:$0xff]  ;;  %v46_v6 = vld [vmem:[%s4892_s1 + $0x28] sm:$0xff]  ;;  %v48_v7 = vld [vmem:[%s4892_s1 + $0x38] sm:$0xf]  ;;  %3409 = vmatprep.mubr.msk.f32.mxu1 %vm4120_vm3, %v4119_v13 }
   0x3   :  { %v3700_v8 = vpack.c.bf16 %v43_v4, %v41_v2  ;;  %v3702_v9 = vpack.c.bf16 %v48_v7, %v46_v6  ;;  %vm4203_vm2 = vmpackc.low %vm68_vm0, %vm4118_vm1  ;;  %v152_v11 = vld [vmem:[%s4893_s2] sm:$0xff]  ;;  %v153_v12 = vld [vmem:[%s4893_s2 + $0x8] sm:$0xff] }
   0x4   :  { %3699 = vmatprep.subr.bf16.mxu0 %v3698_v3  ;;  %v4214_v14 = vpack.c.bf16 %v153_v12, %v152_v11  ;;  %v45_v15 = vld [vmem:[%s4892_s1 + $0x20] sm:$0xff]  ;;  %v47_v16 = vld [vmem:[%s4892_s1 + $0x30] sm:$0xf]  ;;  %v155_v19 = vld [vmem:[%s4893_s2 + $0x18] sm:$0xff] }
   0x5   :  { %3701 = vmatpush1.bf16.msra.mxu0 %v3700_v8  ;;  %v3705_v17 = vpack.c.bf16 %v47_v16, %v45_v15  ;;  %v154_v18 = vld [vmem:[%s4893_s2 + $0x10] sm:$0xff]  ;;  %v230_v21 = vld [vmem:[%s4894_s3] sm:$0xff]  ;;  %v231_v22 = vld [vmem:[%s4894_s3 + $0x8] sm:$0xff] }
   0x6   :  { %3704 = vmatprep.subr.msk.bf16.mxu0 %vm4203_vm2, %v3702_v9  ;;  %3710 = vmatpush3.bf16.msra.mxu1 %v4214_v14  ;;  %v4233_v20 = vpack.c.bf16 %v155_v19, %v154_v18 }
   0x7   :  { %3711 = vmatprep.subr.bf16.mxu1 %v4117_v5 }
   0x8   :  { %16 = vsyncpa [#allocation4], 0  ;;  %v39_v23 = vld [vmem:[%s4891_s0] sm:$0xff]  ;;  %vm61_vm4 = vcmask 228352   ;;  %v4247_v24 = vpack.c.bf16 %v231_v22, %v230_v21  ;;  %v232_v25 = vld [vmem:[%s4894_s3 + $0x10] sm:$0xff]  ;;  %v51_v29 = vlaneseq  ;;  %s4122_s14 = smov 32  }
   0x9   :  { %3707 = vmatpush1.bf16.msk.msra.mxu0 %vm4203_vm2, %v3705_v17  ;;  %v233_v26 = vld [vmem:[%s4894_s3 + $0x18] sm:$0xff]  ;;  %v40_v27 = vld [vmem:[%s4891_s0 + $0x8] sm:$0xff]  ;;  %v49_v32 = vld [vmem:[%s4895_s4] sm:$0x3]  ;;  %s4121_s4 = smov 64   ;;  %vm156_vm5 = vcmask 261120  }
   0xa   :  { %3713 = vmatpush3.bf16.msra.mxu1 %v4233_v20  ;;  %3714 = vmatprep.subr.bf16.mxu0 %v4117_v5  ;;  %v4264_v28 = vpack.c.bf16 %v233_v26, %v232_v25  ;;  %v4286_v30 = vshrl.u32 %v51_v29, 7  ;;  %vm361_vm6 = vcmask 254976   ;;  %vm822_vm7 = vcmask 259076  }
   0xb   :  { %3720 = vmatprep.subr.bf16.mxu1 %v4117_v5  ;;  %vm590_vm8 = vcmask 257026   ;;  %vm828_vm9 = vcmask 519426   ;;  %vm1051_vm10 = vcmask 261126   ;;  %vm367_vm11 = vcmask 523526  }
   0xc   :  { %3213 = vmatmul.mubr.msk.f32.vlgmr.msra.gmra.mrb[0].mxu0 %vm61_vm4, %v39_v23  ;;  %v57_v31 = vsub.s32 1, %v4286_v30  ;;  %v53_v34 = vsub.s32 0, %v4286_v30  ;;  %vm596_vm12 = vcmask 521476   ;;  %vm1057_vm13 = vcmask 517376  }
   0xd   :  { %3716 = vmatpush3.bf16.msra.mxu0 %v4247_v24  ;;  %145 = vmatprep.mubr.f32.mxu0 %v4119_v13  ;;  %vm1999_vm14 = vcmask 523264   ;;  %vm3195_vm15 = vcmask 74752  }
   0xe   :  { %3410 = vmatmul.mubr.f32.vlgmr.msra.gmra.mrb[0].mxu1 %v4119_v13  ;;  %3717 = vmatprep.subr.bf16.mxu0 %v4117_v5  ;;  %v58_v33 = vrot.slane %v49_v32, %v57_v31  ;;  %v54_v39 = vrot.slane %v49_v32, %v53_v34 }
   0xf   :  { %3722 = vmatpush3.bf16.msra.mxu1 %v4214_v14  ;;  %3431 = vmatprep.mubr.msk.f32.mxu1 %vm4120_vm3, %v4119_v13 }
  0x10   :  { %3214 = vmatmul.mubr.msk.f32.gmra.mrb[2].mxu0 %vm61_vm4, %v40_v27  ;;  %3723 = vmatprep.subr.bf16.mxu1 %v4117_v5 }
  0x11   :  { %3719 = vmatpush3.bf16.msra.mxu0 %v4264_v28  ;;  %3420 = vmatprep.mubr.msk.f32.mxu0 %vm4120_vm3, %v4119_v13 }
  0x12   :  { %3726 = vmatprep.subr.bf16.mxu0 %v4117_v5 }
  0x13   :  { %3725 = vmatpush3.bf16.msra.mxu1 %v4233_v20 }
  0x14   :  { %3421 = vmatmul.mubr.f32.vlgmr.msra.gmra.mrb[4].mxu0 %v4119_v13  ;;  %3732 = vmatprep.subr.bf16.mxu1 %v4117_v5 }
  0x15   :  { %3728 = vmatpush3.bf16.msra.mxu0 %v4247_v24  ;;  %3442 = vmatprep.mubr.msk.f32.mxu0 %vm4120_vm3, %v4119_v13 }
  0x16   :  { %3729 = vmatprep.subr.bf16.mxu0 %v4117_v5 }
  0x19   :  { %3731 = vmatpush3.bf16.msra.mxu0 %v4264_v28 }
  0x1a   :  { %3738 = vmatprep.subr.bf16.mxu0 %v4117_v5 }
  0xdf   :  { %v141_v35 = vpop.f32.mrb[0].mxu0 }
  0xe0   :  { %v143_v36 = vpop.f32.mrb[1].mxu0  ;;  %v4305_v53 = vadd.f32 %v141_v35, %v54_v39 }
  0xe1   :  { %v4295_v37 = vadd.f32 %v143_v36, %v58_v33  ;;  %v226_v38 = vpop.f32.mrb[0].mxu1 }
  0xe2   :  { %v3411_v40 = vpop.f32.mrb[1].mxu1  ;;  %v304_v54 = vadd.f32 %v226_v38, %v4305_v53 }
  0xe3   :  { %v147_v41 = vpop.f32.mrb[2].mxu0 }
  0xe4   :  { %v4299_v42 = vadd.f32 %v147_v41, %v54_v39  ;;  %v149_v43 = vpop.f32.mrb[3].mxu0  ;;  %v3215_v59 = vmul.f32 -1.442695, %v304_v54 }
  0xe5   :  { %v4301_v45 = vadd.f32 %v149_v43, %v58_v33 }
  0xe7   :  { %v300_v44 = vpop.f32.mrb[4].mxu0 }
  0xe8   :  { %v330_v46 = vrot.slane %v300_v44, 2  ;;  %v3422_v47 = vpop.f32.mrb[5].mxu0 }
  0xea   :  { %v332_v48 = vadd.f32 %v330_v46, %v4301_v45 }
  0xec   :  { %3893 = vtanh.f32 %v332_v48  ;;  %v3216_v50 = vmul.f32 -1.442695, %v332_v48 }
  0xee   :  { %3895 = vpow2.f32 %v3216_v50 }
  0xf6   :  { %v3894_v49 = vpop.eup %3893 }
  0xf7   :  { %342 = vrot.lane.b32.xlu0 %v3894_v49, %s4121_s4 }
  0xf8   :  { %v3896_v51 = vpop.eup %3895 }
  0xf9   :  { %v336_v52 = vadd.f32 1.0, %v3896_v51 }
  0xfb   :  { %3897 = vrcp.f32 %v336_v52 }
  0xfc   :  { %3899 = vtanh.f32 %v304_v54 }
  0xfd   :  { %3901 = vpow2.f32 %v3215_v59 }
 0x105   :  { %v3898_v55 = vpop.eup %3897 }
 0x106   :  { %v3900_v58 = vpop.eup %3899  ;;  %v340_v62 = vmul.f32 0.0, %v3898_v55 }
 0x107   :  { %v3902_v60 = vpop.eup %3901 }
 0x108   :  { %v308_v61 = vadd.f32 1.0, %v3902_v60 }
 0x10a   :  { %3903 = vrcp.f32 %v308_v61 }
 0x114   :  { %v3904_v1 = vpop.eup %3903 }
 0x115   :  { %v312_v6 = vmul.f32 0.0, %v3904_v1 }
 0x169   :  { %v343_v56 = vpop.permute.xlu0 %342 }
 0x16a   :  { %v345_v57 = vmul.f32 %v3898_v55, %v343_v56 }
 0x16c   :  { %347 = vrot.lane.b32.xlu0 %v345_v57, %s4122_s14 }
 0x170   :  { %314 = vrot.lane.b32.xlu0 %v3900_v58, %s4121_s4 }
 0x1de   :  { %v348_v63 = vpop.permute.xlu0 %347 }
 0x1df   :  { %v4310_v0 = vadd.f32 %v348_v63, %v340_v62 }
 0x1e1   :  { %3905 = vtanh.f32 %v4310_v0  ;;  %v567_v47 = vrot.slane %v4310_v0, 2 }
 0x1e2   :  { %v315_v2 = vpop.permute.xlu0 %314 }
 0x1e3   :  { %v317_v3 = vmul.f32 %v3904_v1, %v315_v2 }
 0x1e5   :  { %319 = vrot.lane.b32.xlu0 %v317_v3, %s4122_s14 }
 0x1eb   :  { %v3906_v4 = vpop.eup %3905 }
 0x1ec   :  { %353 = vrot.lane.b32.xlu1 %v3906_v4, %s4121_s4 }
 0x257   :  { %v320_v7 = vpop.permute.xlu0 %319 }
 0x258   :  { %v4315_v8 = vadd.f32 %v320_v7, %v312_v6 }
 0x25a   :  { %3907 = vtanh.f32 %v4315_v8  ;;  %v536_v56 = vrot.slane %v4315_v8, 6 }
 0x25e   :  { %v354_v9 = vpop.permute.xlu1 %353 }
 0x25f   :  { %v4318_v10 = vmul.f32 %v3898_v55, %v354_v9 }
 0x261   :  { %v449_v11 = vrot.slane %v4318_v10, 6 }
 0x263   :  { %450 = vrot.lane.b32.xlu1 %v449_v11, %s4122_s14 }
 0x264   :  { %v3908_v12 = vpop.eup %3907 }
 0x265   :  { %325 = vrot.lane.b32.xlu0 %v3908_v12, %s4121_s4 }
 0x2d5   :  { %v451_v15 = vpop.permute.xlu1 %450 }
 0x2d6   :  { %3443 = vmatmul.mubr.msk.f32.vlgmr.msra.gmra.mrb[6].mxu0 %vm156_vm5, %v451_v15 }
 0x2d7   :  { %v326_v16 = vpop.permute.xlu0 %325  ;;  %3740 = vmatpush3.bf16.msra.mxu0 %v4247_v24  ;;  %3464 = vmatprep.mubr.msk.f32.mxu0 %vm4120_vm3, %v4119_v13 }
 0x2d8   :  { %v328_v17 = vmul.f32 %v3904_v1, %v326_v16  ;;  %3741 = vmatprep.subr.bf16.mxu0 %v4117_v5 }
 0x2da   :  { %358 = vrot.lane.b32.xlu0 %v328_v17, %s4122_s14 }
 0x2db   :  { %3743 = vmatpush3.bf16.msra.mxu0 %v4264_v28 }
 0x2dc   :  { %3750 = vmatprep.subr.bf16.mxu0 %v4117_v5 }
 0x34c   :  { %v359_v18 = vpop.permute.xlu0 %358 }
 0x34d   :  { %362 = vst.msk [vmem:[#allocation2] sm:$0x3] %vm361_vm6, %v359_v18  ;;  %3432 = vmatmul.mubr.msk.f32.vlgmr.msra.gmra.mrb[2].mxu1 %vm156_vm5, %v359_v18 }
 0x34e   :  { %3734 = vmatpush3.bf16.msra.mxu1 %v4214_v14  ;;  %3453 = vmatprep.mubr.msk.f32.mxu1 %vm4120_vm3, %v4119_v13 }
 0x34f   :  { %3735 = vmatprep.subr.bf16.mxu1 %v4117_v5 }
 0x352   :  { %3737 = vmatpush3.bf16.msra.mxu1 %v4233_v20 }
 0x353   :  { %3744 = vmatprep.subr.bf16.mxu1 %v4117_v5 }
 0x3a9   :  { %v520_v19 = vpop.f32.mrb[6].mxu0 }
 0x3aa   :  { %v556_v21 = vrot.slane %v520_v19, 4  ;;  %v3444_v22 = vpop.f32.mrb[7].mxu0 }
 0x3ac   :  { %v558_v23 = vadd.f32 %v556_v21, %v4301_v45 }
 0x3ae   :  { %3909 = vtanh.f32 %v558_v23  ;;  %v3220_v26 = vmul.f32 -1.442695, %v558_v23 }
 0x3b0   :  { %3911 = vpow2.f32 %v3220_v26 }
 0x3b8   :  { %v3910_v25 = vpop.eup %3909 }
 0x3b9   :  { %571 = vrot.lane.b32.xlu1 %v3910_v25, %s4121_s4 }
 0x3ba   :  { %v3912_v27 = vpop.eup %3911 }
 0x3bb   :  { %v562_v29 = vadd.f32 1.0, %v3912_v27 }
 0x3bd   :  { %3913 = vrcp.f32 %v562_v29 }
 0x3c7   :  { %v3914_v38 = vpop.eup %3913 }
 0x3c8   :  { %v569_v48 = vmul.f32 %v3914_v38, %v567_v47 }
 0x420   :  { %v441_v32 = vpop.f32.mrb[2].mxu1 }
 0x421   :  { %v525_v33 = vrot.slane %v441_v32, 6  ;;  %v3433_v35 = vpop.f32.mrb[3].mxu1 }
 0x423   :  { %v527_v36 = vadd.f32 %v525_v33, %v4305_v53 }
 0x425   :  { %3915 = vtanh.f32 %v527_v36  ;;  %v3219_v43 = vmul.f32 -1.442695, %v527_v36 }
 0x427   :  { %3917 = vpow2.f32 %v3219_v43 }
 0x42b   :  { %v572_v39 = vpop.permute.xlu1 %571 }
 0x42c   :  { %v574_v40 = vmul.f32 %v3914_v38, %v572_v39 }
 0x42e   :  { %576 = vrot.lane.b32.xlu1 %v574_v40, %s4122_s14 }
 0x42f   :  { %v3916_v41 = vpop.eup %3915 }
 0x430   :  { %540 = vrot.lane.b32.xlu0 %v3916_v41, %s4121_s4 }
 0x431   :  { %v3918_v44 = vpop.eup %3917 }
 0x432   :  { %v531_v46 = vadd.f32 1.0, %v3918_v44 }
 0x434   :  { %3919 = vrcp.f32 %v531_v46 }
 0x43e   :  { %v3920_v51 = vpop.eup %3919 }
 0x43f   :  { %v538_v57 = vmul.f32 %v3920_v51, %v536_v56 }
 0x4a0   :  { %v577_v49 = vpop.permute.xlu1 %576 }
 0x4a1   :  { %v4345_v50 = vadd.f32 %v577_v49, %v569_v48 }
 0x4a2   :  { %v541_v52 = vpop.permute.xlu0 %540 }
 0x4a3   :  { %3921 = vtanh.f32 %v4345_v50  ;;  %v543_v54 = vmul.f32 %v3920_v51, %v541_v52  ;;  %v799_v33 = vrot.slane %v4345_v50, 2 }
 0x4a5   :  { %545 = vrot.lane.b32.xlu0 %v543_v54, %s4122_s14 }
 0x4ad   :  { %v3922_v55 = vpop.eup %3921 }
 0x4ae   :  { %582 = vrot.lane.b32.xlu1 %v3922_v55, %s4121_s4 }
 0x517   :  { %v546_v58 = vpop.permute.xlu0 %545 }
 0x518   :  { %v4351_v59 = vadd.f32 %v546_v58, %v538_v57 }
 0x51a   :  { %3923 = vtanh.f32 %v4351_v59  ;;  %v768_v44 = vrot.slane %v4351_v59, 6 }
 0x520   :  { %v583_v60 = vpop.permute.xlu1 %582 }
 0x521   :  { %v4354_v61 = vmul.f32 %v3914_v38, %v583_v60 }
 0x523   :  { %v681_v62 = vrot.slane %v4354_v61, 4 }
 0x524   :  { %v3924_v63 = vpop.eup %3923 }
 0x525   :  { %682 = vrot.lane.b32.xlu1 %v681_v62, %s4122_s14  ;;  %551 = vrot.lane.b32.xlu0 %v3924_v63, %s4121_s4 }
 0x597   :  { %v683_v0 = vpop.permute.xlu1 %682  ;;  %v552_v1 = vpop.permute.xlu0 %551 }
 0x598   :  { %v4359_v2 = vmul.f32 %v3920_v51, %v552_v1  ;;  %3465 = vmatmul.mubr.msk.f32.vlgmr.msra.gmra.mrb[8].mxu0 %vm156_vm5, %v683_v0 }
 0x599   :  { %3752 = vmatpush3.bf16.msra.mxu0 %v4247_v24  ;;  %3486 = vmatprep.mubr.msk.f32.mxu0 %vm4120_vm3, %v4119_v13 }
 0x59a   :  { %v602_v3 = vrot.slane %v4359_v2, 2  ;;  %3753 = vmatprep.subr.bf16.mxu0 %v4117_v5 }
 0x59c   :  { %603 = vrot.lane.b32.xlu0 %v602_v3, %s4122_s14 }
 0x59d   :  { %3755 = vmatpush3.bf16.msra.mxu0 %v4264_v28 }
 0x59e   :  { %3762 = vmatprep.subr.bf16.mxu0 %v4117_v5 }
 0x60e   :  { %v604_v4 = vpop.permute.xlu0 %603 }
 0x60f   :  { %3454 = vmatmul.mubr.msk.f32.vlgmr.msra.gmra.mrb[4].mxu1 %vm156_vm5, %v604_v4 }
 0x610   :  { %3746 = vmatpush3.bf16.msra.mxu1 %v4214_v14  ;;  %3475 = vmatprep.mubr.msk.f32.mxu1 %vm4120_vm3, %v4119_v13 }
 0x611   :  { %3747 = vmatprep.subr.bf16.mxu1 %v4117_v5 }
 0x614   :  { %3749 = vmatpush3.bf16.msra.mxu1 %v4233_v20 }
 0x615   :  { %3756 = vmatprep.subr.bf16.mxu1 %v4117_v5 }
 0x66b   :  { %v752_v6 = vpop.f32.mrb[8].mxu0 }
 0x66c   :  { %v788_v7 = vrot.slane %v752_v6, 6  ;;  %v3466_v8 = vpop.f32.mrb[9].mxu0 }
 0x66e   :  { %v790_v9 = vadd.f32 %v788_v7, %v4301_v45 }
 0x670   :  { %3925 = vtanh.f32 %v790_v9  ;;  %v3224_v12 = vmul.f32 -1.442695, %v790_v9 }
 0x672   :  { %3927 = vpow2.f32 %v3224_v12 }
 0x67a   :  { %v3926_v11 = vpop.eup %3925 }
 0x67b   :  { %803 = vrot.lane.b32.xlu1 %v3926_v11, %s4121_s4 }
 0x67c   :  { %v3928_v15 = vpop.eup %3927 }
 0x67d   :  { %v794_v16 = vadd.f32 1.0, %v3928_v15 }
 0x67f   :  { %3929 = vrcp.f32 %v794_v16 }
 0x689   :  { %v3930_v22 = vpop.eup %3929 }
 0x68a   :  { %v801_v35 = vmul.f32 %v3930_v22, %v799_v33 }
 0x6e2   :  { %v673_v17 = vpop.f32.mrb[4].mxu1 }
 0x6e3   :  { %v757_v18 = vrot.slane %v673_v17, 4  ;;  %v3455_v19 = vpop.f32.mrb[5].mxu1 }
 0x6e5   :  { %v759_v21 = vadd.f32 %v757_v18, %v4305_v53 }
 0x6e7   :  { %3931 = vtanh.f32 %v759_v21  ;;  %v3223_v27 = vmul.f32 -1.442695, %v759_v21 }
 0x6e9   :  { %3933 = vpow2.f32 %v3223_v27 }
 0x6ed   :  { %v804_v23 = vpop.permute.xlu1 %803 }
 0x6ee   :  { %v806_v25 = vmul.f32 %v3930_v22, %v804_v23 }
 0x6f0   :  { %808 = vrot.lane.b32.xlu1 %v806_v25, %s4122_s14 }
 0x6f1   :  { %v3932_v26 = vpop.eup %3931 }
 0x6f2   :  { %772 = vrot.lane.b32.xlu0 %v3932_v26, %s4121_s4 }
 0x6f3   :  { %v3934_v29 = vpop.eup %3933 }
 0x6f4   :  { %v763_v32 = vadd.f32 1.0, %v3934_v29 }
 0x6f6   :  { %3935 = vrcp.f32 %v763_v32 }
 0x700   :  { %v3936_v39 = vpop.eup %3935 }
 0x701   :  { %v770_v46 = vmul.f32 %v3936_v39, %v768_v44 }
 0x762   :  { %v809_v36 = vpop.permute.xlu1 %808 }
 0x763   :  { %v4383_v38 = vadd.f32 %v809_v36, %v801_v35 }
 0x764   :  { %v773_v40 = vpop.permute.xlu0 %772 }
 0x765   :  { %3937 = vtanh.f32 %v4383_v38  ;;  %v775_v41 = vmul.f32 %v3936_v39, %v773_v40  ;;  %v1028_v18 = vrot.slane %v4383_v38, 2 }
 0x767   :  { %777 = vrot.lane.b32.xlu0 %v775_v41, %s4122_s14 }
 0x76f   :  { %v3938_v43 = vpop.eup %3937 }
 0x770   :  { %814 = vrot.lane.b32.xlu1 %v3938_v43, %s4121_s4 }
 0x7d9   :  { %v778_v47 = vpop.permute.xlu0 %777 }
 0x7da   :  { %v4389_v48 = vadd.f32 %v778_v47, %v770_v46 }
 0x7dc   :  { %3939 = vtanh.f32 %v4389_v48  ;;  %v1000_v27 = vrot.slane %v4389_v48, 6 }
 0x7e2   :  { %v815_v49 = vpop.permute.xlu1 %814 }
 0x7e3   :  { %v4392_v50 = vmul.f32 %v3930_v22, %v815_v49 }
 0x7e5   :  { %v913_v51 = vrot.slane %v4392_v50, 2 }
 0x7e6   :  { %v3940_v52 = vpop.eup %3939 }
 0x7e7   :  { %914 = vrot.lane.b32.xlu1 %v913_v51, %s4122_s14  ;;  %783 = vrot.lane.b32.xlu0 %v3940_v52, %s4121_s4 }
 0x859   :  { %v915_v54 = vpop.permute.xlu1 %914  ;;  %v784_v55 = vpop.permute.xlu0 %783 }
 0x85a   :  { %v4397_v56 = vmul.f32 %v3936_v39, %v784_v55  ;;  %3487 = vmatmul.mubr.msk.f32.vlgmr.msra.gmra.mrb[10].mxu0 %vm156_vm5, %v915_v54 }
 0x85b   :  { %3764 = vmatpush3.bf16.msra.mxu0 %v4247_v24  ;;  %3508 = vmatprep.mubr.msk.f32.mxu0 %vm4120_vm3, %v4119_v13 }
 0x85c   :  { %v834_v57 = vrot.slane %v4397_v56, 4  ;;  %3765 = vmatprep.subr.bf16.mxu0 %v4117_v5 }
 0x85e   :  { %835 = vrot.lane.b32.xlu0 %v834_v57, %s4122_s14 }
 0x85f   :  { %3767 = vmatpush3.bf16.msra.mxu0 %v4264_v28 }
 0x860   :  { %3774 = vmatprep.subr.bf16.mxu0 %v4117_v5 }
 0x8d0   :  { %v836_v58 = vpop.permute.xlu0 %835 }
 0x8d1   :  { %3476 = vmatmul.mubr.msk.f32.vlgmr.msra.gmra.mrb[6].mxu1 %vm156_vm5, %v836_v58 }
 0x8d2   :  { %3758 = vmatpush3.bf16.msra.mxu1 %v4214_v14  ;;  %3497 = vmatprep.mubr.msk.f32.mxu1 %vm4120_vm3, %v4119_v13 }
 0x8d3   :  { %3759 = vmatprep.subr.bf16.mxu1 %v4117_v5 }
 0x8d6   :  { %3761 = vmatpush3.bf16.msra.mxu1 %v4233_v20 }
 0x8d7   :  { %3768 = vmatprep.subr.bf16.mxu1 %v4117_v5 }
 0x92d   :  { %v984_v59 = vpop.f32.mrb[10].mxu0 }
 0x92e   :  { %v1019_v60 = vadd.f32 %v984_v59, %v4301_v45  ;;  %v3488_v62 = vpop.f32.mrb[11].mxu0 }
 0x930   :  { %3941 = vtanh.f32 %v1019_v60  ;;  %v3228_v0 = vmul.f32 -1.442695, %v1019_v60 }
 0x932   :  { %3943 = vpow2.f32 %v3228_v0 }
 0x93a   :  { %v3942_v63 = vpop.eup %3941 }
 0x93b   :  { %1032 = vrot.lane.b32.xlu1 %v3942_v63, %s4121_s4 }
 0x93c   :  { %v3944_v1 = vpop.eup %3943 }
 0x93d   :  { %v1023_v3 = vadd.f32 1.0, %v3944_v1 }
 0x93f   :  { %3945 = vrcp.f32 %v1023_v3 }
 0x949   :  { %v3946_v9 = vpop.eup %3945 }
 0x94a   :  { %v1030_v19 = vmul.f32 %v3946_v9, %v1028_v18 }
 0x9a4   :  { %v905_v4 = vpop.f32.mrb[6].mxu1 }
 0x9a5   :  { %v989_v6 = vrot.slane %v905_v4, 2  ;;  %v3477_v7 = vpop.f32.mrb[7].mxu1 }
 0x9a7   :  { %v991_v8 = vadd.f32 %v989_v6, %v4305_v53 }
 0x9a9   :  { %3947 = vtanh.f32 %v991_v8  ;;  %v3227_v15 = vmul.f32 -1.442695, %v991_v8 }
 0x9ab   :  { %3949 = vpow2.f32 %v3227_v15 }
 0x9ad   :  { %v1033_v11 = vpop.permute.xlu1 %1032 }
 0x9ae   :  { %v1035_v12 = vmul.f32 %v3946_v9, %v1033_v11 }
 0x9b0   :  { %1037 = vrot.lane.b32.xlu1 %v1035_v12, %s4122_s14 }
 0x9b3   :  { %v3948_v45 = vpop.eup %3947 }
 0x9b4   :  { %1004 = vrot.lane.b32.xlu0 %v3948_v45, %s4121_s4 }
 0x9b5   :  { %v3950_v16 = vpop.eup %3949 }
 0x9b6   :  { %v995_v17 = vadd.f32 1.0, %v3950_v16 }
 0x9b8   :  { %3951 = vrcp.f32 %v995_v17 }
 0x9c2   :  { %v3952_v53 = vpop.eup %3951 }
 0x9c3   :  { %v1002_v29 = vmul.f32 %v3952_v53, %v1000_v27 }
 0xa22   :  { %v1038_v21 = vpop.permute.xlu1 %1037 }
 0xa23   :  { %v4421_v22 = vadd.f32 %v1038_v21, %v1030_v19 }
 0xa25   :  { %3953 = vtanh.f32 %v4421_v22  ;;  %v1256_v6 = vrot.slane %v4421_v22, 2 }
 0xa26   :  { %v1005_v23 = vpop.permute.xlu0 %1004 }
 0xa27   :  { %v1007_v25 = vmul.f32 %v3952_v53, %v1005_v23 }
 0xa29   :  { %1009 = vrot.lane.b32.xlu0 %v1007_v25, %s4122_s14 }
 0xa2f   :  { %v3954_v26 = vpop.eup %3953 }
 0xa30   :  { %1043 = vrot.lane.b32.xlu1 %v3954_v26, %s4121_s4 }
 0xa9b   :  { %v1010_v32 = vpop.permute.xlu0 %1009 }
 0xa9c   :  { %v4427_v33 = vadd.f32 %v1010_v32, %v1002_v29 }
 0xa9e   :  { %3955 = vtanh.f32 %v4427_v33  ;;  %v1225_v16 = vrot.slane %v4427_v33, 6 }
 0xaa2   :  { %v1044_v35 = vpop.permute.xlu1 %1043 }
 0xaa3   :  { %v4430_v36 = vmul.f32 %v3946_v9, %v1044_v35 }
 0xaa5   :  { %1142 = vrot.lane.b32.xlu1 %v4430_v36, %s4122_s14 }
 0xaa8   :  { %v3956_v38 = vpop.eup %3955 }
 0xaa9   :  { %1015 = vrot.lane.b32.xlu0 %v3956_v38, %s4121_s4 }
 0xb17   :  { %v1143_v39 = vpop.permute.xlu1 %1142 }
 0xb18   :  { %3509 = vmatmul.mubr.msk.f32.vlgmr.msra.gmra.mrb[12].mxu0 %vm156_vm5, %v1143_v39 }
 0xb19   :  { %3776 = vmatpush3.bf16.msra.mxu0 %v4247_v24  ;;  %3530 = vmatprep.mubr.msk.f32.mxu0 %vm4120_vm3, %v4119_v13 }
 0xb1a   :  { %3777 = vmatprep.subr.bf16.mxu0 %v4117_v5 }
 0xb1b   :  { %v1016_v40 = vpop.permute.xlu0 %1015 }
 0xb1c   :  { %v4440_v41 = vmul.f32 %v3952_v53, %v1016_v40 }
 0xb1d   :  { %3779 = vmatpush3.bf16.msra.mxu0 %v4264_v28 }
 0xb1e   :  { %v1063_v43 = vrot.slane %v4440_v41, 6  ;;  %3786 = vmatprep.subr.bf16.mxu0 %v4117_v5 }
 0xb20   :  { %1064 = vrot.lane.b32.xlu0 %v1063_v43, %s4122_s14 }
 0xb92   :  { %v1065_v44 = vpop.permute.xlu0 %1064 }
 0xb93   :  { %3498 = vmatmul.mubr.msk.f32.vlgmr.msra.gmra.mrb[8].mxu1 %vm156_vm5, %v1065_v44 }
 0xb94   :  { %3770 = vmatpush3.bf16.msra.mxu1 %v4214_v14  ;;  %3519 = vmatprep.mubr.msk.f32.mxu1 %vm4120_vm3, %v4119_v13 }
 0xb95   :  { %3771 = vmatprep.subr.bf16.mxu1 %v4117_v5 }
 0xb98   :  { %3773 = vmatpush3.bf16.msra.mxu1 %v4233_v20 }
 0xb99   :  { %3780 = vmatprep.subr.bf16.mxu1 %v4117_v5 }
 0xbeb   :  { %v1212_v46 = vpop.f32.mrb[12].mxu0 }
 0xbec   :  { %v1245_v47 = vrot.slane %v1212_v46, 2  ;;  %v3510_v48 = vpop.f32.mrb[13].mxu0 }
 0xbee   :  { %v1247_v49 = vadd.f32 %v1245_v47, %v4295_v37 }
 0xbf0   :  { %3957 = vtanh.f32 %v1247_v49  ;;  %v3232_v52 = vmul.f32 -1.442695, %v1247_v49 }
 0xbf2   :  { %3959 = vpow2.f32 %v3232_v52 }
 0xbfa   :  { %v3958_v51 = vpop.eup %3957 }
 0xbfb   :  { %1260 = vrot.lane.b32.xlu1 %v3958_v51, %s4121_s4 }
 0xbfc   :  { %v3960_v54 = vpop.eup %3959 }
 0xbfd   :  { %v1251_v55 = vadd.f32 1.0, %v3960_v54 }
 0xbff   :  { %3961 = vrcp.f32 %v1251_v55 }
 0xc09   :  { %v3962_v60 = vpop.eup %3961 }
 0xc0a   :  { %v1258_v7 = vmul.f32 %v3962_v60, %v1256_v6 }
 0xc66   :  { %v1134_v57 = vpop.f32.mrb[8].mxu1 }
 0xc67   :  { %v1216_v58 = vadd.f32 %v1134_v57, %v4299_v42  ;;  %v3499_v59 = vpop.f32.mrb[9].mxu1 }
 0xc69   :  { %3963 = vtanh.f32 %v1216_v58  ;;  %v3231_v1 = vmul.f32 -1.442695, %v1216_v58 }
 0xc6b   :  { %3965 = vpow2.f32 %v3231_v1 }
 0xc6d   :  { %v1261_v62 = vpop.permute.xlu1 %1260 }
 0xc6e   :  { %v1263_v63 = vmul.f32 %v3962_v60, %v1261_v62 }
 0xc70   :  { %1265 = vrot.lane.b32.xlu1 %v1263_v63, %s4122_s14 }
 0xc73   :  { %v3964_v0 = vpop.eup %3963 }
 0xc74   :  { %1229 = vrot.lane.b32.xlu0 %v3964_v0, %s4121_s4 }
 0xc75   :  { %v3966_v3 = vpop.eup %3965 }
 0xc76   :  { %v1220_v4 = vadd.f32 1.0, %v3966_v3 }
 0xc78   :  { %3967 = vrcp.f32 %v1220_v4 }
 0xc82   :  { %v3968_v11 = vpop.eup %3967 }
 0xc83   :  { %v1227_v17 = vmul.f32 %v3968_v11, %v1225_v16 }
 0xce2   :  { %v1266_v8 = vpop.permute.xlu1 %1265 }
 0xce3   :  { %v4459_v9 = vadd.f32 %v1266_v8, %v1258_v7 }
 0xce5   :  { %3969 = vtanh.f32 %v4459_v9  ;;  %v1483_v58 = vrot.slane %v4459_v9, 2 }
 0xce6   :  { %v1230_v12 = vpop.permute.xlu0 %1229 }
 0xce7   :  { %v1232_v45 = vmul.f32 %v3968_v11, %v1230_v12 }
 0xce9   :  { %1234 = vrot.lane.b32.xlu0 %v1232_v45, %s4122_s14 }
 0xcef   :  { %v3970_v15 = vpop.eup %3969 }
 0xcf0   :  { %1271 = vrot.lane.b32.xlu1 %v3970_v15, %s4121_s4 }
 0xd5b   :  { %v1235_v18 = vpop.permute.xlu0 %1234 }
 0xd5c   :  { %v4465_v19 = vadd.f32 %v1235_v18, %v1227_v17 }
 0xd5e   :  { %3971 = vtanh.f32 %v4465_v19  ;;  %v1452_v4 = vrot.slane %v4465_v19, 6 }
 0xd62   :  { %v1272_v21 = vpop.permute.xlu1 %1271 }
 0xd63   :  { %v4468_v22 = vmul.f32 %v3962_v60, %v1272_v21 }
 0xd65   :  { %v1365_v53 = vrot.slane %v4468_v22, 6 }
 0xd67   :  { %1366 = vrot.lane.b32.xlu1 %v1365_v53, %s4122_s14 }
 0xd68   :  { %v3972_v23 = vpop.eup %3971 }
 0xd69   :  { %1240 = vrot.lane.b32.xlu0 %v3972_v23, %s4121_s4 }
 0xdd9   :  { %v1367_v25 = vpop.permute.xlu1 %1366 }
 0xdda   :  { %3531 = vmatmul.mubr.msk.f32.vlgmr.msra.gmra.mrb[14].mxu0 %vm156_vm5, %v1367_v25 }
 0xddb   :  { %v1241_v26 = vpop.permute.xlu0 %1240  ;;  %3788 = vmatpush3.bf16.msra.mxu0 %v4247_v24  ;;  %3552 = vmatprep.mubr.msk.f32.mxu0 %vm4120_vm3, %v4119_v13 }
 0xddc   :  { %v1243_v27 = vmul.f32 %v3968_v11, %v1241_v26  ;;  %3789 = vmatprep.subr.bf16.mxu0 %v4117_v5 }
 0xdde   :  { %1276 = vrot.lane.b32.xlu0 %v1243_v27, %s4122_s14 }
 0xddf   :  { %3791 = vmatpush3.bf16.msra.mxu0 %v4264_v28 }
 0xde0   :  { %3798 = vmatprep.subr.bf16.mxu0 %v4117_v5 }
 0xe50   :  { %v4481_v29 = vpop.permute.xlu0 %1276 }
 0xe51   :  { %3520 = vmatmul.mubr.msk.f32.vlgmr.msra.gmra.mrb[10].mxu1 %vm156_vm5, %v4481_v29 }
 0xe52   :  { %3782 = vmatpush3.bf16.msra.mxu1 %v4214_v14  ;;  %3541 = vmatprep.mubr.msk.f32.mxu1 %vm4120_vm3, %v4119_v13 }
 0xe53   :  { %3783 = vmatprep.subr.bf16.mxu1 %v4117_v5 }
 0xe56   :  { %3785 = vmatpush3.bf16.msra.mxu1 %v4233_v20 }
 0xe57   :  { %3792 = vmatprep.subr.bf16.mxu1 %v4117_v5 }
 0xead   :  { %v1436_v32 = vpop.f32.mrb[14].mxu0 }
 0xeae   :  { %v1472_v33 = vrot.slane %v1436_v32, 4  ;;  %v3532_v35 = vpop.f32.mrb[15].mxu0 }
 0xeb0   :  { %v1474_v38 = vadd.f32 %v1472_v33, %v4295_v37 }
 0xeb2   :  { %3973 = vtanh.f32 %v1474_v38  ;;  %v3236_v40 = vmul.f32 -1.442695, %v1474_v38 }
 0xeb4   :  { %3975 = vpow2.f32 %v3236_v40 }
 0xebc   :  { %v3974_v39 = vpop.eup %3973 }
 0xebd   :  { %1487 = vrot.lane.b32.xlu1 %v3974_v39, %s4121_s4 }
 0xebe   :  { %v3976_v14 = vpop.eup %3975 }
 0xebf   :  { %v1478_v43 = vadd.f32 1.0, %v3976_v14 }
 0xec1   :  { %3977 = vrcp.f32 %v1478_v43 }
 0xecb   :  { %v3978_v48 = vpop.eup %3977 }
 0xecc   :  { %v1485_v59 = vmul.f32 %v3978_v48, %v1483_v58 }
 0xf24   :  { %v1357_v44 = vpop.f32.mrb[10].mxu1 }
 0xf25   :  { %v1441_v46 = vrot.slane %v1357_v44, 6  ;;  %v3521_v47 = vpop.f32.mrb[11].mxu1 }
 0xf27   :  { %v1443_v20 = vadd.f32 %v1441_v46, %v4299_v42 }
 0xf29   :  { %3979 = vtanh.f32 %v1443_v20  ;;  %v3235_v54 = vmul.f32 -1.442695, %v1443_v20 }
 0xf2b   :  { %3981 = vpow2.f32 %v3235_v54 }
 0xf2f   :  { %v1488_v49 = vpop.permute.xlu1 %1487 }
 0xf30   :  { %v1490_v51 = vmul.f32 %v3978_v48, %v1488_v49 }
 0xf32   :  { %1492 = vrot.lane.b32.xlu1 %v1490_v51, %s4122_s14 }
 0xf33   :  { %v3980_v52 = vpop.eup %3979 }
 0xf34   :  { %1456 = vrot.lane.b32.xlu0 %v3980_v52, %s4121_s4 }
 0xf35   :  { %v3982_v55 = vpop.eup %3981 }
 0xf36   :  { %v1447_v57 = vadd.f32 1.0, %v3982_v55 }
 0xf38   :  { %3983 = vrcp.f32 %v1447_v57 }
 0xf42   :  { %v3984_v63 = vpop.eup %3983 }
 0xf43   :  { %v1454_v6 = vmul.f32 %v3984_v63, %v1452_v4  ;;  %v1742_v4 = vld [vmem:[%s4893_s2] sm:$0xff] }
 0xfa4   :  { %v1493_v60 = vpop.permute.xlu1 %1492 }
 0xfa5   :  { %v4497_v62 = vadd.f32 %v1493_v60, %v1485_v59 }
 0xfa6   :  { %v1457_v0 = vpop.permute.xlu0 %1456 }
 0xfa7   :  { %3985 = vtanh.f32 %v4497_v62  ;;  %v1459_v1 = vmul.f32 %v3984_v63, %v1457_v0  ;;  %v1713_v20 = vrot.slane %v4497_v62, 2 }
 0xfa9   :  { %1461 = vrot.lane.b32.xlu0 %v1459_v1, %s4122_s14 }
 0xfb1   :  { %v3986_v3 = vpop.eup %3985 }
 0xfb2   :  { %1498 = vrot.lane.b32.xlu1 %v3986_v3, %s4121_s4 }
0x101b   :  { %v1462_v7 = vpop.permute.xlu0 %1461 }
0x101c   :  { %v4503_v8 = vadd.f32 %v1462_v7, %v1454_v6  ;;  %v1743_v6 = vld [vmem:[%s4893_s2 + $0x8] sm:$0xff]  ;;  %v1744_v7 = vld [vmem:[%s4893_s2 + $0x10] sm:$0xff] }
0x101e   :  { %3987 = vtanh.f32 %v4503_v8  ;;  %v1682_v58 = vrot.slane %v4503_v8, 6  ;;  %v3793_v8 = vpack.c.bf16 %v1743_v6, %v1742_v4  ;;  %v1977_v4 = vld [vmem:[%s4896_s5 + $0x30] sm:$0xff] }
0x1024   :  { %v1499_v9 = vpop.permute.xlu1 %1498 }
0x1025   :  { %v4506_v11 = vmul.f32 %v3978_v48, %v1499_v9  ;;  %v1745_v9 = vld [vmem:[%s4893_s2 + $0x18] sm:$0xff] }
0x1027   :  { %v1595_v12 = vrot.slane %v4506_v11, 4 }
0x1028   :  { %v3988_v45 = vpop.eup %3987 }
0x1029   :  { %1596 = vrot.lane.b32.xlu1 %v1595_v12, %s4122_s14  ;;  %1467 = vrot.lane.b32.xlu0 %v3988_v45, %s4121_s4  ;;  %v3796_v12 = vpack.c.bf16 %v1745_v9, %v1744_v7  ;;  %v1980_v7 = vld [vmem:[%s4896_s5 + $0x48] sm:$0xff] }
0x109b   :  { %v1597_v15 = vpop.permute.xlu1 %1596  ;;  %v1468_v16 = vpop.permute.xlu0 %1467 }
0x109c   :  { %v4511_v17 = vmul.f32 %v3984_v63, %v1468_v16  ;;  %3553 = vmatmul.mubr.msk.f32.vlgmr.msra.gmra.mrb[16].mxu0 %vm156_vm5, %v1597_v15 }
0x109d   :  { %3800 = vmatpush3.bf16.msra.mxu0 %v4247_v24  ;;  %3574 = vmatprep.mubr.msk.f32.mxu0 %vm4120_vm3, %v4119_v13 }
0x109e   :  { %v1516_v18 = vrot.slane %v4511_v17, 2  ;;  %3801 = vmatprep.subr.bf16.mxu0 %v4117_v5 }
0x10a0   :  { %1517 = vrot.lane.b32.xlu0 %v1516_v18, %s4122_s14 }
0x10a1   :  { %3803 = vmatpush3.bf16.msra.mxu0 %v4264_v28 }
0x10a2   :  { %3820 = vmatprep.subr.bf16.mxu0 %v4117_v5 }
0x1112   :  { %v1518_v19 = vpop.permute.xlu0 %1517 }
0x1113   :  { %3542 = vmatmul.mubr.msk.f32.vlgmr.msra.gmra.mrb[12].mxu1 %vm156_vm5, %v1518_v19 }
0x1114   :  { %3563 = vmatprep.mubr.msk.f32.mxu1 %vm4120_vm3, %v4119_v13  ;;  %3794 = vmatpush3.bf16.msra.mxu1 %v3793_v8  ;;  %v1982_v8 = vld [vmem:[%s4896_s5 + $0x58] sm:$0xff] }
0x1115   :  { %3795 = vmatprep.subr.bf16.mxu1 %v4117_v5  ;;  %v3812_v9 = vpack.c.bf16 %v1982_v8, %v1980_v7 }
0x1118   :  { %3797 = vmatpush3.bf16.msra.mxu1 %v3796_v12  ;;  %v1981_v12 = vld [vmem:[%s4896_s5 + $0x50] sm:$0xff] }
0x116f   :  { %v1666_v24 = vpop.f32.mrb[16].mxu0 }
0x1170   :  { %v1702_v21 = vrot.slane %v1666_v24, 6  ;;  %v3554_v53 = vpop.f32.mrb[17].mxu0 }
0x1172   :  { %v1704_v23 = vadd.f32 %v1702_v21, %v4295_v37 }
0x1174   :  { %3989 = vtanh.f32 %v1704_v23  ;;  %v3240_v26 = vmul.f32 -1.442695, %v1704_v23 }
0x1176   :  { %3991 = vpow2.f32 %v3240_v26 }
0x117e   :  { %v3990_v25 = vpop.eup %3989 }
0x117f   :  { %1717 = vrot.lane.b32.xlu1 %v3990_v25, %s4121_s4 }
0x1180   :  { %v3992_v28 = vpop.eup %3991 }
0x1181   :  { %v1708_v27 = vadd.f32 1.0, %v3992_v28 }
0x1183   :  { %3993 = vrcp.f32 %v1708_v27 }
0x118d   :  { %v3994_v39 = vpop.eup %3993 }
0x118e   :  { %v1715_v48 = vmul.f32 %v3994_v39, %v1713_v20 }
0x11e6   :  { %v1587_v32 = vpop.f32.mrb[12].mxu1 }
0x11e7   :  { %v1671_v33 = vrot.slane %v1587_v32, 4  ;;  %v3543_v35 = vpop.f32.mrb[13].mxu1 }
0x11e9   :  { %v1673_v38 = vadd.f32 %v1671_v33, %v4299_v42 }
0x11eb   :  { %3995 = vtanh.f32 %v1673_v38  ;;  %v3239_v44 = vmul.f32 -1.442695, %v1673_v38 }
0x11ed   :  { %3997 = vpow2.f32 %v3239_v44 }
0x11f1   :  { %v1718_v40 = vpop.permute.xlu1 %1717 }
0x11f2   :  { %v1720_v14 = vmul.f32 %v3994_v39, %v1718_v40 }
0x11f4   :  { %1722 = vrot.lane.b32.xlu1 %v1720_v14, %s4122_s14 }
0x11f5   :  { %v3996_v43 = vpop.eup %3995 }
0x11f6   :  { %1686 = vrot.lane.b32.xlu0 %v3996_v43, %s4121_s4 }
0x11f7   :  { %v3998_v46 = vpop.eup %3997 }
0x11f8   :  { %v1677_v47 = vadd.f32 1.0, %v3998_v46 }
0x11fa   :  { %3999 = vrcp.f32 %v1677_v47 }
0x1204   :  { %v4000_v52 = vpop.eup %3999 }
0x1205   :  { %v1684_v59 = vmul.f32 %v4000_v52, %v1682_v58  ;;  %v1971_v58 = vld [vmem:[%s4896_s5] sm:$0xff] }
0x1266   :  { %v1723_v49 = vpop.permute.xlu1 %1722 }
0x1267   :  { %v4531_v51 = vadd.f32 %v1723_v49, %v1715_v48 }
0x1268   :  { %v1687_v54 = vpop.permute.xlu0 %1686 }
0x1269   :  { %4001 = vtanh.f32 %v4531_v51  ;;  %v1689_v55 = vmul.f32 %v4000_v52, %v1687_v54 }
0x126b   :  { %1691 = vrot.lane.b32.xlu0 %v1689_v55, %s4122_s14 }
0x1273   :  { %v4002_v57 = vpop.eup %4001 }
0x1274   :  { %1728 = vrot.lane.b32.xlu1 %v4002_v57, %s4121_s4  ;;  %v1974_v57 = vld [vmem:[%s4896_s5 + $0x18] sm:$0xff] }
0x12dd   :  { %v1692_v60 = vpop.permute.xlu0 %1691 }
0x12de   :  { %v4537_v63 = vadd.f32 %v1692_v60, %v1684_v59  ;;  %v1973_v60 = vld [vmem:[%s4896_s5 + $0x10] sm:$0xff] }
0x12e0   :  { %4003 = vtanh.f32 %v4537_v63 }
0x12e6   :  { %v1729_v62 = vpop.permute.xlu1 %1728 }
0x12e7   :  { %v1731_v0 = vmul.f32 %v3994_v39, %v1729_v62  ;;  %v1978_v62 = vld [vmem:[%s4896_s5 + $0x38] sm:$0xff] }
0x12e9   :  { %v1825_v1 = vrot.slane %v1731_v0, 2 }
0x12ea   :  { %v4004_v3 = vpop.eup %4003 }
0x12eb   :  { %1826 = vrot.lane.b32.xlu1 %v1825_v1, %s4122_s14  ;;  %1697 = vrot.lane.b32.xlu0 %v4004_v3, %s4121_s4  ;;  %v1975_v3 = vld [vmem:[%s4896_s5 + $0x20] sm:$0xff] }
0x12ec   :  { %v3810_v6 = vpack.c.bf16 %v1977_v4, %v1975_v3  ;;  %v2156_v4 = vld [vmem:[%s4898_s7] sm:$0xff] }
0x135d   :  { %v1827_v45 = vpop.permute.xlu1 %1826  ;;  %v1698_v15 = vpop.permute.xlu0 %1697 }
0x135e   :  { %v4555_v16 = vmul.f32 %v4000_v52, %v1698_v15  ;;  %3575 = vmatmul.mubr.msk.f32.vlgmr.msra.gmra.mrb[18].mxu0 %vm156_vm5, %v1827_v45  ;;  %v2083_v15 = vld [vmem:[%s4897_s6 + $0x8] sm:$0xff] }
0x135f   :  { %3585 = vmatprep.mubr.msk.f32.mxu0 %vm4120_vm3, %v4119_v13 }
0x1360   :  { %v1746_v18 = vrot.slane %v4555_v16, 4 }
0x1362   :  { %1747 = vrot.lane.b32.xlu0 %v1746_v18, %s4122_s14  ;;  %v1912_v18 = vrot.slane %v4537_v63, 6  ;;  %v1983_v63 = vld [vmem:[%s4896_s5 + $0x60] sm:$0xff] }
0x1366   :  { %819 = vrot.lane.b32.xlu0 %v4397_v56, %s4122_s14 }
0x136a   :  { %1281 = vrot.lane.b32.xlu0 %v4468_v22, %s4121_s4 }
0x136e   :  { %1738 = vrot.lane.b32.xlu0 %v1731_v0, %s4121_s4  ;;  %v3806_v0 = vpack.c.bf16 %v1973_v60, %v1971_v58 }
0x13d4   :  { %v1748_v19 = vpop.permute.xlu0 %1747 }
0x13d5   :  { %3564 = vmatmul.mubr.msk.f32.vlgmr.msra.gmra.mrb[14].mxu1 %vm156_vm5, %v1748_v19 }
0x13d6   :  { %2070 = vmatprep.mubr.f32.mxu1 %v4119_v13 }
0x13d8   :  { %v820_v24 = vpop.permute.xlu0 %819 }
0x13d9   :  { %823 = vst.msk [vmem:[#allocation2] sm:$0x30] %vm822_vm7, %v820_v24  ;;  %v1984_v24 = vld [vmem:[%s4896_s5 + $0x68] sm:$0xff] }
0x13dc   :  { %v4578_v44 = vpop.permute.xlu0 %1281 }
0x13e0   :  { %v4582_v47 = vpop.permute.xlu0 %1738 }
0x1431   :  { %v1896_v21 = vpop.f32.mrb[18].mxu0 }
0x1432   :  { %v1931_v53 = vadd.f32 %v1896_v21, %v4295_v37  ;;  %v3576_v23 = vpop.f32.mrb[19].mxu0  ;;  %v1986_v21 = vld [vmem:[%s4896_s5 + $0x78] sm:$0xff] }
0x1433   :  { %v3816_v23 = vpack.c.bf16 %v1986_v21, %v1984_v24 }
0x1434   :  { %4005 = vtanh.f32 %v1931_v53  ;;  %v3244_v22 = vmul.f32 -1.442695, %v1931_v53 }
0x1436   :  { %4007 = vpow2.f32 %v3244_v22 }
0x143e   :  { %v4006_v56 = vpop.eup %4005 }
0x143f   :  { %1944 = vrot.lane.b32.xlu1 %v4006_v56, %s4121_s4  ;;  %v1985_v56 = vld [vmem:[%s4896_s5 + $0x70] sm:$0xff] }
0x1440   :  { %v4008_v25 = vpop.eup %4007 }
0x1441   :  { %v1935_v26 = vadd.f32 1.0, %v4008_v25  ;;  %v3818_v25 = vpack.c.bf16 %v1985_v56, %v1983_v63 }
0x1443   :  { %4009 = vrcp.f32 %v1935_v26  ;;  %v2084_v26 = vld [vmem:[%s4897_s6 + $0x10] sm:$0xff] }
0x144d   :  { %v4573_v35 = vpop.eup %4009 }
0x14a8   :  { %v1817_v28 = vpop.f32.mrb[14].mxu1 }
0x14a9   :  { %v1901_v27 = vrot.slane %v1817_v28, 2  ;;  %v3565_v32 = vpop.f32.mrb[15].mxu1  ;;  %v2085_v28 = vld [vmem:[%s4897_s6 + $0x18] sm:$0xff] }
0x14aa   :  { %v4661_v32 = vpack.c.bf16 %v2085_v28, %v2084_v26 }
0x14ab   :  { %v1903_v33 = vadd.f32 %v1901_v27, %v4299_v42  ;;  %v1940_v42 = vrot.slane %v4531_v51, 2  ;;  %v1972_v51 = vld [vmem:[%s4896_s5 + $0x8] sm:$0xff] }
0x14ac   :  { %v3804_v59 = vpack.c.bf16 %v1974_v57, %v1972_v51 }
0x14ad   :  { %4011 = vtanh.f32 %v1903_v33  ;;  %v3243_v40 = vmul.f32 -1.442695, %v1903_v33  ;;  %v1942_v46 = vmul.f32 %v4573_v35, %v1940_v42 }
0x14ae   :  { %3805 = vmatprep.subr.bf16.mxu1 %v3804_v59 }
0x14af   :  { %4013 = vpow2.f32 %v3243_v40  ;;  %3807 = vmatpush1.bf16.msra.mxu1 %v3806_v0 }
0x14b1   :  { %v1945_v38 = vpop.permute.xlu1 %1944 }
0x14b2   :  { %v1947_v37 = vmul.f32 %v4573_v35, %v1945_v38 }
0x14b4   :  { %1949 = vrot.lane.b32.xlu1 %v1947_v37, %s4122_s14 }
0x14b7   :  { %v4012_v39 = vpop.eup %4011 }
0x14b8   :  { %1916 = vrot.lane.b32.xlu0 %v4012_v39, %s4121_s4 }
0x14b9   :  { %v4014_v14 = vpop.eup %4013 }
0x14ba   :  { %v1907_v43 = vadd.f32 1.0, %v4014_v14 }
0x14bc   :  { %4015 = vrcp.f32 %v1907_v43 }
0x14c6   :  { %v4584_v49 = vpop.eup %4015 }
0x14c7   :  { %v1914_v53 = vmul.f32 %v4584_v49, %v1912_v18 }
0x1526   :  { %v1950_v20 = vpop.permute.xlu1 %1949 }
0x1527   :  { %v1952_v48 = vadd.f32 %v1950_v20, %v1942_v46 }
0x1529   :  { %4017 = vtanh.f32 %v1952_v48  ;;  %v4701_v48 = vld [vmem:[%s4899_s8] sm:$0x3] }
0x152a   :  { %v1917_v52 = vpop.permute.xlu0 %1916 }
0x152b   :  { %v1919_v54 = vmul.f32 %v4584_v49, %v1917_v52 }
0x152d   :  { %1921 = vrot.lane.b32.xlu0 %v1919_v54, %s4122_s14 }
0x1533   :  { %v4018_v55 = vpop.eup %4017 }
0x1534   :  { %1955 = vrot.lane.b32.xlu1 %v4018_v55, %s4121_s4 }
0x1538   :  { %587 = vrot.lane.b32.xlu1 %v4359_v2, %s4122_s14  ;;  %v1976_v2 = vld [vmem:[%s4896_s5 + $0x28] sm:$0xff] }
0x1539   :  { %v3808_v1 = vpack.c.bf16 %v1978_v62, %v1976_v2 }
0x153b   :  { %3809 = vmatprep.subr.bf16.mxu1 %v3808_v1 }
0x153c   :  { %1048 = vrot.lane.b32.xlu1 %v4440_v41, %s4122_s14  ;;  %3811 = vmatpush1.bf16.msra.mxu1 %v3810_v6  ;;  %v1979_v41 = vld [vmem:[%s4896_s5 + $0x40] sm:$0xff]  ;;  %v2157_v6 = vld [vmem:[%s4898_s7 + $0x8] sm:$0xff] }
0x153d   :  { %v3814_v45 = vpack.c.bf16 %v1981_v12, %v1979_v41  ;;  %3813 = vmatprep.subr.bf16.mxu1 %v3812_v9  ;;  %v3827_v8 = vpack.c.bf16 %v2157_v6, %v2156_v4  ;;  %v2158_v9 = vld [vmem:[%s4898_s7 + $0x10] sm:$0xff]  ;;  %v2159_v41 = vld [vmem:[%s4898_s7 + $0x18] sm:$0xff] }
0x153e   :  { %v3830_v12 = vpack.c.bf16 %v2159_v41, %v2158_v9 }
0x1540   :  { %1508 = vrot.lane.b32.xlu1 %v4506_v11, %s4121_s4  ;;  %v2082_v11 = vld [vmem:[%s4897_s6] sm:$0xff]  ;;  %3815 = vmatpush1.bf16.msra.mxu1 %v3814_v45 }
0x1541   :  { %v4638_v19 = vpack.c.bf16 %v2083_v15, %v2082_v11  ;;  %3817 = vmatprep.subr.bf16.mxu1 %v3816_v23 }
0x1543   :  { %3822 = vmatpush3.bf16.msra.mxu0 %v4638_v19 }
0x1544   :  { %3823 = vmatprep.subr.bf16.mxu0 %v4117_v5  ;;  %3819 = vmatpush1.bf16.msra.mxu1 %v3818_v25 }
0x1545   :  { %3832 = vmatprep.subr.bf16.mxu1 %v4117_v5 }
0x1547   :  { %3825 = vmatpush3.bf16.msra.mxu0 %v4661_v32 }
0x1548   :  { %3826 = vmatprep.subr.bf16.mxu0 %v4117_v5 }
0x154a   :  { %3586 = vmatmul.mubr.f32.vlgmr.msra.gmra.mrb[20].mxu0 %v4119_v13 }
0x154b   :  { %3596 = vmatprep.mubr.msk.f32.mxu0 %vm4120_vm3, %v4119_v13  ;;  %3828 = vmatpush3.bf16.msra.mxu0 %v3827_v8 }
0x154c   :  { %3829 = vmatprep.subr.bf16.mxu0 %v4117_v5 }
0x154f   :  { %3831 = vmatpush3.bf16.msra.mxu0 %v3830_v12 }
0x1550   :  { %3838 = vmatprep.subr.bf16.mxu0 %v4117_v5 }
0x1552   :  { %3597 = vmatmul.mubr.f32.vlgmr.msra.gmra.mrb[22].mxu0 %v4119_v13 }
0x1553   :  { %3840 = vmatpush3.bf16.msra.mxu0 %v4638_v19  ;;  %3618 = vmatprep.mubr.msk.f32.mxu0 %vm4120_vm3, %v4119_v13 }
0x1554   :  { %3841 = vmatprep.subr.bf16.mxu0 %v4117_v5 }
0x1557   :  { %3843 = vmatpush3.bf16.msra.mxu0 %v4661_v32 }
0x1558   :  { %3850 = vmatprep.subr.bf16.mxu0 %v4117_v5 }
0x159f   :  { %v1922_v22 = vpop.permute.xlu0 %1921 }
0x15a0   :  { %v1924_v27 = vadd.f32 %v1922_v22, %v1914_v53 }
0x15a2   :  { %4019 = vtanh.f32 %v1924_v27 }
0x15a6   :  { %v1956_v33 = vpop.permute.xlu1 %1955 }
0x15a7   :  { %v1958_v38 = vmul.f32 %v4573_v35, %v1956_v33 }
0x15a9   :  { %1965 = vrot.lane.b32.xlu1 %v1958_v38, %s4121_s4 }
0x15aa   :  { %v588_v37 = vpop.permute.xlu1 %587 }
0x15ab   :  { %591 = vst.msk [vmem:[#allocation2] sm:$0xc] %vm590_vm8, %v588_v37 }
0x15ac   :  { %v4020_v39 = vpop.eup %4019  ;;  %1741 = vst.msk [vmem:[#allocation2] sm:$0xc] %vm828_vm9, %v4582_v47 }
0x15ad   :  { %1927 = vrot.lane.b32.xlu0 %v4020_v39, %s4121_s4 }
0x15ae   :  { %v1049_v40 = vpop.permute.xlu1 %1048 }
0x15af   :  { %1052 = vst.msk [vmem:[#allocation2] sm:$0xc0] %vm1051_vm10, %v1049_v40 }
0x15b0   :  { %1284 = vst.msk [vmem:[#allocation2] sm:$0xc0] %vm367_vm11, %v4578_v44 }
0x15b1   :  { %364 = vrot.lane.b32.xlu0 %v4318_v10, %s4121_s4 }
0x15b2   :  { %v1509_v35 = vpop.permute.xlu1 %1508 }
0x15b3   :  { %1511 = vst.msk [vmem:[#allocation2] sm:$0x30] %vm596_vm12, %v1509_v35 }
0x15b5   :  { %825 = vrot.lane.b32.xlu0 %v4392_v50, %s4121_s4 }
0x15b9   :  { %1503 = vrot.lane.b32.xlu0 %v4511_v17, %s4122_s14 }
0x161b   :  { %v1966_v14 = vpop.permute.xlu1 %1965 }
0x161c   :  { %1968 = vst.msk [vmem:[#allocation2] sm:$0x3] %vm1057_vm13, %v1966_v14 }
0x161d   :  { %v2152_v46 = vpop.f32.mrb[20].mxu0 }
0x161e   :  { %v3587_v47 = vpop.f32.mrb[21].mxu0 }
0x161f   :  { %v1928_v43 = vpop.permute.xlu0 %1927 }
0x1620   :  { %v1930_v42 = vmul.f32 %v4584_v49, %v1928_v43  ;;  %v4706_v49 = vrot.slane %v4701_v48, %v53_v34 }
0x1622   :  { %1960 = vrot.lane.b32.xlu0 %v1930_v42, %s4122_s14 }
0x1623   :  { %v365_v10 = vpop.permute.xlu0 %364  ;;  %v1969_v44 = vld [vmem:[#allocation2] sm:$0xff] }
0x1624   :  { %368 = vst.msk [vmem:[#allocation2 + $0x8] sm:$0xc0] %vm367_vm11, %v365_v10  ;;  %3245 = vmatmul.mubr.msk.f32.vlgmr.msra.gmra.mrb[16].mxu1 %vm1999_vm14, %v1969_v44 }
0x1625   :  { %2075 = vmatprep.mubr.f32.mxu1 %v4119_v13  ;;  %3834 = vmatpush3.bf16.msra.mxu1 %v4638_v19  ;;  %v2226_v18 = vpop.f32.mrb[22].mxu0 }
0x1626   :  { %3835 = vmatprep.subr.bf16.mxu1 %v4117_v5  ;;  %v3598_v24 = vpop.f32.mrb[23].mxu0  ;;  %v2256_v23 = vrot.slane %v2226_v18, 2 }
0x1627   :  { %v826_v50 = vpop.permute.xlu0 %825 }
0x1628   :  { %829 = vst.msk [vmem:[#allocation2 + $0x8] sm:$0xc] %vm828_vm9, %v826_v50 }
0x1629   :  { %3837 = vmatpush3.bf16.msra.mxu1 %v4661_v32 }
0x162a   :  { %3844 = vmatprep.subr.bf16.mxu1 %v4117_v5 }
0x162b   :  { %v1504_v17 = vpop.permute.xlu0 %1503 }
0x162c   :  { %1506 = vst.msk [vmem:[#allocation2 + $0x8] sm:$0xc] %vm590_vm8, %v1504_v17 }
0x1694   :  { %v1961_v20 = vpop.permute.xlu0 %1960 }
0x1695   :  { %1963 = vst.msk [vmem:[#allocation2 + $0x8] sm:$0xc0] %vm1051_vm10, %v1961_v20 }
0x16f7   :  { %v2072_v52 = vpop.f32.mrb[16].mxu1 }
0x16f8   :  { %v4709_v54 = vadd.f32 %v2072_v52, %v4706_v49  ;;  %v2074_v55 = vpop.f32.mrb[17].mxu1 }
0x16fa   :  { %v2230_v51 = vadd.f32 %v2152_v46, %v4709_v54 }
0x16fc   :  { %4021 = vtanh.f32 %v2230_v51  ;;  %v3247_v58 = vmul.f32 -1.442695, %v2230_v51 }
0x16fe   :  { %4023 = vpow2.f32 %v3247_v58 }
0x1706   :  { %v4022_v57 = vpop.eup %4021 }
0x1707   :  { %2240 = vrot.lane.b32.xlu1 %v4022_v57, %s4121_s4 }
0x1708   :  { %v4024_v59 = vpop.eup %4023 }
0x1709   :  { %v2234_v60 = vadd.f32 1.0, %v4024_v59 }
0x170b   :  { %4025 = vrcp.f32 %v2234_v60 }
0x1715   :  { %v4026_v2 = vpop.eup %4025 }
0x1716   :  { %v2238_v0 = vmul.f32 0.0, %v4026_v2 }
0x1779   :  { %v2241_v62 = vpop.permute.xlu1 %2240 }
0x177a   :  { %v2243_v34 = vmul.f32 %v4026_v2, %v2241_v62 }
0x177c   :  { %2245 = vrot.lane.b32.xlu1 %v2243_v34, %s4122_s14 }
0x17ee   :  { %v2246_v1 = vpop.permute.xlu1 %2245 }
0x17ef   :  { %v4714_v3 = vadd.f32 %v2246_v1, %v2238_v0 }
0x17f1   :  { %4027 = vtanh.f32 %v4714_v3  ;;  %v2370_v35 = vrot.slane %v4714_v3, 6 }
0x17fb   :  { %v4028_v7 = vpop.eup %4027 }
0x17fc   :  { %2251 = vrot.lane.b32.xlu1 %v4028_v7, %s4121_s4 }
0x1800   :  { %593 = vrot.lane.b32.xlu1 %v4354_v61, %s4121_s4 }
0x1804   :  { %1054 = vrot.lane.b32.xlu1 %v4430_v36, %s4121_s4 }
0x1808   :  { %1733 = vrot.lane.b32.xlu1 %v4555_v16, %s4122_s14 }
0x186e   :  { %v2252_v61 = vpop.permute.xlu1 %2251 }
0x186f   :  { %v2254_v45 = vmul.f32 %v4026_v2, %v2252_v61 }
0x1871   :  { %2284 = vrot.lane.b32.xlu1 %v2254_v45, %s4122_s14 }
0x1872   :  { %v594_v36 = vpop.permute.xlu1 %593 }
0x1873   :  { %597 = vst.msk [vmem:[#allocation2 + $0x8] sm:$0x30] %vm596_vm12, %v594_v36 }
0x1876   :  { %v1055_v11 = vpop.permute.xlu1 %1054 }
0x1877   :  { %1058 = vst.msk [vmem:[#allocation2 + $0x8] sm:$0x3] %vm1057_vm13, %v1055_v11 }
0x1878   :  { %1279 = vst.msk [vmem:[#allocation2 + $0x8] sm:$0x3] %vm361_vm6, %v4481_v29  ;;  %v1996_v29 = vrot.slane %v4701_v48, %v57_v31 }
0x187a   :  { %v1734_v15 = vpop.permute.xlu1 %1733 }
0x187b   :  { %1736 = vst.msk [vmem:[#allocation2 + $0x8] sm:$0x30] %vm822_vm7, %v1734_v15 }
0x1882   :  { %v1970_v16 = vld [vmem:[#allocation2 + $0x8] sm:$0xff] }
0x1883   :  { %3246 = vmatmul.mubr.msk.f32.gmra.mrb[18].mxu1 %vm1999_vm14, %v1970_v16 }
0x1884   :  { %3607 = vmatprep.mubr.msk.f32.mxu1 %vm4120_vm3, %v4119_v13 }
0x18e3   :  { %v2285_v21 = vpop.permute.xlu1 %2284 }
0x18e4   :  { %3608 = vmatmul.mubr.msk.f32.vlgmr.msra.gmra.mrb[20].mxu1 %vm156_vm5, %v2285_v21 }
0x18e5   :  { %3846 = vmatpush3.bf16.msra.mxu1 %v4638_v19  ;;  %3629 = vmatprep.mubr.msk.f32.mxu1 %vm4120_vm3, %v4119_v13 }
0x18e6   :  { %3847 = vmatprep.subr.bf16.mxu1 %v4117_v5 }
0x18e9   :  { %3849 = vmatpush3.bf16.msra.mxu1 %v4661_v32 }
0x18ea   :  { %3856 = vmatprep.subr.bf16.mxu1 %v4117_v5 }
0x1956   :  { %v4764_v53 = vpop.f32.mrb[18].mxu1 }
0x1957   :  { %v2079_v63 = vpop.f32.mrb[19].mxu1 }
0x1958   :  { %v2080_v56 = vadd.f32 %v2079_v63, %v1996_v29 }
0x195a   :  { %v4766_v22 = vadd.f32 %v2256_v23, %v2080_v56 }
0x19b7   :  { %v2354_v25 = vpop.f32.mrb[20].mxu1 }
0x19b8   :  { %v2359_v26 = vrot.slane %v2354_v25, 6  ;;  %v3609_v28 = vpop.f32.mrb[21].mxu1 }
0x19ba   :  { %v2361_v27 = vadd.f32 %v2359_v26, %v4709_v54 }
0x19bc   :  { %4029 = vtanh.f32 %v2361_v27  ;;  %v3250_v38 = vmul.f32 -1.442695, %v2361_v27  ;;  %v4807_v27 = vadd.f32 %v4764_v53, %v4706_v49 }
0x19be   :  { %4031 = vpow2.f32 %v3250_v38 }
0x19c6   :  { %v4030_v33 = vpop.eup %4029 }
0x19c7   :  { %2374 = vrot.lane.b32.xlu0 %v4030_v33, %s4121_s4 }
0x19c8   :  { %v4032_v30 = vpop.eup %4031 }
0x19c9   :  { %v2365_v31 = vadd.f32 1.0, %v4032_v30 }
0x19cb   :  { %4033 = vrcp.f32 %v2365_v31 }
0x19d5   :  { %v4034_v37 = vpop.eup %4033 }
0x19d6   :  { %v2372_v14 = vmul.f32 %v4034_v37, %v2370_v35 }
0x1a39   :  { %v2375_v39 = vpop.permute.xlu0 %2374 }
0x1a3a   :  { %v2377_v40 = vmul.f32 %v4034_v37, %v2375_v39 }
0x1a3c   :  { %2379 = vrot.lane.b32.xlu1 %v2377_v40, %s4122_s14 }
0x1aae   :  { %v2380_v43 = vpop.permute.xlu1 %2379 }
0x1aaf   :  { %v2382_v42 = vadd.f32 %v2380_v43, %v2372_v14 }
0x1ab1   :  { %4035 = vtanh.f32 %v2382_v42  ;;  %v2477_v62 = vrot.slane %v2382_v42, 6 }
0x1abb   :  { %v4036_v10 = vpop.eup %4035 }
0x1abc   :  { %2385 = vrot.lane.b32.xlu0 %v4036_v10, %s4121_s4 }
0x1b2e   :  { %v2386_v44 = vpop.permute.xlu0 %2385 }
0x1b2f   :  { %v2388_v50 = vmul.f32 %v4034_v37, %v2386_v44 }
0x1b31   :  { %v2390_v17 = vrot.slane %v2388_v50, 2 }
0x1b33   :  { %2391 = vrot.lane.b32.xlu1 %v2390_v17, %s4122_s14 }
0x1ba5   :  { %v2392_v46 = vpop.permute.xlu1 %2391 }
0x1ba6   :  { %3619 = vmatmul.mubr.msk.f32.vlgmr.msra.gmra.mrb[24].mxu0 %vm156_vm5, %v2392_v46 }
0x1ba7   :  { %3852 = vmatpush3.bf16.msra.mxu0 %v4638_v19  ;;  %3640 = vmatprep.mubr.msk.f32.mxu0 %vm4120_vm3, %v4119_v13 }
0x1ba8   :  { %3853 = vmatprep.subr.bf16.mxu0 %v4117_v5 }
0x1bab   :  { %3855 = vmatpush3.bf16.msra.mxu0 %v4661_v32 }
0x1bac   :  { %3862 = vmatprep.subr.bf16.mxu0 %v4117_v5 }
0x1c79   :  { %v2461_v47 = vpop.f32.mrb[24].mxu0 }
0x1c7a   :  { %v2466_v20 = vrot.slane %v2461_v47, 4  ;;  %v3620_v48 = vpop.f32.mrb[25].mxu0 }
0x1c7c   :  { %v2468_v52 = vadd.f32 %v2466_v20, %v4709_v54 }
0x1c7e   :  { %4037 = vtanh.f32 %v2468_v52  ;;  %v3252_v51 = vmul.f32 -1.442695, %v2468_v52 }
0x1c80   :  { %4039 = vpow2.f32 %v3252_v51 }
0x1c88   :  { %v4038_v55 = vpop.eup %4037 }
0x1c89   :  { %2481 = vrot.lane.b32.xlu0 %v4038_v55, %s4121_s4 }
0x1c8a   :  { %v4040_v57 = vpop.eup %4039 }
0x1c8b   :  { %v2472_v58 = vadd.f32 1.0, %v4040_v57 }
0x1c8d   :  { %4041 = vrcp.f32 %v2472_v58 }
0x1c97   :  { %v4042_v59 = vpop.eup %4041 }
0x1c98   :  { %v2479_v34 = vmul.f32 %v4042_v59, %v2477_v62 }
0x1cfb   :  { %v2482_v60 = vpop.permute.xlu0 %2481 }
0x1cfc   :  { %v2484_v2 = vmul.f32 %v4042_v59, %v2482_v60 }
0x1cfe   :  { %2486 = vrot.lane.b32.xlu1 %v2484_v2, %s4122_s14 }
0x1d70   :  { %v2487_v0 = vpop.permute.xlu1 %2486 }
0x1d71   :  { %v2489_v1 = vadd.f32 %v2487_v0, %v2479_v34 }
0x1d73   :  { %4043 = vtanh.f32 %v2489_v1  ;;  %v2584_v21 = vrot.slane %v2489_v1, 6 }
0x1d7d   :  { %v4044_v3 = vpop.eup %4043 }
0x1d7e   :  { %2492 = vrot.lane.b32.xlu0 %v4044_v3, %s4121_s4 }
0x1df0   :  { %v2493_v4 = vpop.permute.xlu0 %2492 }
0x1df1   :  { %v2495_v6 = vmul.f32 %v4042_v59, %v2493_v4 }
0x1df3   :  { %v2497_v7 = vrot.slane %v2495_v6, 4 }
0x1df5   :  { %2498 = vrot.lane.b32.xlu1 %v2497_v7, %s4122_s14 }
0x1e67   :  { %v2499_v8 = vpop.permute.xlu1 %2498 }
0x1e68   :  { %3630 = vmatmul.mubr.msk.f32.vlgmr.msra.gmra.mrb[22].mxu1 %vm156_vm5, %v2499_v8 }
0x1e69   :  { %3858 = vmatpush3.bf16.msra.mxu1 %v4638_v19  ;;  %3651 = vmatprep.mubr.msk.f32.mxu1 %vm4120_vm3, %v4119_v13 }
0x1e6a   :  { %3859 = vmatprep.subr.bf16.mxu1 %v4117_v5 }
0x1e6d   :  { %3861 = vmatpush3.bf16.msra.mxu1 %v4661_v32 }
0x1e6e   :  { %3868 = vmatprep.subr.bf16.mxu1 %v4117_v5 }
0x1f3b   :  { %v2568_v9 = vpop.f32.mrb[22].mxu1 }
0x1f3c   :  { %v2573_v41 = vrot.slane %v2568_v9, 2  ;;  %v3631_v12 = vpop.f32.mrb[23].mxu1 }
0x1f3e   :  { %v2575_v61 = vadd.f32 %v2573_v41, %v4709_v54 }
0x1f40   :  { %4045 = vtanh.f32 %v2575_v61  ;;  %v3254_v36 = vmul.f32 -1.442695, %v2575_v61 }
0x1f42   :  { %4047 = vpow2.f32 %v3254_v36 }
0x1f4a   :  { %v4046_v45 = vpop.eup %4045 }
0x1f4b   :  { %2588 = vrot.lane.b32.xlu0 %v4046_v45, %s4121_s4 }
0x1f4c   :  { %v4048_v11 = vpop.eup %4047 }
0x1f4d   :  { %v2579_v15 = vadd.f32 1.0, %v4048_v11 }
0x1f4f   :  { %4049 = vrcp.f32 %v2579_v15 }
0x1f59   :  { %v4050_v16 = vpop.eup %4049 }
0x1f5a   :  { %v2586_v29 = vmul.f32 %v4050_v16, %v2584_v21 }
0x1fbd   :  { %v2589_v18 = vpop.permute.xlu0 %2588 }
0x1fbe   :  { %v2591_v24 = vmul.f32 %v4050_v16, %v2589_v18 }
0x1fc0   :  { %2593 = vrot.lane.b32.xlu1 %v2591_v24, %s4122_s14 }
0x2032   :  { %v2594_v23 = vpop.permute.xlu1 %2593 }
0x2033   :  { %v2596_v63 = vadd.f32 %v2594_v23, %v2586_v29 }
0x2035   :  { %4051 = vtanh.f32 %v2596_v63  ;;  %v2688_v49 = vrot.slane %v2596_v63, 6 }
0x203f   :  { %v4052_v54 = vpop.eup %4051 }
0x2040   :  { %2599 = vrot.lane.b32.xlu0 %v4052_v54, %s4121_s4  ;;  %v3248_v54 = vmul.f32 -1.442695, %v4766_v22 }
0x20b2   :  { %v2600_v56 = vpop.permute.xlu0 %2599 }
0x20b3   :  { %v2602_v25 = vmul.f32 %v4050_v16, %v2600_v56 }
0x20b5   :  { %v2604_v26 = vrot.slane %v2602_v25, 6 }
0x20b7   :  { %2605 = vrot.lane.b32.xlu1 %v2604_v26, %s4122_s14 }
0x2129   :  { %v2606_v28 = vpop.permute.xlu1 %2605 }
0x212a   :  { %3641 = vmatmul.mubr.msk.f32.vlgmr.msra.gmra.mrb[26].mxu0 %vm156_vm5, %v2606_v28 }
0x212b   :  { %3864 = vmatpush3.bf16.msra.mxu0 %v4638_v19  ;;  %3662 = vmatprep.mubr.msk.f32.mxu0 %vm4120_vm3, %v4119_v13 }
0x212c   :  { %3865 = vmatprep.subr.bf16.mxu0 %v4117_v5 }
0x212f   :  { %3867 = vmatpush3.bf16.msra.mxu0 %v4661_v32 }
0x2130   :  { %3874 = vmatprep.subr.bf16.mxu0 %v4117_v5 }
0x21fd   :  { %v2675_v33 = vpop.f32.mrb[26].mxu0 }
0x21fe   :  { %v2679_v38 = vadd.f32 %v2675_v33, %v4807_v27  ;;  %v3642_v30 = vpop.f32.mrb[27].mxu0 }
0x2200   :  { %4053 = vtanh.f32 %v2679_v38  ;;  %v3256_v37 = vmul.f32 -1.442695, %v2679_v38 }
0x2202   :  { %4055 = vpow2.f32 %v3256_v37 }
0x220a   :  { %v4054_v31 = vpop.eup %4053 }
0x220b   :  { %2692 = vrot.lane.b32.xlu0 %v4054_v31, %s4121_s4 }
0x220c   :  { %v4056_v39 = vpop.eup %4055 }
0x220d   :  { %v2683_v40 = vadd.f32 1.0, %v4056_v39 }
0x220f   :  { %4057 = vrcp.f32 %v2683_v40 }
0x2219   :  { %v4058_v35 = vpop.eup %4057 }
0x221a   :  { %v2690_v53 = vmul.f32 %v4058_v35, %v2688_v49  ;;  %v3033_v49 = vld [vmem:[%s4900_s9 + $0x30] sm:$0xff] }
0x227d   :  { %v2693_v14 = vpop.permute.xlu0 %2692 }
0x227e   :  { %v2695_v43 = vmul.f32 %v4058_v35, %v2693_v14  ;;  %v3031_v14 = vld [vmem:[%s4900_s9 + $0x20] sm:$0xff] }
0x2280   :  { %2697 = vrot.lane.b32.xlu1 %v2695_v43, %s4122_s14  ;;  %v3032_v43 = vld [vmem:[%s4900_s9 + $0x28] sm:$0xff] }
0x22f2   :  { %v2698_v42 = vpop.permute.xlu1 %2697 }
0x22f3   :  { %v2700_v10 = vadd.f32 %v2698_v42, %v2690_v53  ;;  %v3875_v53 = vpack.c.bf16 %v3032_v43, %v3031_v14 }
0x22f5   :  { %4059 = vtanh.f32 %v2700_v10 }
0x22ff   :  { %v4060_v44 = vpop.eup %4059 }
0x2300   :  { %2703 = vrot.lane.b32.xlu0 %v4060_v44, %s4121_s4 }
0x2372   :  { %v2704_v50 = vpop.permute.xlu0 %2703 }
0x2373   :  { %v2706_v17 = vmul.f32 %v4058_v35, %v2704_v50 }
0x2375   :  { %2708 = vrot.lane.b32.xlu1 %v2706_v17, %s4122_s14 }
0x23e7   :  { %v2709_v46 = vpop.permute.xlu1 %2708 }
0x23e8   :  { %3652 = vmatmul.mubr.msk.f32.vlgmr.msra.gmra.mrb[24].mxu1 %vm156_vm5, %v2709_v46 }
0x23e9   :  { %3870 = vmatpush3.bf16.msra.mxu1 %v4638_v19  ;;  %3673 = vmatprep.mubr.msk.f32.mxu1 %vm4120_vm3, %v4119_v13 }
0x23ea   :  { %3871 = vmatprep.subr.bf16.mxu1 %v4117_v5 }
0x23ed   :  { %3873 = vmatpush3.bf16.msra.mxu1 %v4661_v32  ;;  %v2794_v32 = vrot.slane %v2700_v10, 6 }
0x23ee   :  { %3880 = vmatprep.subr.bf16.mxu1 %v4117_v5 }
0x24bb   :  { %v2778_v47 = vpop.f32.mrb[24].mxu1 }
0x24bc   :  { %v2783_v20 = vrot.slane %v2778_v47, 6  ;;  %v3653_v48 = vpop.f32.mrb[25].mxu1 }
0x24be   :  { %v2785_v52 = vadd.f32 %v2783_v20, %v4807_v27 }
0x24c0   :  { %4061 = vtanh.f32 %v2785_v52  ;;  %v3258_v51 = vmul.f32 -1.442695, %v2785_v52 }
0x24c2   :  { %4063 = vpow2.f32 %v3258_v51 }
0x24ca   :  { %v4062_v55 = vpop.eup %4061 }
0x24cb   :  { %2798 = vrot.lane.b32.xlu0 %v4062_v55, %s4121_s4 }
0x24cc   :  { %v4064_v19 = vpop.eup %4063 }
0x24cd   :  { %v2789_v57 = vadd.f32 1.0, %v4064_v19 }
0x24cf   :  { %4065 = vrcp.f32 %v2789_v57 }
0x24d9   :  { %v4066_v58 = vpop.eup %4065 }
0x24da   :  { %v2796_v2 = vmul.f32 %v4066_v58, %v2794_v32 }
0x253d   :  { %v2799_v59 = vpop.permute.xlu0 %2798 }
0x253e   :  { %v2801_v60 = vmul.f32 %v4066_v58, %v2799_v59 }
0x2540   :  { %2803 = vrot.lane.b32.xlu1 %v2801_v60, %s4122_s14 }
0x25b2   :  { %v2804_v62 = vpop.permute.xlu1 %2803 }
0x25b3   :  { %v2806_v34 = vadd.f32 %v2804_v62, %v2796_v2 }
0x25b5   :  { %4067 = vtanh.f32 %v2806_v34  ;;  %v2901_v18 = vrot.slane %v2806_v34, 6 }
0x25bf   :  { %v4068_v0 = vpop.eup %4067 }
0x25c0   :  { %2809 = vrot.lane.b32.xlu0 %v4068_v0, %s4121_s4  ;;  %v3027_v0 = vld [vmem:[%s4900_s9] sm:$0xff] }
0x2632   :  { %v2810_v1 = vpop.permute.xlu0 %2809 }
0x2633   :  { %v2812_v3 = vmul.f32 %v4066_v58, %v2810_v1  ;;  %v3028_v1 = vld [vmem:[%s4900_s9 + $0x8] sm:$0xff] }
0x2635   :  { %v2814_v4 = vrot.slane %v2812_v3, 2  ;;  %v3029_v3 = vld [vmem:[%s4900_s9 + $0x10] sm:$0xff] }
0x2637   :  { %2815 = vrot.lane.b32.xlu1 %v2814_v4, %s4122_s14  ;;  %v3881_v4 = vpack.c.bf16 %v3028_v1, %v3027_v0 }
0x26a9   :  { %v2816_v6 = vpop.permute.xlu1 %2815 }
0x26aa   :  { %3663 = vmatmul.mubr.msk.f32.vlgmr.msra.gmra.mrb[28].mxu0 %vm156_vm5, %v2816_v6  ;;  %v3030_v6 = vld [vmem:[%s4900_s9 + $0x18] sm:$0xff] }
0x26ab   :  { %3684 = vmatprep.mubr.msk.f32.mxu0 %vm4120_vm3, %v4119_v13  ;;  %3876 = vmatpush3.bf16.msra.mxu0 %v3875_v53 }
0x26ac   :  { %3877 = vmatprep.subr.bf16.mxu0 %v4117_v5 }
0x277d   :  { %v2885_v7 = vpop.f32.mrb[28].mxu0 }
0x277e   :  { %v2890_v8 = vrot.slane %v2885_v7, 4  ;;  %v3664_v9 = vpop.f32.mrb[29].mxu0  ;;  %v3884_v7 = vpack.c.bf16 %v3030_v6, %v3029_v3 }
0x2780   :  { %v2892_v41 = vadd.f32 %v2890_v8, %v4807_v27 }
0x2782   :  { %4069 = vtanh.f32 %v2892_v41  ;;  %v3260_v61 = vmul.f32 -1.442695, %v2892_v41 }
0x2784   :  { %4071 = vpow2.f32 %v3260_v61 }
0x278c   :  { %v4070_v12 = vpop.eup %4069 }
0x278d   :  { %2905 = vrot.lane.b32.xlu0 %v4070_v12, %s4121_s4 }
0x278e   :  { %v4072_v45 = vpop.eup %4071 }
0x278f   :  { %v2896_v36 = vadd.f32 1.0, %v4072_v45 }
0x2791   :  { %4073 = vrcp.f32 %v2896_v36  ;;  %v3265_v36 = vld [vmem:[%s4901_s10] ss:$0 sm:$0xff] }
0x279b   :  { %v4074_v11 = vpop.eup %4073 }
0x279c   :  { %v2903_v24 = vmul.f32 %v4074_v11, %v2901_v18 }
0x27ff   :  { %v2906_v15 = vpop.permute.xlu0 %2905 }
0x2800   :  { %v2908_v16 = vmul.f32 %v4074_v11, %v2906_v15 }
0x2802   :  { %2910 = vrot.lane.b32.xlu1 %v2908_v16, %s4122_s14 }
0x2874   :  { %v2911_v21 = vpop.permute.xlu1 %2910 }
0x2875   :  { %v2913_v29 = vadd.f32 %v2911_v21, %v2903_v24 }
0x2877   :  { %4075 = vtanh.f32 %v2913_v29  ;;  %v3008_v60 = vrot.slane %v2913_v29, 6 }
0x2878   :  { %4077 = vtanh.f32 %v4766_v22 }
0x2879   :  { %4079 = vpow2.f32 %v3248_v54 }
0x2881   :  { %v4076_v23 = vpop.eup %4075 }
0x2882   :  { %2916 = vrot.lane.b32.xlu0 %v4076_v23, %s4121_s4  ;;  %v4078_v63 = vpop.eup %4077 }
0x2883   :  { %v4080_v56 = vpop.eup %4079 }
0x2884   :  { %v2262_v25 = vadd.f32 1.0, %v4080_v56 }
0x2886   :  { %2268 = vrot.lane.b32.xlu0 %v4078_v63, %s4121_s4  ;;  %4081 = vrcp.f32 %v2262_v25 }
0x2890   :  { %v4082_v38 = vpop.eup %4081 }
0x2891   :  { %v2266_v39 = vmul.f32 0.0, %v4082_v38 }
0x28f4   :  { %v2917_v26 = vpop.permute.xlu0 %2916 }
0x28f5   :  { %v2919_v28 = vmul.f32 %v4074_v11, %v2917_v26 }
0x28f7   :  { %v2921_v33 = vrot.slane %v2919_v28, 4 }
0x28f8   :  { %v2269_v30 = vpop.permute.xlu0 %2268 }
0x28f9   :  { %v2271_v31 = vmul.f32 %v4082_v38, %v2269_v30  ;;  %2922 = vrot.lane.b32.xlu1 %v2921_v33, %s4122_s14 }
0x28fb   :  { %2273 = vrot.lane.b32.xlu0 %v2271_v31, %s4122_s14 }
0x296b   :  { %v2923_v37 = vpop.permute.xlu1 %2922 }
0x296c   :  { %3674 = vmatmul.mubr.msk.f32.vlgmr.msra.gmra.mrb[26].mxu1 %vm156_vm5, %v2923_v37 }
0x296d   :  { %v2274_v40 = vpop.permute.xlu0 %2273  ;;  %3695 = vmatprep.mubr.msk.f32.mxu1 %vm4120_vm3, %v4119_v13  ;;  %v3034_v13 = vld [vmem:[%s4900_s9 + $0x38] sm:$0xff]  ;;  %3882 = vmatpush3.bf16.msra.mxu1 %v3881_v4  ;;  %s4123_s9 = smov [#allocation3]  }
0x296e   :  { %v2276_v22 = vadd.f32 %v2274_v40, %v2266_v39  ;;  %v3878_v42 = vpack.c.bf16 %v3034_v13, %v3033_v49  ;;  %3883 = vmatprep.subr.bf16.mxu1 %v4117_v5  ;;  %s3203_s8 = sshll.u32 %s4123_s9, 4  ;;  %s3204_s8 = int_to_ptr.vmem [resolvable:$true] %s3203_s8 }
0x296f   :  { %p4098_p1 = scmp.lt.s32.totalorder %s3204_s8, %s3204_s8 }
0x2970   :  { %4083 = vtanh.f32 %v2276_v22  ;;  %3879 = vmatpush3.bf16.msra.mxu0 %v3878_v42 }
0x2971   :  { %3885 = vmatpush3.bf16.msra.mxu1 %v3884_v7 }
0x297a   :  { %v4084_v35 = vpop.eup %4083 }
0x297b   :  { %2279 = vrot.lane.b32.xlu0 %v4084_v35, %s4121_s4 }
0x29ed   :  { %v2280_v10 = vpop.permute.xlu0 %2279 }
0x29ee   :  { %v2282_v44 = vmul.f32 %v4082_v38, %v2280_v10 }
0x29f0   :  { %v3036_v50 = vrot.slane %v2282_v44, 6 }
0x29f2   :  { %3037 = vrot.lane.b32.xlu0 %v3036_v50, %s4122_s14 }
0x2a3f   :  { %v2992_v17 = vpop.f32.mrb[26].mxu1 }
0x2a40   :  { %v2997_v46 = vrot.slane %v2992_v17, 2  ;;  %v3675_v47 = vpop.f32.mrb[27].mxu1 }
0x2a42   :  { %v2999_v20 = vadd.f32 %v2997_v46, %v4807_v27 }
0x2a44   :  { %4085 = vtanh.f32 %v2999_v20  ;;  %v3262_v55 = vmul.f32 -1.442695, %v2999_v20 }
0x2a46   :  { %4087 = vpow2.f32 %v3262_v55 }
0x2a4e   :  { %v4086_v48 = vpop.eup %4085 }
0x2a4f   :  { %3012 = vrot.lane.b32.xlu1 %v4086_v48, %s4121_s4 }
0x2a50   :  { %v4088_v51 = vpop.eup %4087 }
0x2a51   :  { %v3003_v19 = vadd.f32 1.0, %v4088_v51 }
0x2a53   :  { %4089 = vrcp.f32 %v3003_v19 }
0x2a5d   :  { %v4090_v57 = vpop.eup %4089 }
0x2a5e   :  { %v3010_v32 = vmul.f32 %v4090_v57, %v3008_v60 }
0x2a64   :  { %v3038_v52 = vpop.permute.xlu0 %3037 }
0x2a65   :  { %3685 = vmatmul.mubr.msk.f32.vlgmr.msra.gmra.mrb[30].mxu0 %vm156_vm5, %v3038_v52 }
0x2ac1   :  { %v3013_v58 = vpop.permute.xlu1 %3012 }
0x2ac2   :  { %v3015_v59 = vmul.f32 %v4090_v57, %v3013_v58 }
0x2ac4   :  { %3017 = vrot.lane.b32.xlu1 %v3015_v59, %s4122_s14 }
0x2b36   :  { %v3018_v27 = vpop.permute.xlu1 %3017 }
0x2b37   :  { %v3020_v2 = vadd.f32 %v3018_v27, %v3010_v32 }
0x2b38   :  { %v3107_v62 = vpop.f32.mrb[30].mxu0 }
0x2b39   :  { %4091 = vtanh.f32 %v3020_v2  ;;  %v3686_v34 = vpop.f32.mrb[31].mxu0 }
0x2b43   :  { %v4092_v8 = vpop.eup %4091 }
0x2b44   :  { %3023 = vrot.lane.b32.xlu1 %v4092_v8, %s4121_s4  ;;  %s4093_s4 = scalar_lea.vmem %s3204_s8, 32 }
0x2b45   :  { %p4094_p0 = scmp.ne.s32.totalorder %s3204_s8, %s4093_s4  ;;  %p4099_p2 = scmp.lt.s32.totalorder %s4093_s4, %s4093_s4 }
0x2b47   :  { %p4100_p3 = por %p4099_p2, %p4098_p1 }
0x2b49   :  { %p4101_p4 = pnand %p4100_p3, %p4094_p0 }
0x2bb6   :  { %v3024_v9 = vpop.permute.xlu1 %3023 }
0x2bb7   :  { %v3026_v41 = vmul.f32 %v4090_v57, %v3024_v9 }
0x2bb9   :  { %v3112_v12 = vrot.slane %v3026_v41, 6 }
0x2bbb   :  { %3113 = vrot.lane.b32.xlu1 %v3112_v12, %s4122_s14 }
0x2c2d   :  { %v3114_v61 = vpop.permute.xlu1 %3113 }
0x2c2e   :  { %3696 = vmatmul.mubr.msk.f32.vlgmr.msra.gmra.mrb[28].mxu1 %vm156_vm5, %v3114_v61 }
0x2d01   :  { %v3183_v45 = vpop.f32.mrb[28].mxu1 }
0x2d02   :  { %v3184_v5 = vadd.f32 %v3183_v45, %v3107_v62  ;;  %v3697_v11 = vpop.f32.mrb[29].mxu1 }
0x2d04   :  { %v3194_v15 = vadd.f32 %v3265_v36, %v3184_v5 }
0x2d06   :  { %3196 = vst.msk [vmem:[#allocation3] sm:$0x3] %vm3195_vm15, %v3194_v15 }
0x2d07   :  { %4104 = shalt.err (!%p4101_p4)
}
0x2d08   :  { %s4105_s20 = scalar_lea.hbm %s4902_s11, 32 }
0x2d09   :  { %p4106_p5 = scmp.ne.s32.totalorder %s4902_s11, %s4105_s20  ;;  %p4109_p6 = scmp.lt.u32.totalorder %s4105_s20, %s4902_s11 }
0x2d0b   :  { %p4111_p7 = pnand %p4109_p6, %p4106_p5 }
0x2d0d   :  { %4114 = shalt.err (!%p4111_p7)
}
0x2d0e   :  { %3206 = dma.vmem_to_hbm [thread:$0]  %s3204_s8, 32, %s4902_s11, [#allocation4]  }
0x2d0f   :  { %4115 = dma.done.wait [#allocation4], 32  }
0x2d10   :  { %4116 = vsyncadd [#allocation4], 4294967264 }
0x2d11   :  { %3210 = vsyncpa [#allocation4], 1 }

</bundles_post_ra>
